<compile_context>
chip_gen: v6e
topology: v6e:2x2x1
jax: 0.10.0
libtpu: 0.0.40
codegen_flags: <defaults>
</compile_context>

<pallas_src>
import jax
import jax.numpy as jnp
from jax.experimental import pallas as pl
from jax.experimental.pallas import tpu as pltpu

EPS = 1e-5


def _bn_kernel(x_ref, w_ref, b_ref, o_ref):
    # x_ref: (N, tc, HW)   w_ref/b_ref: (1, tc, 1)   o_ref: (N, tc, HW)
    x = x_ref[...].astype(jnp.float32)
    inv_n = 1.0 / (x.shape[0] * x.shape[2])

    # One-pass per-channel statistics (fp32).  Lane-axis reduction first (XLU),
    # then the cheap leading-batch reduction (VPU).
    s = jnp.sum(jnp.sum(x, axis=2, keepdims=True), axis=0, keepdims=True)       # (1, tc, 1)
    ss = jnp.sum(jnp.sum(x * x, axis=2, keepdims=True), axis=0, keepdims=True)  # (1, tc, 1)
    mean = s * inv_n
    var = jnp.maximum(ss * inv_n - mean * mean, 0.0)   # biased var; clamp tiny negatives

    scale = w_ref[...].astype(jnp.float32) * jax.lax.rsqrt(var + EPS)           # (1, tc, 1)
    shift = b_ref[...].astype(jnp.float32) - mean * scale                       # (1, tc, 1)

    # Single FMA pass over the slab.
    o_ref[...] = (x * scale + shift).astype(o_ref.dtype)


def _choose_block_c(C, N, hw, itemsize, vmem_budget=12 * 1024 * 1024):
    """Largest channel tile (divisor of C, multiple of 8 or == C) whose
    double-buffered in+out blocks fit a conservative VMEM budget."""
    hw_pad = max(pl.cdiv(hw, 128) * 128, 128)      # account for lane padding
    per_c = N * hw_pad * itemsize * 2 * 2          # (in + out) x double-buffered
    fallback = C
    for tc in range(C, 0, -1):
        if C % tc:
            continue
        if tc != C and tc % 8:
            continue
        if tc * per_c <= vmem_budget:
            return tc
        fallback = tc                               # smallest legal divisor so far
    return fallback


def batchnorm2d(x, weight, bias):
    """x: (N, C, H, W); weight/bias: (C,).  Training-mode BatchNorm2d forward."""
    N, C, H, W = x.shape
    hw = H * W

    # Free, layout-preserving views (no HBM copies).
    x3 = x.reshape(N, C, hw)
    w3 = weight.reshape(1, C, 1)
    b3 = bias.reshape(1, C, 1)

    tc = _choose_block_c(C, N, hw, x.dtype.itemsize)
    grid = (C // tc,)

    cost = pl.CostEstimate(
        flops=6 * N * C * hw,
        transcendentals=C,
        bytes_accessed=2 * N * C * hw * x.dtype.itemsize + 2 * C * weight.dtype.itemsize,
    )

    y3 = pl.pallas_call(
        _bn_kernel,
        out_shape=jax.ShapeDtypeStruct((N, C, hw), x.dtype),
        grid=grid,
        in_specs=[
            pl.BlockSpec((N, tc, hw), lambda i: (0, i, 0)),
            pl.BlockSpec((1, tc, 1), lambda i: (0, i, 0)),
            pl.BlockSpec((1, tc, 1), lambda i: (0, i, 0)),
        ],
        out_specs=pl.BlockSpec((N, tc, hw), lambda i: (0, i, 0)),
        compiler_params=pltpu.CompilerParams(
            dimension_semantics=("parallel",)),
        cost_estimate=cost,
    )(x3, w3, b3)

    return y3.reshape(N, C, H, W)


if __name__ == "__main__":
    key = jax.random.PRNGKey(0)
    kx, kw, kb, kx2 = jax.random.split(key, 4)

    def _ref(x, w, b):
        mean = jnp.mean(x, axis=(0, 2, 3), keepdims=True)
        var = jnp.mean((x - mean) ** 2, axis=(0, 2, 3), keepdims=True)
        C = x.shape[1]
        return (x - mean) / jnp.sqrt(var + EPS) * w.reshape(1, C, 1, 1) + b.reshape(1, C, 1, 1)

    # Module shape: BatchNorm2d(672) applied to [1, 672, 14, 14].
    N, C, H, W = 1, 672, 14, 14
    x = jax.random.normal(kx, (N, C, H, W), dtype=jnp.float32)
    weight = 1.0 + 0.1 * jax.random.normal(kw, (C,), dtype=jnp.float32)
    bias = 0.1 * jax.random.normal(kb, (C,), dtype=jnp.float32)

    y = batchnorm2d(x, weight, bias)
    jax.block_until_ready(y)
    assert jnp.allclose(y, _ref(x, weight, bias), atol=1e-4, rtol=1e-4), "mismatch vs reference (N=1)"

    # Small batched case exercises the transpose-free N>1 path (reduce over N and HW).
    x2 = jax.random.normal(kx2, (2, 8, 4, 4), dtype=jnp.float32)
    w2 = jnp.linspace(0.5, 1.5, 8, dtype=jnp.float32)
    b2 = jnp.linspace(-0.2, 0.2, 8, dtype=jnp.float32)
    y2 = batchnorm2d(x2, w2, b2)
    jax.block_until_ready(y2)
    assert jnp.allclose(y2, _ref(x2, w2, b2), atol=1e-4, rtol=1e-4), "mismatch vs reference (N=2)"

    # TODO(synk): running_mean/running_var momentum updates (track_running_stats) are
    # module-state side effects that do not affect the forward output; not modeled.
    print("KERNEL_OK")
</pallas_src>

<mosaic_0001>
module attributes {stable_mosaic.version = 11 : i64} {
  func.func @_bn_kernel(%arg0: i32, %arg1: memref<1x672x196xf32, #tpu.memory_space<vmem>>, %arg2: memref<1x672x1xf32, #tpu.memory_space<vmem>>, %arg3: memref<1x672x1xf32, #tpu.memory_space<vmem>>, %arg4: memref<1x672x196xf32, #tpu.memory_space<vmem>>) attributes {dimension_semantics = [#tpu.dimension_semantics<parallel>], iteration_bounds = array<i64: 1>, scalar_prefetch = 0 : i64, scratch_operands = 0 : i64, tpu.core_type = #tpu.core_type<tc>, window_params = [{transform_indices = @transform_0, window_bounds = array<i64: 1, 672, 196>}, {transform_indices = @transform_1, window_bounds = array<i64: 1, 672, 1>}, {transform_indices = @transform_2, window_bounds = array<i64: 1, 672, 1>}, {transform_indices = @transform_3, window_bounds = array<i64: 1, 672, 196>}]} {
    %c0 = arith.constant 0 : index
    %c0_0 = arith.constant 0 : index
    %c0_1 = arith.constant 0 : index
    %0 = vector.load %arg1[%c0, %c0_0, %c0_1] : memref<1x672x196xf32, #tpu.memory_space<vmem>>, vector<1x672x196xf32>
    %cst = arith.constant dense<0.000000e+00> : vector<1x672xf32>
    %1 = vector.multi_reduction <add>, %0, %cst [2] : vector<1x672x196xf32> to vector<1x672xf32>
    %2 = vector.shape_cast %1 : vector<1x672xf32> to vector<1x672x1xf32>
    %cst_2 = arith.constant dense<0.000000e+00> : vector<672x1xf32>
    %3 = vector.multi_reduction <add>, %2, %cst_2 [0] : vector<1x672x1xf32> to vector<672x1xf32>
    %4 = vector.shape_cast %3 : vector<672x1xf32> to vector<1x672x1xf32>
    %5 = arith.mulf %0, %0 : vector<1x672x196xf32>
    %cst_3 = arith.constant dense<0.000000e+00> : vector<1x672xf32>
    %6 = vector.multi_reduction <add>, %5, %cst_3 [2] : vector<1x672x196xf32> to vector<1x672xf32>
    %7 = vector.shape_cast %6 : vector<1x672xf32> to vector<1x672x1xf32>
    %cst_4 = arith.constant dense<0.000000e+00> : vector<672x1xf32>
    %8 = vector.multi_reduction <add>, %7, %cst_4 [0] : vector<1x672x1xf32> to vector<672x1xf32>
    %9 = vector.shape_cast %8 : vector<672x1xf32> to vector<1x672x1xf32>
    %cst_5 = arith.constant 0.00510204071 : f32
    %10 = vector.broadcast %cst_5 : f32 to vector<1x672x1xf32>
    %11 = arith.mulf %4, %10 : vector<1x672x1xf32>
    %cst_6 = arith.constant 0.00510204071 : f32
    %12 = vector.broadcast %cst_6 : f32 to vector<1x672x1xf32>
    %13 = arith.mulf %9, %12 : vector<1x672x1xf32>
    %14 = arith.mulf %11, %11 : vector<1x672x1xf32>
    %15 = arith.subf %13, %14 : vector<1x672x1xf32>
    %cst_7 = arith.constant 0.000000e+00 : f32
    %16 = vector.broadcast %cst_7 : f32 to vector<1x672x1xf32>
    %17 = arith.maximumf %15, %16 : vector<1x672x1xf32>
    %c0_8 = arith.constant 0 : index
    %c0_9 = arith.constant 0 : index
    %c0_10 = arith.constant 0 : index
    %18 = vector.load %arg2[%c0_8, %c0_9, %c0_10] : memref<1x672x1xf32, #tpu.memory_space<vmem>>, vector<1x672x1xf32>
    %cst_11 = arith.constant 9.99999974E-6 : f32
    %19 = vector.broadcast %cst_11 : f32 to vector<1x672x1xf32>
    %20 = arith.addf %17, %19 : vector<1x672x1xf32>
    %21 = math.rsqrt %20 : vector<1x672x1xf32>
    %22 = arith.mulf %18, %21 : vector<1x672x1xf32>
    %c0_12 = arith.constant 0 : index
    %c0_13 = arith.constant 0 : index
    %c0_14 = arith.constant 0 : index
    %23 = vector.load %arg3[%c0_12, %c0_13, %c0_14] : memref<1x672x1xf32, #tpu.memory_space<vmem>>, vector<1x672x1xf32>
    %24 = arith.mulf %11, %22 : vector<1x672x1xf32>
    %25 = arith.subf %23, %24 : vector<1x672x1xf32>
    %26 = vector.broadcast %22 : vector<1x672x1xf32> to vector<1x672x196xf32>
    %27 = arith.mulf %0, %26 : vector<1x672x196xf32>
    %28 = vector.broadcast %25 : vector<1x672x1xf32> to vector<1x672x196xf32>
    %29 = arith.addf %27, %28 : vector<1x672x196xf32>
    %c0_15 = arith.constant 0 : index
    %c0_16 = arith.constant 0 : index
    %c0_17 = arith.constant 0 : index
    %30 = vector.load %arg4[%c0_15, %c0_16, %c0_17] : memref<1x672x196xf32, #tpu.memory_space<vmem>>, vector<1x672x196xf32>
    tpu.vector_store %arg4[%c0_15, %c0_16, %c0_17], %29 {strides = array<i32>} : memref<1x672x196xf32, #tpu.memory_space<vmem>>, vector<1x672x196xf32>,
    return
  }
  func.func @transform_0(%arg0: i32) -> (i32, i32, i32) {
    %c0_i32 = arith.constant 0 : i32
    %c0_i32_0 = arith.constant 0 : i32
    %c0_i32_1 = arith.constant 0 : i32
    return %c0_i32, %arg0, %c0_i32_0 : i32, i32, i32
  }
  func.func @transform_1(%arg0: i32) -> (i32, i32, i32) {
    %c0_i32 = arith.constant 0 : i32
    %c0_i32_0 = arith.constant 0 : i32
    %c0_i32_1 = arith.constant 0 : i32
    return %c0_i32, %arg0, %c0_i32_0 : i32, i32, i32
  }
  func.func @transform_2(%arg0: i32) -> (i32, i32, i32) {
    %c0_i32 = arith.constant 0 : i32
    %c0_i32_0 = arith.constant 0 : i32
    %c0_i32_1 = arith.constant 0 : i32
    return %c0_i32, %arg0, %c0_i32_0 : i32, i32, i32
  }
  func.func @transform_3(%arg0: i32) -> (i32, i32, i32) {
    %c0_i32 = arith.constant 0 : i32
    %c0_i32_0 = arith.constant 0 : i32
    %c0_i32_1 = arith.constant 0 : i32
    return %c0_i32, %arg0, %c0_i32_0 : i32, i32, i32
  }
}

</mosaic_0001>

<bundles_post_ra>
// kernel: tpu_custom_call.1
= control target key start
LH: loop header
LB: loop body
LE: loop exit
PB: predicated region body
PF: predicated region fallthrough
CT: control target
= control target key end

     0   :  { %vm182_vm0 = vcmask 556032   ;;  %s8521_s0 = inlined_call_operand.vmem [shape: f32[1,672,196], index: 0, kind: input, shape index: {}]   ;;  %s8522_s1 = inlined_call_operand.vmem [shape: f32[1,672,1], index: 1, kind: input, shape index: {}]   ;;  %s8523_s2 = inlined_call_operand.vmem [shape: f32[1,672,1], index: 2, kind: input, shape index: {}]   ;;  %s8524_s3 = inlined_call_operand.vmem [shape: f32[1,672,196], index: 3, kind: output, shape index: {}]  }
   0x1   :  { %v3916_v0 = vld [vmem:[%s8521_s0 + $0x20] sm:$0xff]  ;;  %v3921_v1 = vld [vmem:[%s8521_s0 + $0x28] sm:$0xff]  ;;  %v3938_v5 = vld [vmem:[%s8521_s0 + $0x30] sm:$0xff] }
   0x2   :  { %v3926_v2 = vld [vmem:[%s8521_s0] sm:$0xff]  ;;  %v191_v3 = vsel %vm182_vm0, %v3921_v1, 0.0  ;;  %v3933_v4 = vld [vmem:[%s8521_s0 + $0x8] sm:$0xff]  ;;  %v3943_v6 = vld [vmem:[%s8521_s0 + $0x38] sm:$0xff] }
   0x3   :  { %v192_v7 = vadd.f32 %v191_v3, %v3916_v0  ;;  %v183_v8 = vsel %vm182_vm0, %v3933_v4, 0.0  ;;  %v195_v9 = vsel %vm182_vm0, %v3943_v6, 0.0  ;;  %v3953_v10 = vld [vmem:[%s8521_s0 + $0x10] sm:$0xff]  ;;  %v3958_v11 = vld [vmem:[%s8521_s0 + $0x18] sm:$0xff]  ;;  %v3971_v15 = vld [vmem:[%s8521_s0 + $0x48] sm:$0xff] }
   0x4   :  { %v184_v12 = vadd.f32 %v183_v8, %v3926_v2  ;;  %v187_v13 = vsel %vm182_vm0, %v3958_v11, 0.0  ;;  %v3966_v14 = vld [vmem:[%s8521_s0 + $0x58] sm:$0xff]  ;;  %v196_v16 = vadd.f32 %v195_v9, %v3938_v5  ;;  %v3978_v18 = vld [vmem:[%s8521_s0 + $0x50] sm:$0xff]  ;;  %v3985_v20 = vld [vmem:[%s8521_s0 + $0x40] sm:$0xff]  ;;  %v199_v21 = vsel %vm182_vm0, %v3971_v15, 0.0 }
   0x5   :  { %193 = vadd.xlane.f32.xlu1 %v192_v7  ;;  %v188_v17 = vadd.f32 %v187_v13, %v3953_v10  ;;  %v203_v19 = vsel %vm182_vm0, %v3966_v14, 0.0  ;;  %v3992_v22 = vld [vmem:[%s8521_s0 + $0x78] sm:$0xff]  ;;  %v3997_v23 = vld [vmem:[%s8521_s0 + $0x68] sm:$0xff]  ;;  %v200_v25 = vadd.f32 %v199_v21, %v3985_v20  ;;  %v4004_v26 = vld [vmem:[%s8521_s0 + $0x70] sm:$0xff] }
   0x6   :  { %185 = vadd.xlane.f32.xlu0 %v184_v12  ;;  %v204_v24 = vadd.f32 %v203_v19, %v3978_v18  ;;  %v211_v27 = vsel %vm182_vm0, %v3992_v22, 0.0  ;;  %v4011_v28 = vld [vmem:[%s8521_s0 + $0x60] sm:$0xff]  ;;  %v207_v29 = vsel %vm182_vm0, %v3997_v23, 0.0  ;;  %v4018_v30 = vld [vmem:[%s8521_s0 + $0x98] sm:$0xff]  ;;  %v4023_v31 = vld [vmem:[%s8521_s0 + $0x88] sm:$0xff] }
   0x7   :  { %v212_v32 = vadd.f32 %v211_v27, %v4004_v26  ;;  %v208_v33 = vadd.f32 %v207_v29, %v4011_v28  ;;  %v4030_v34 = vld [vmem:[%s8521_s0 + $0x90] sm:$0xff]  ;;  %v219_v35 = vsel %vm182_vm0, %v4018_v30, 0.0  ;;  %v4037_v36 = vld [vmem:[%s8521_s0 + $0x80] sm:$0xff]  ;;  %v215_v37 = vsel %vm182_vm0, %v4023_v31, 0.0  ;;  %v4044_v38 = vld [vmem:[%s8521_s0 + $0xb8] sm:$0xff] }
   0x8   :  { %v4049_v39 = vld [vmem:[%s8521_s0 + $0xa8] sm:$0xff]  ;;  %v220_v40 = vadd.f32 %v219_v35, %v4030_v34  ;;  %v216_v41 = vadd.f32 %v215_v37, %v4037_v36  ;;  %v4056_v42 = vld [vmem:[%s8521_s0 + $0xb0] sm:$0xff]  ;;  %v227_v43 = vsel %vm182_vm0, %v4044_v38, 0.0  ;;  %v4063_v44 = vld [vmem:[%s8521_s0 + $0xa0] sm:$0xff] }
   0x9   :  { %197 = vadd.xlane.f32.xlu1 %v196_v16  ;;  %v223_v45 = vsel %vm182_vm0, %v4049_v39, 0.0  ;;  %v4070_v46 = vld [vmem:[%s8521_s0 + $0xd8] sm:$0xff]  ;;  %v4075_v47 = vld [vmem:[%s8521_s0 + $0xc8] sm:$0xff]  ;;  %v228_v48 = vadd.f32 %v227_v43, %v4056_v42  ;;  %v4082_v50 = vld [vmem:[%s8521_s0 + $0xd0] sm:$0xff] }
   0xa   :  { %189 = vadd.xlane.f32.xlu0 %v188_v17  ;;  %v224_v49 = vadd.f32 %v223_v45, %v4063_v44  ;;  %v235_v51 = vsel %vm182_vm0, %v4070_v46, 0.0  ;;  %v4089_v52 = vld [vmem:[%s8521_s0 + $0xc0] sm:$0xff]  ;;  %v231_v53 = vsel %vm182_vm0, %v4075_v47, 0.0  ;;  %v4096_v54 = vld [vmem:[%s8521_s0 + $0xf8] sm:$0xff]  ;;  %v4101_v55 = vld [vmem:[%s8521_s0 + $0xe8] sm:$0xff] }
   0xb   :  { %v236_v56 = vadd.f32 %v235_v51, %v4082_v50  ;;  %v232_v57 = vadd.f32 %v231_v53, %v4089_v52  ;;  %v4108_v58 = vld [vmem:[%s8521_s0 + $0xf0] sm:$0xff]  ;;  %v243_v59 = vsel %vm182_vm0, %v4096_v54, 0.0  ;;  %v4115_v60 = vld [vmem:[%s8521_s0 + $0xe0] sm:$0xff]  ;;  %v239_v61 = vsel %vm182_vm0, %v4101_v55, 0.0  ;;  %v4122_v62 = vld [vmem:[%s8521_s0 + $0x118] sm:$0xff] }
   0xc   :  { %v4127_v63 = vld [vmem:[%s8521_s0 + $0x108] sm:$0xff]  ;;  %v244_v3 = vadd.f32 %v243_v59, %v4108_v58  ;;  %v240_v7 = vadd.f32 %v239_v61, %v4115_v60  ;;  %v4134_v8 = vld [vmem:[%s8521_s0 + $0x110] sm:$0xff]  ;;  %v251_v9 = vsel %vm182_vm0, %v4122_v62, 0.0  ;;  %v4141_v12 = vld [vmem:[%s8521_s0 + $0x100] sm:$0xff] }
   0xd   :  { %205 = vadd.xlane.f32.xlu1 %v204_v24  ;;  %v247_v13 = vsel %vm182_vm0, %v4127_v63, 0.0  ;;  %v4148_v16 = vld [vmem:[%s8521_s0 + $0x138] sm:$0xff]  ;;  %v4153_v17 = vld [vmem:[%s8521_s0 + $0x128] sm:$0xff]  ;;  %v252_v19 = vadd.f32 %v251_v9, %v4134_v8  ;;  %v4160_v24 = vld [vmem:[%s8521_s0 + $0x130] sm:$0xff] }
   0xe   :  { %201 = vadd.xlane.f32.xlu0 %v200_v25  ;;  %v248_v21 = vadd.f32 %v247_v13, %v4141_v12  ;;  %v259_v25 = vsel %vm182_vm0, %v4148_v16, 0.0  ;;  %v4167_v27 = vld [vmem:[%s8521_s0 + $0x120] sm:$0xff]  ;;  %v255_v29 = vsel %vm182_vm0, %v4153_v17, 0.0 }
   0xf   :  { %v260_v35 = vadd.f32 %v259_v25, %v4160_v24  ;;  %v256_v37 = vadd.f32 %v255_v29, %v4167_v27  ;;  %v4193_v43 = vld [vmem:[%s8521_s0 + $0x140] sm:$0xff] }
  0x10   :  { %v4219_v59 = vld [vmem:[%s8521_s0 + $0x160] sm:$0xff] }
  0x11   :  { %213 = vadd.xlane.f32.xlu1 %v212_v32  ;;  %v4174_v32 = vld [vmem:[%s8521_s0 + $0x158] sm:$0xff]  ;;  %v4245_v25 = vld [vmem:[%s8521_s0 + $0x180] sm:$0xff] }
  0x12   :  { %209 = vadd.xlane.f32.xlu0 %v208_v33  ;;  %v4179_v33 = vld [vmem:[%s8521_s0 + $0x148] sm:$0xff]  ;;  %8812 = vst [vmem:[#allocation4_spill] sm:$0xff] %v4245_v25 }
  0x13   :  { %v263_v45 = vsel %vm182_vm0, %v4179_v33, 0.0 }
  0x14   :  { %v264_v53 = vadd.f32 %v263_v45, %v4193_v43 }
  0x15   :  { %221 = vadd.xlane.f32.xlu1 %v220_v40  ;;  %v4186_v40 = vld [vmem:[%s8521_s0 + $0x150] sm:$0xff] }
  0x16   :  { %217 = vadd.xlane.f32.xlu0 %v216_v41  ;;  %v267_v41 = vsel %vm182_vm0, %v4174_v32, 0.0 }
  0x17   :  { %v268_v51 = vadd.f32 %v267_v41, %v4186_v40 }
  0x19   :  { %229 = vadd.xlane.f32.xlu1 %v228_v48  ;;  %v4200_v48 = vld [vmem:[%s8521_s0 + $0x178] sm:$0xff] }
  0x1a   :  { %225 = vadd.xlane.f32.xlu0 %v224_v49  ;;  %v4205_v49 = vld [vmem:[%s8521_s0 + $0x168] sm:$0xff] }
  0x1b   :  { %v271_v61 = vsel %vm182_vm0, %v4205_v49, 0.0 }
  0x1c   :  { %v272_v13 = vadd.f32 %v271_v61, %v4219_v59 }
  0x1d   :  { %237 = vadd.xlane.f32.xlu1 %v236_v56  ;;  %v4212_v56 = vld [vmem:[%s8521_s0 + $0x170] sm:$0xff] }
  0x1e   :  { %233 = vadd.xlane.f32.xlu0 %v232_v57  ;;  %v275_v57 = vsel %vm182_vm0, %v4200_v48, 0.0 }
  0x1f   :  { %v276_v9 = vadd.f32 %v275_v57, %v4212_v56  ;;  %v4271_v57 = vld [vmem:[%s8521_s0 + $0x1a0] sm:$0xff] }
  0x20   :  { %8816 = vst [vmem:[#allocation8_spill] sm:$0xff] %v4271_v57 }
  0x21   :  { %245 = vadd.xlane.f32.xlu1 %v244_v3  ;;  %v4226_v3 = vld [vmem:[%s8521_s0 + $0x198] sm:$0xff] }
  0x22   :  { %241 = vadd.xlane.f32.xlu0 %v240_v7  ;;  %v4231_v7 = vld [vmem:[%s8521_s0 + $0x188] sm:$0xff] }
  0x23   :  { %8810 = vst [vmem:[#allocation2_spill] sm:$0xff] %v4231_v7  ;;  %v279_v29 = vsel %vm182_vm0, %v4231_v7, 0.0 }
  0x24   :  { %v280_v45 = vadd.f32 %v279_v29, %v4245_v25  ;;  %v4297_v25 = vld [vmem:[%s8521_s0 + $0x1c0] sm:$0xff] }
  0x25   :  { %253 = vadd.xlane.f32.xlu1 %v252_v19  ;;  %v4238_v19 = vld [vmem:[%s8521_s0 + $0x190] sm:$0xff]  ;;  %8820 = vst [vmem:[#allocation12_spill] sm:$0xff] %v4297_v25 }
  0x26   :  { %249 = vadd.xlane.f32.xlu0 %v248_v21  ;;  %8811 = vst [vmem:[#allocation3_spill] sm:$0xff] %v4238_v19  ;;  %v283_v21 = vsel %vm182_vm0, %v4226_v3, 0.0 }
  0x27   :  { %v284_v41 = vadd.f32 %v283_v21, %v4238_v19 }
  0x29   :  { %261 = vadd.xlane.f32.xlu1 %v260_v35  ;;  %v4252_v35 = vld [vmem:[%s8521_s0 + $0x1b8] sm:$0xff] }
  0x2a   :  { %257 = vadd.xlane.f32.xlu0 %v256_v37  ;;  %8813 = vst [vmem:[#allocation5_spill] sm:$0xff] %v4252_v35  ;;  %v4257_v37 = vld [vmem:[%s8521_s0 + $0x1a8] sm:$0xff] }
  0x2b   :  { %8814 = vst [vmem:[#allocation6_spill] sm:$0xff] %v4257_v37  ;;  %v287_v61 = vsel %vm182_vm0, %v4257_v37, 0.0  ;;  %v4290_v37 = vld [vmem:[%s8521_s0 + $0x1d0] sm:$0xff] }
  0x2c   :  { %v288_v29 = vadd.f32 %v287_v61, %v4271_v57  ;;  %8819 = vst [vmem:[#allocation11_spill] sm:$0xff] %v4290_v37 }
  0x2d   :  { %269 = vadd.xlane.f32.xlu1 %v268_v51  ;;  %v4264_v51 = vld [vmem:[%s8521_s0 + $0x1b0] sm:$0xff] }
  0x2e   :  { %265 = vadd.xlane.f32.xlu0 %v264_v53  ;;  %8815 = vst [vmem:[#allocation7_spill] sm:$0xff] %v4264_v51  ;;  %v291_v53 = vsel %vm182_vm0, %v4252_v35, 0.0 }
  0x2f   :  { %v292_v21 = vadd.f32 %v291_v53, %v4264_v51  ;;  %v4309_v53 = vld [vmem:[%s8521_s0 + $0x1e8] sm:$0xff]  ;;  %v4323_v51 = vld [vmem:[%s8521_s0 + $0x1e0] sm:$0xff] }
  0x30   :  { %8822 = vst [vmem:[#allocation14_spill] sm:$0xff] %v4309_v53  ;;  %8824 = vst [vmem:[#allocation16_spill] sm:$0xff] %v4323_v51 }
  0x31   :  { %277 = vadd.xlane.f32.xlu1 %v276_v9  ;;  %v4278_v9 = vld [vmem:[%s8521_s0 + $0x1d8] sm:$0xff] }
  0x32   :  { %273 = vadd.xlane.f32.xlu0 %v272_v13  ;;  %8817 = vst [vmem:[#allocation9_spill] sm:$0xff] %v4278_v9  ;;  %v4283_v13 = vld [vmem:[%s8521_s0 + $0x1c8] sm:$0xff]  ;;  %v299_v35 = vsel %vm182_vm0, %v4278_v9, 0.0 }
  0x33   :  { %8818 = vst [vmem:[#allocation10_spill] sm:$0xff] %v4283_v13  ;;  %v300_v61 = vadd.f32 %v299_v35, %v4290_v37  ;;  %v4330_v35 = vld [vmem:[%s8521_s0 + $0x218] sm:$0xff]  ;;  %v4349_v37 = vld [vmem:[%s8521_s0 + $0x200] sm:$0xff] }
  0x34   :  { %8825 = vst [vmem:[#allocation17_spill] sm:$0xff] %v4330_v35  ;;  %8828 = vst [vmem:[#allocation20_spill] sm:$0xff] %v4349_v37 }
  0x35   :  { %285 = vadd.xlane.f32.xlu1 %v284_v41  ;;  %v295_v41 = vsel %vm182_vm0, %v4283_v13, 0.0  ;;  %v4316_v13 = vld [vmem:[%s8521_s0 + $0x1f0] sm:$0xff] }
  0x36   :  { %281 = vadd.xlane.f32.xlu0 %v280_v45  ;;  %v4304_v45 = vld [vmem:[%s8521_s0 + $0x1f8] sm:$0xff]  ;;  %v296_v9 = vadd.f32 %v295_v41, %v4297_v25  ;;  %8823 = vst [vmem:[#allocation15_spill] sm:$0xff] %v4316_v13  ;;  %v315_v25 = vsel %vm182_vm0, %v4330_v35, 0.0 }
  0x37   :  { %8821 = vst [vmem:[#allocation13_spill] sm:$0xff] %v4304_v45  ;;  %v307_v57 = vsel %vm182_vm0, %v4304_v45, 0.0 }
  0x38   :  { %v308_v41 = vadd.f32 %v307_v57, %v4316_v13  ;;  %v4356_v57 = vld [vmem:[%s8521_s0 + $0x238] sm:$0xff]  ;;  %v4375_v13 = vld [vmem:[%s8521_s0 + $0x220] sm:$0xff] }
  0x39   :  { %293 = vadd.xlane.f32.xlu1 %v292_v21  ;;  %v303_v21 = vsel %vm182_vm0, %v4309_v53, 0.0  ;;  %v4342_v53 = vld [vmem:[%s8521_s0 + $0x210] sm:$0xff]  ;;  %8829 = vst [vmem:[#allocation21_spill] sm:$0xff] %v4356_v57  ;;  %8832 = vst [vmem:[#allocation24_spill] sm:$0xff] %v4375_v13 }
  0x3a   :  { %289 = vadd.xlane.f32.xlu0 %v288_v29  ;;  %v4335_v29 = vld [vmem:[%s8521_s0 + $0x208] sm:$0xff]  ;;  %v304_v45 = vadd.f32 %v303_v21, %v4323_v51  ;;  %8827 = vst [vmem:[#allocation19_spill] sm:$0xff] %v4342_v53  ;;  %v316_v21 = vadd.f32 %v315_v25, %v4342_v53  ;;  %v323_v51 = vsel %vm182_vm0, %v4356_v57, 0.0  ;;  %v4382_v25 = vld [vmem:[%s8521_s0 + $0x258] sm:$0xff]  ;;  %v4401_v53 = vld [vmem:[%s8521_s0 + $0x240] sm:$0xff] }
  0x3b   :  { %8826 = vst [vmem:[#allocation18_spill] sm:$0xff] %v4335_v29  ;;  %8833 = vst [vmem:[#allocation25_spill] sm:$0xff] %v4382_v25 }
  0x3c   :  { %8836 = vst [vmem:[#allocation28_spill] sm:$0xff] %v4401_v53 }
  0x3d   :  { %301 = vadd.xlane.f32.xlu1 %v300_v61  ;;  %v311_v61 = vsel %vm182_vm0, %v4335_v29, 0.0  ;;  %v4368_v29 = vld [vmem:[%s8521_s0 + $0x230] sm:$0xff] }
  0x3e   :  { %297 = vadd.xlane.f32.xlu0 %v296_v9  ;;  %v4361_v9 = vld [vmem:[%s8521_s0 + $0x228] sm:$0xff]  ;;  %v312_v35 = vadd.f32 %v311_v61, %v4349_v37  ;;  %8831 = vst [vmem:[#allocation23_spill] sm:$0xff] %v4368_v29  ;;  %v324_v61 = vadd.f32 %v323_v51, %v4368_v29  ;;  %v331_v37 = vsel %vm182_vm0, %v4382_v25, 0.0  ;;  %v4408_v51 = vld [vmem:[%s8521_s0 + $0x278] sm:$0xff]  ;;  %v4427_v29 = vld [vmem:[%s8521_s0 + $0x260] sm:$0xff] }
  0x3f   :  { %8830 = vst [vmem:[#allocation22_spill] sm:$0xff] %v4361_v9  ;;  %8837 = vst [vmem:[#allocation29_spill] sm:$0xff] %v4408_v51 }
  0x40   :  { %8840 = vst [vmem:[#allocation32_spill] sm:$0xff] %v4427_v29 }
  0x41   :  { %309 = vadd.xlane.f32.xlu1 %v308_v41  ;;  %v319_v41 = vsel %vm182_vm0, %v4361_v9, 0.0  ;;  %v4394_v9 = vld [vmem:[%s8521_s0 + $0x250] sm:$0xff] }
  0x42   :  { %305 = vadd.xlane.f32.xlu0 %v304_v45  ;;  %v4387_v45 = vld [vmem:[%s8521_s0 + $0x248] sm:$0xff]  ;;  %v320_v57 = vadd.f32 %v319_v41, %v4375_v13  ;;  %8835 = vst [vmem:[#allocation27_spill] sm:$0xff] %v4394_v9  ;;  %v332_v41 = vadd.f32 %v331_v37, %v4394_v9  ;;  %v339_v13 = vsel %vm182_vm0, %v4408_v51, 0.0  ;;  %v4434_v37 = vld [vmem:[%s8521_s0 + $0x298] sm:$0xff]  ;;  %v4453_v9 = vld [vmem:[%s8521_s0 + $0x280] sm:$0xff] }
  0x43   :  { %8834 = vst [vmem:[#allocation26_spill] sm:$0xff] %v4387_v45  ;;  %8841 = vst [vmem:[#allocation33_spill] sm:$0xff] %v4434_v37 }
  0x44   :  { %8844 = vst [vmem:[#allocation36_spill] sm:$0xff] %v4453_v9 }
  0x45   :  { %317 = vadd.xlane.f32.xlu1 %v316_v21  ;;  %v327_v21 = vsel %vm182_vm0, %v4387_v45, 0.0  ;;  %v4420_v45 = vld [vmem:[%s8521_s0 + $0x270] sm:$0xff] }
  0x46   :  { %313 = vadd.xlane.f32.xlu0 %v312_v35  ;;  %v4413_v35 = vld [vmem:[%s8521_s0 + $0x268] sm:$0xff]  ;;  %v328_v25 = vadd.f32 %v327_v21, %v4401_v53  ;;  %8839 = vst [vmem:[#allocation31_spill] sm:$0xff] %v4420_v45  ;;  %v340_v21 = vadd.f32 %v339_v13, %v4420_v45  ;;  %v347_v53 = vsel %vm182_vm0, %v4434_v37, 0.0  ;;  %v4460_v13 = vld [vmem:[%s8521_s0 + $0x2b8] sm:$0xff]  ;;  %v4479_v45 = vld [vmem:[%s8521_s0 + $0x2a0] sm:$0xff] }
  0x47   :  { %8838 = vst [vmem:[#allocation30_spill] sm:$0xff] %v4413_v35  ;;  %8845 = vst [vmem:[#allocation37_spill] sm:$0xff] %v4460_v13 }
  0x48   :  { %8848 = vst [vmem:[#allocation40_spill] sm:$0xff] %v4479_v45 }
  0x49   :  { %325 = vadd.xlane.f32.xlu1 %v324_v61  ;;  %v335_v61 = vsel %vm182_vm0, %v4413_v35, 0.0  ;;  %v4446_v35 = vld [vmem:[%s8521_s0 + $0x290] sm:$0xff] }
  0x4a   :  { %321 = vadd.xlane.f32.xlu0 %v320_v57  ;;  %v4439_v57 = vld [vmem:[%s8521_s0 + $0x288] sm:$0xff]  ;;  %v336_v51 = vadd.f32 %v335_v61, %v4427_v29  ;;  %8843 = vst [vmem:[#allocation35_spill] sm:$0xff] %v4446_v35  ;;  %v348_v61 = vadd.f32 %v347_v53, %v4446_v35  ;;  %v355_v29 = vsel %vm182_vm0, %v4460_v13, 0.0  ;;  %v4486_v53 = vld [vmem:[%s8521_s0 + $0x2d8] sm:$0xff]  ;;  %v4505_v35 = vld [vmem:[%s8521_s0 + $0x2c0] sm:$0xff] }
  0x4b   :  { %8842 = vst [vmem:[#allocation34_spill] sm:$0xff] %v4439_v57  ;;  %8849 = vst [vmem:[#allocation41_spill] sm:$0xff] %v4486_v53 }
  0x4c   :  { %8852 = vst [vmem:[#allocation44_spill] sm:$0xff] %v4505_v35 }
  0x4d   :  { %333 = vadd.xlane.f32.xlu1 %v332_v41  ;;  %v343_v41 = vsel %vm182_vm0, %v4439_v57, 0.0  ;;  %v4472_v57 = vld [vmem:[%s8521_s0 + $0x2b0] sm:$0xff] }
  0x4e   :  { %329 = vadd.xlane.f32.xlu0 %v328_v25  ;;  %v4465_v25 = vld [vmem:[%s8521_s0 + $0x2a8] sm:$0xff]  ;;  %v344_v37 = vadd.f32 %v343_v41, %v4453_v9  ;;  %8847 = vst [vmem:[#allocation39_spill] sm:$0xff] %v4472_v57  ;;  %v356_v41 = vadd.f32 %v355_v29, %v4472_v57  ;;  %v363_v9 = vsel %vm182_vm0, %v4486_v53, 0.0  ;;  %v4512_v29 = vld [vmem:[%s8521_s0 + $0x2f8] sm:$0xff]  ;;  %v4531_v57 = vld [vmem:[%s8521_s0 + $0x2e0] sm:$0xff] }
  0x4f   :  { %8846 = vst [vmem:[#allocation38_spill] sm:$0xff] %v4465_v25  ;;  %8853 = vst [vmem:[#allocation45_spill] sm:$0xff] %v4512_v29 }
  0x50   :  { %8856 = vst [vmem:[#allocation48_spill] sm:$0xff] %v4531_v57 }
  0x51   :  { %341 = vadd.xlane.f32.xlu1 %v340_v21  ;;  %v351_v21 = vsel %vm182_vm0, %v4465_v25, 0.0  ;;  %v4498_v25 = vld [vmem:[%s8521_s0 + $0x2d0] sm:$0xff] }
  0x52   :  { %337 = vadd.xlane.f32.xlu0 %v336_v51  ;;  %v4491_v51 = vld [vmem:[%s8521_s0 + $0x2c8] sm:$0xff]  ;;  %v352_v13 = vadd.f32 %v351_v21, %v4479_v45  ;;  %8851 = vst [vmem:[#allocation43_spill] sm:$0xff] %v4498_v25  ;;  %v364_v21 = vadd.f32 %v363_v9, %v4498_v25  ;;  %v371_v45 = vsel %vm182_vm0, %v4512_v29, 0.0  ;;  %v4538_v9 = vld [vmem:[%s8521_s0 + $0x318] sm:$0xff]  ;;  %v4557_v25 = vld [vmem:[%s8521_s0 + $0x300] sm:$0xff] }
  0x53   :  { %8850 = vst [vmem:[#allocation42_spill] sm:$0xff] %v4491_v51  ;;  %8857 = vst [vmem:[#allocation49_spill] sm:$0xff] %v4538_v9 }
  0x54   :  { %8860 = vst [vmem:[#allocation52_spill] sm:$0xff] %v4557_v25 }
  0x55   :  { %349 = vadd.xlane.f32.xlu1 %v348_v61  ;;  %v359_v61 = vsel %vm182_vm0, %v4491_v51, 0.0  ;;  %v4524_v51 = vld [vmem:[%s8521_s0 + $0x2f0] sm:$0xff] }
  0x56   :  { %345 = vadd.xlane.f32.xlu0 %v344_v37  ;;  %v4517_v37 = vld [vmem:[%s8521_s0 + $0x2e8] sm:$0xff]  ;;  %v360_v53 = vadd.f32 %v359_v61, %v4505_v35  ;;  %8855 = vst [vmem:[#allocation47_spill] sm:$0xff] %v4524_v51  ;;  %v372_v61 = vadd.f32 %v371_v45, %v4524_v51  ;;  %v379_v35 = vsel %vm182_vm0, %v4538_v9, 0.0  ;;  %v4564_v45 = vld [vmem:[%s8521_s0 + $0x338] sm:$0xff]  ;;  %v4583_v51 = vld [vmem:[%s8521_s0 + $0x320] sm:$0xff] }
  0x57   :  { %8854 = vst [vmem:[#allocation46_spill] sm:$0xff] %v4517_v37  ;;  %8861 = vst [vmem:[#allocation53_spill] sm:$0xff] %v4564_v45 }
  0x58   :  { %8864 = vst [vmem:[#allocation56_spill] sm:$0xff] %v4583_v51 }
  0x59   :  { %357 = vadd.xlane.f32.xlu1 %v356_v41  ;;  %v367_v41 = vsel %vm182_vm0, %v4517_v37, 0.0  ;;  %v4550_v37 = vld [vmem:[%s8521_s0 + $0x310] sm:$0xff] }
  0x5a   :  { %353 = vadd.xlane.f32.xlu0 %v352_v13  ;;  %v4543_v13 = vld [vmem:[%s8521_s0 + $0x308] sm:$0xff]  ;;  %v368_v29 = vadd.f32 %v367_v41, %v4531_v57  ;;  %8859 = vst [vmem:[#allocation51_spill] sm:$0xff] %v4550_v37  ;;  %v380_v41 = vadd.f32 %v379_v35, %v4550_v37  ;;  %v387_v57 = vsel %vm182_vm0, %v4564_v45, 0.0  ;;  %v4590_v35 = vld [vmem:[%s8521_s0 + $0x358] sm:$0xff]  ;;  %v4609_v37 = vld [vmem:[%s8521_s0 + $0x340] sm:$0xff] }
  0x5b   :  { %8858 = vst [vmem:[#allocation50_spill] sm:$0xff] %v4543_v13  ;;  %8865 = vst [vmem:[#allocation57_spill] sm:$0xff] %v4590_v35 }
  0x5c   :  { %8868 = vst [vmem:[#allocation60_spill] sm:$0xff] %v4609_v37 }
  0x5d   :  { %365 = vadd.xlane.f32.xlu1 %v364_v21  ;;  %v375_v21 = vsel %vm182_vm0, %v4543_v13, 0.0  ;;  %v4576_v13 = vld [vmem:[%s8521_s0 + $0x330] sm:$0xff] }
  0x5e   :  { %361 = vadd.xlane.f32.xlu0 %v360_v53  ;;  %v4569_v53 = vld [vmem:[%s8521_s0 + $0x328] sm:$0xff]  ;;  %v376_v9 = vadd.f32 %v375_v21, %v4557_v25  ;;  %8863 = vst [vmem:[#allocation55_spill] sm:$0xff] %v4576_v13  ;;  %v388_v21 = vadd.f32 %v387_v57, %v4576_v13  ;;  %v395_v25 = vsel %vm182_vm0, %v4590_v35, 0.0  ;;  %v4616_v57 = vld [vmem:[%s8521_s0 + $0x378] sm:$0xff]  ;;  %v4635_v13 = vld [vmem:[%s8521_s0 + $0x360] sm:$0xff] }
  0x5f   :  { %8862 = vst [vmem:[#allocation54_spill] sm:$0xff] %v4569_v53  ;;  %8869 = vst [vmem:[#allocation61_spill] sm:$0xff] %v4616_v57 }
  0x60   :  { %8872 = vst [vmem:[#allocation64_spill] sm:$0xff] %v4635_v13 }
  0x61   :  { %373 = vadd.xlane.f32.xlu1 %v372_v61  ;;  %v383_v61 = vsel %vm182_vm0, %v4569_v53, 0.0  ;;  %v4602_v53 = vld [vmem:[%s8521_s0 + $0x350] sm:$0xff] }
  0x62   :  { %369 = vadd.xlane.f32.xlu0 %v368_v29  ;;  %v4595_v29 = vld [vmem:[%s8521_s0 + $0x348] sm:$0xff]  ;;  %v384_v45 = vadd.f32 %v383_v61, %v4583_v51  ;;  %8867 = vst [vmem:[#allocation59_spill] sm:$0xff] %v4602_v53  ;;  %v396_v61 = vadd.f32 %v395_v25, %v4602_v53  ;;  %v403_v51 = vsel %vm182_vm0, %v4616_v57, 0.0  ;;  %v4642_v25 = vld [vmem:[%s8521_s0 + $0x398] sm:$0xff]  ;;  %v4661_v53 = vld [vmem:[%s8521_s0 + $0x380] sm:$0xff] }
  0x63   :  { %8866 = vst [vmem:[#allocation58_spill] sm:$0xff] %v4595_v29  ;;  %8873 = vst [vmem:[#allocation65_spill] sm:$0xff] %v4642_v25 }
  0x64   :  { %8876 = vst [vmem:[#allocation68_spill] sm:$0xff] %v4661_v53 }
  0x65   :  { %381 = vadd.xlane.f32.xlu1 %v380_v41  ;;  %v391_v41 = vsel %vm182_vm0, %v4595_v29, 0.0  ;;  %v4628_v29 = vld [vmem:[%s8521_s0 + $0x370] sm:$0xff] }
  0x66   :  { %377 = vadd.xlane.f32.xlu0 %v376_v9  ;;  %v4621_v9 = vld [vmem:[%s8521_s0 + $0x368] sm:$0xff]  ;;  %v392_v35 = vadd.f32 %v391_v41, %v4609_v37  ;;  %8871 = vst [vmem:[#allocation63_spill] sm:$0xff] %v4628_v29  ;;  %v404_v41 = vadd.f32 %v403_v51, %v4628_v29  ;;  %v411_v37 = vsel %vm182_vm0, %v4642_v25, 0.0  ;;  %v4668_v51 = vld [vmem:[%s8521_s0 + $0x3b8] sm:$0xff]  ;;  %v4687_v29 = vld [vmem:[%s8521_s0 + $0x3a0] sm:$0xff] }
  0x67   :  { %8870 = vst [vmem:[#allocation62_spill] sm:$0xff] %v4621_v9  ;;  %8877 = vst [vmem:[#allocation69_spill] sm:$0xff] %v4668_v51 }
  0x68   :  { %8880 = vst [vmem:[#allocation72_spill] sm:$0xff] %v4687_v29 }
  0x69   :  { %389 = vadd.xlane.f32.xlu1 %v388_v21  ;;  %v399_v21 = vsel %vm182_vm0, %v4621_v9, 0.0  ;;  %v4654_v9 = vld [vmem:[%s8521_s0 + $0x390] sm:$0xff] }
  0x6a   :  { %385 = vadd.xlane.f32.xlu0 %v384_v45  ;;  %v4647_v45 = vld [vmem:[%s8521_s0 + $0x388] sm:$0xff]  ;;  %v400_v57 = vadd.f32 %v399_v21, %v4635_v13  ;;  %8875 = vst [vmem:[#allocation67_spill] sm:$0xff] %v4654_v9  ;;  %v412_v21 = vadd.f32 %v411_v37, %v4654_v9  ;;  %v419_v13 = vsel %vm182_vm0, %v4668_v51, 0.0  ;;  %v4694_v37 = vld [vmem:[%s8521_s0 + $0x3d8] sm:$0xff]  ;;  %v4713_v9 = vld [vmem:[%s8521_s0 + $0x3c0] sm:$0xff] }
  0x6b   :  { %8874 = vst [vmem:[#allocation66_spill] sm:$0xff] %v4647_v45  ;;  %8881 = vst [vmem:[#allocation73_spill] sm:$0xff] %v4694_v37 }
  0x6c   :  { %8884 = vst [vmem:[#allocation76_spill] sm:$0xff] %v4713_v9 }
  0x6d   :  { %397 = vadd.xlane.f32.xlu1 %v396_v61  ;;  %v407_v61 = vsel %vm182_vm0, %v4647_v45, 0.0  ;;  %v4680_v45 = vld [vmem:[%s8521_s0 + $0x3b0] sm:$0xff] }
  0x6e   :  { %393 = vadd.xlane.f32.xlu0 %v392_v35  ;;  %v4673_v35 = vld [vmem:[%s8521_s0 + $0x3a8] sm:$0xff]  ;;  %v408_v25 = vadd.f32 %v407_v61, %v4661_v53  ;;  %8879 = vst [vmem:[#allocation71_spill] sm:$0xff] %v4680_v45  ;;  %v420_v61 = vadd.f32 %v419_v13, %v4680_v45  ;;  %v427_v53 = vsel %vm182_vm0, %v4694_v37, 0.0  ;;  %v4720_v13 = vld [vmem:[%s8521_s0 + $0x3f8] sm:$0xff]  ;;  %v4739_v45 = vld [vmem:[%s8521_s0 + $0x3e0] sm:$0xff] }
  0x6f   :  { %8878 = vst [vmem:[#allocation70_spill] sm:$0xff] %v4673_v35  ;;  %8885 = vst [vmem:[#allocation77_spill] sm:$0xff] %v4720_v13 }
  0x70   :  { %8888 = vst [vmem:[#allocation80_spill] sm:$0xff] %v4739_v45 }
  0x71   :  { %405 = vadd.xlane.f32.xlu1 %v404_v41  ;;  %v415_v41 = vsel %vm182_vm0, %v4673_v35, 0.0  ;;  %v4706_v35 = vld [vmem:[%s8521_s0 + $0x3d0] sm:$0xff] }
  0x72   :  { %401 = vadd.xlane.f32.xlu0 %v400_v57  ;;  %v4699_v57 = vld [vmem:[%s8521_s0 + $0x3c8] sm:$0xff]  ;;  %v416_v51 = vadd.f32 %v415_v41, %v4687_v29  ;;  %8883 = vst [vmem:[#allocation75_spill] sm:$0xff] %v4706_v35  ;;  %v428_v41 = vadd.f32 %v427_v53, %v4706_v35  ;;  %v435_v29 = vsel %vm182_vm0, %v4720_v13, 0.0  ;;  %v4746_v53 = vld [vmem:[%s8521_s0 + $0x418] sm:$0xff]  ;;  %v4765_v35 = vld [vmem:[%s8521_s0 + $0x400] sm:$0xff] }
  0x73   :  { %8882 = vst [vmem:[#allocation74_spill] sm:$0xff] %v4699_v57  ;;  %8889 = vst [vmem:[#allocation81_spill] sm:$0xff] %v4746_v53 }
  0x74   :  { %8892 = vst [vmem:[#allocation84_spill] sm:$0xff] %v4765_v35 }
  0x75   :  { %413 = vadd.xlane.f32.xlu1 %v412_v21  ;;  %v423_v21 = vsel %vm182_vm0, %v4699_v57, 0.0  ;;  %v4732_v57 = vld [vmem:[%s8521_s0 + $0x3f0] sm:$0xff] }
  0x76   :  { %409 = vadd.xlane.f32.xlu0 %v408_v25  ;;  %v4725_v25 = vld [vmem:[%s8521_s0 + $0x3e8] sm:$0xff]  ;;  %v424_v37 = vadd.f32 %v423_v21, %v4713_v9  ;;  %8887 = vst [vmem:[#allocation79_spill] sm:$0xff] %v4732_v57  ;;  %v436_v21 = vadd.f32 %v435_v29, %v4732_v57  ;;  %v443_v9 = vsel %vm182_vm0, %v4746_v53, 0.0  ;;  %v4772_v29 = vld [vmem:[%s8521_s0 + $0x438] sm:$0xff]  ;;  %v4791_v57 = vld [vmem:[%s8521_s0 + $0x420] sm:$0xff] }
  0x77   :  { %8886 = vst [vmem:[#allocation78_spill] sm:$0xff] %v4725_v25  ;;  %8893 = vst [vmem:[#allocation85_spill] sm:$0xff] %v4772_v29 }
  0x78   :  { %8896 = vst [vmem:[#allocation88_spill] sm:$0xff] %v4791_v57 }
  0x79   :  { %421 = vadd.xlane.f32.xlu1 %v420_v61  ;;  %v431_v61 = vsel %vm182_vm0, %v4725_v25, 0.0  ;;  %v4758_v25 = vld [vmem:[%s8521_s0 + $0x410] sm:$0xff] }
  0x7a   :  { %417 = vadd.xlane.f32.xlu0 %v416_v51  ;;  %v4751_v51 = vld [vmem:[%s8521_s0 + $0x408] sm:$0xff]  ;;  %v432_v13 = vadd.f32 %v431_v61, %v4739_v45  ;;  %8891 = vst [vmem:[#allocation83_spill] sm:$0xff] %v4758_v25  ;;  %v444_v61 = vadd.f32 %v443_v9, %v4758_v25  ;;  %v451_v45 = vsel %vm182_vm0, %v4772_v29, 0.0  ;;  %v4798_v9 = vld [vmem:[%s8521_s0 + $0x458] sm:$0xff]  ;;  %v4817_v25 = vld [vmem:[%s8521_s0 + $0x440] sm:$0xff] }
  0x7b   :  { %8890 = vst [vmem:[#allocation82_spill] sm:$0xff] %v4751_v51  ;;  %8897 = vst [vmem:[#allocation89_spill] sm:$0xff] %v4798_v9 }
  0x7c   :  { %8900 = vst [vmem:[#allocation92_spill] sm:$0xff] %v4817_v25 }
  0x7d   :  { %429 = vadd.xlane.f32.xlu1 %v428_v41  ;;  %v439_v41 = vsel %vm182_vm0, %v4751_v51, 0.0  ;;  %v4784_v51 = vld [vmem:[%s8521_s0 + $0x430] sm:$0xff] }
  0x7e   :  { %425 = vadd.xlane.f32.xlu0 %v424_v37  ;;  %v4777_v37 = vld [vmem:[%s8521_s0 + $0x428] sm:$0xff]  ;;  %v440_v53 = vadd.f32 %v439_v41, %v4765_v35  ;;  %8895 = vst [vmem:[#allocation87_spill] sm:$0xff] %v4784_v51  ;;  %v452_v41 = vadd.f32 %v451_v45, %v4784_v51  ;;  %v459_v35 = vsel %vm182_vm0, %v4798_v9, 0.0  ;;  %v4824_v45 = vld [vmem:[%s8521_s0 + $0x478] sm:$0xff]  ;;  %v4843_v51 = vld [vmem:[%s8521_s0 + $0x460] sm:$0xff] }
  0x7f   :  { %8894 = vst [vmem:[#allocation86_spill] sm:$0xff] %v4777_v37  ;;  %8901 = vst [vmem:[#allocation93_spill] sm:$0xff] %v4824_v45 }
  0x80   :  { %8904 = vst [vmem:[#allocation96_spill] sm:$0xff] %v4843_v51 }
  0x81   :  { %437 = vadd.xlane.f32.xlu1 %v436_v21  ;;  %v447_v21 = vsel %vm182_vm0, %v4777_v37, 0.0  ;;  %v4810_v37 = vld [vmem:[%s8521_s0 + $0x450] sm:$0xff] }
  0x82   :  { %433 = vadd.xlane.f32.xlu0 %v432_v13  ;;  %v4803_v13 = vld [vmem:[%s8521_s0 + $0x448] sm:$0xff]  ;;  %v448_v29 = vadd.f32 %v447_v21, %v4791_v57  ;;  %8899 = vst [vmem:[#allocation91_spill] sm:$0xff] %v4810_v37  ;;  %v460_v21 = vadd.f32 %v459_v35, %v4810_v37  ;;  %v467_v57 = vsel %vm182_vm0, %v4824_v45, 0.0  ;;  %v4850_v35 = vld [vmem:[%s8521_s0 + $0x498] sm:$0xff] }
  0x83   :  { %8898 = vst [vmem:[#allocation90_spill] sm:$0xff] %v4803_v13  ;;  %8905 = vst [vmem:[#allocation97_spill] sm:$0xff] %v4850_v35  ;;  %v475_v37 = vsel %vm182_vm0, %v4850_v35, 0.0 }
  0x85   :  { %445 = vadd.xlane.f32.xlu1 %v444_v61  ;;  %v455_v61 = vsel %vm182_vm0, %v4803_v13, 0.0  ;;  %v4836_v13 = vld [vmem:[%s8521_s0 + $0x470] sm:$0xff] }
  0x86   :  { %441 = vadd.xlane.f32.xlu0 %v440_v53  ;;  %v4829_v53 = vld [vmem:[%s8521_s0 + $0x468] sm:$0xff]  ;;  %v456_v9 = vadd.f32 %v455_v61, %v4817_v25  ;;  %8903 = vst [vmem:[#allocation95_spill] sm:$0xff] %v4836_v13  ;;  %v468_v61 = vadd.f32 %v467_v57, %v4836_v13 }
  0x87   :  { %8902 = vst [vmem:[#allocation94_spill] sm:$0xff] %v4829_v53 }
  0x89   :  { %453 = vadd.xlane.f32.xlu1 %v452_v41  ;;  %v463_v41 = vsel %vm182_vm0, %v4829_v53, 0.0  ;;  %v4864_v53 = vld [vmem:[%s8521_s0 + $0x490] sm:$0xff] }
  0x8a   :  { %449 = vadd.xlane.f32.xlu0 %v448_v29  ;;  %v4855_v29 = vld [vmem:[%s8521_s0 + $0x488] sm:$0xff]  ;;  %v464_v25 = vadd.f32 %v463_v41, %v4843_v51  ;;  %8908 = vst [vmem:[#allocation100_spill] sm:$0xff] %v4864_v53 }
  0x8b   :  { %8906 = vst [vmem:[#allocation98_spill] sm:$0xff] %v4855_v29  ;;  %v471_v57 = vsel %vm182_vm0, %v4855_v29, 0.0  ;;  %v4885_v41 = vld [vmem:[%s8521_s0 + $0x4a8] sm:$0xff]  ;;  %v4894_v29 = vld [vmem:[%s8521_s0 + $0x4b0] sm:$0xff] }
  0x8c   :  { %8912 = vst [vmem:[#allocation104_spill] sm:$0xff] %v4885_v41  ;;  %8914 = vst [vmem:[#allocation106_spill] sm:$0xff] %v4894_v29 }
  0x8d   :  { %461 = vadd.xlane.f32.xlu1 %v460_v21  ;;  %v4873_v21 = vld [vmem:[%s8521_s0 + $0x480] sm:$0xff] }
  0x8e   :  { %457 = vadd.xlane.f32.xlu0 %v456_v9  ;;  %v4858_v45 = vpop.xlane.xlu1 %193  ;;  %8910 = vst [vmem:[#allocation102_spill] sm:$0xff] %v4873_v21  ;;  %v4880_v9 = vld [vmem:[%s8521_s0 + $0x4b8] sm:$0xff]  ;;  %v472_v35 = vadd.f32 %v471_v57, %v4873_v21  ;;  %v4915_v57 = vld [vmem:[%s8521_s0 + $0x4c8] sm:$0xff] }
  0x8f   :  { %8907 = vst [vmem:[#allocation99_spill] sm:$0xff] %v4858_v45  ;;  %v4868_v19 = vpop.xlane.xlu0 %185  ;;  %8911 = vst [vmem:[#allocation103_spill] sm:$0xff] %v4880_v9  ;;  %v483_v51 = vsel %vm182_vm0, %v4880_v9, 0.0 }
  0x90   :  { %8909 = vst [vmem:[#allocation101_spill] sm:$0xff] %v4868_v19  ;;  %v476_v19 = vadd.f32 %v475_v37, %v4864_v53  ;;  %v4910_v37 = vld [vmem:[%s8521_s0 + $0x4d8] sm:$0xff]  ;;  %8918 = vst [vmem:[#allocation110_spill] sm:$0xff] %v4915_v57 }
  0x91   :  { %469 = vadd.xlane.f32.xlu1 %v468_v61  ;;  %v4903_v61 = vld [vmem:[%s8521_s0 + $0x4a0] sm:$0xff]  ;;  %8917 = vst [vmem:[#allocation109_spill] sm:$0xff] %v4910_v37  ;;  %v491_v21 = vsel %vm182_vm0, %v4910_v37, 0.0 }
  0x92   :  { %465 = vadd.xlane.f32.xlu0 %v464_v25  ;;  %v4888_v45 = vpop.xlane.xlu1 %197  ;;  %8916 = vst [vmem:[#allocation108_spill] sm:$0xff] %v4903_v61  ;;  %v479_v25 = vsel %vm182_vm0, %v4885_v41, 0.0  ;;  %v4924_v41 = vld [vmem:[%s8521_s0 + $0x4d0] sm:$0xff] }
  0x93   :  { %8913 = vst [vmem:[#allocation105_spill] sm:$0xff] %v4888_v45  ;;  %v4898_v13 = vpop.xlane.xlu0 %189  ;;  %v484_v45 = vadd.f32 %v483_v51, %v4894_v29  ;;  %v480_v9 = vadd.f32 %v479_v25, %v4903_v61  ;;  %8920 = vst [vmem:[#allocation112_spill] sm:$0xff] %v4924_v41  ;;  %v487_v51 = vsel %vm182_vm0, %v4915_v57, 0.0  ;;  %v4945_v25 = vld [vmem:[%s8521_s0 + $0x4e8] sm:$0xff]  ;;  %v4954_v57 = vld [vmem:[%s8521_s0 + $0x4f0] sm:$0xff] }
  0x94   :  { %8915 = vst [vmem:[#allocation107_spill] sm:$0xff] %v4898_v13  ;;  %8924 = vst [vmem:[#allocation116_spill] sm:$0xff] %v4945_v25 }
  0x95   :  { %477 = vadd.xlane.f32.xlu1 %v476_v19  ;;  %v4933_v19 = vld [vmem:[%s8521_s0 + $0x4c0] sm:$0xff]  ;;  %8926 = vst [vmem:[#allocation118_spill] sm:$0xff] %v4954_v57 }
  0x96   :  { %473 = vadd.xlane.f32.xlu0 %v472_v35  ;;  %v4918_v13 = vpop.xlane.xlu1 %205  ;;  %8922 = vst [vmem:[#allocation114_spill] sm:$0xff] %v4933_v19  ;;  %v4940_v35 = vld [vmem:[%s8521_s0 + $0x4f8] sm:$0xff]  ;;  %v488_v37 = vadd.f32 %v487_v51, %v4933_v19  ;;  %v4975_v51 = vld [vmem:[%s8521_s0 + $0x508] sm:$0xff] }
  0x97   :  { %8919 = vst [vmem:[#allocation111_spill] sm:$0xff] %v4918_v13  ;;  %v4928_v53 = vpop.xlane.xlu0 %201  ;;  %8923 = vst [vmem:[#allocation115_spill] sm:$0xff] %v4940_v35  ;;  %v492_v13 = vadd.f32 %v491_v21, %v4924_v41  ;;  %v499_v61 = vsel %vm182_vm0, %v4940_v35, 0.0  ;;  %v495_v21 = vsel %vm182_vm0, %v4945_v25, 0.0  ;;  %v176_v25 = vld [vmem:[%s8521_s0 + $0x510] sm:$0xff] }
  0x98   :  { %8921 = vst [vmem:[#allocation113_spill] sm:$0xff] %v4928_v53  ;;  %8930 = vst [vmem:[#allocation122_spill] sm:$0xff] %v4975_v51 }
  0x99   :  { %485 = vadd.xlane.f32.xlu1 %v484_v45  ;;  %v4963_v45 = vld [vmem:[%s8521_s0 + $0x4e0] sm:$0xff] }
  0x9a   :  { %481 = vadd.xlane.f32.xlu0 %v480_v9  ;;  %v4948_v53 = vpop.xlane.xlu1 %213  ;;  %8928 = vst [vmem:[#allocation120_spill] sm:$0xff] %v4963_v45  ;;  %v4970_v9 = vld [vmem:[%s8521_s0 + $0x518] sm:$0xff]  ;;  %v496_v35 = vadd.f32 %v495_v21, %v4963_v45  ;;  %v179_v21 = vld [vmem:[%s8521_s0 + $0x528] sm:$0xff]  ;;  %v180_v45 = vld [vmem:[%s8521_s0 + $0x530] sm:$0xff] }
  0x9b   :  { %8925 = vst [vmem:[#allocation117_spill] sm:$0xff] %v4948_v53  ;;  %v4958_v29 = vpop.xlane.xlu0 %209  ;;  %8929 = vst [vmem:[#allocation121_spill] sm:$0xff] %v4970_v9  ;;  %v500_v53 = vadd.f32 %v499_v61, %v4954_v57  ;;  %v507_v19 = vsel %vm182_vm0, %v4970_v9, 0.0  ;;  %v503_v61 = vsel %vm182_vm0, %v4975_v51, 0.0  ;;  %v606_v57 = vmul.f32 %v3958_v11, %v3958_v11 }
  0x9c   :  { %8927 = vst [vmem:[#allocation119_spill] sm:$0xff] %v4958_v29 }
  0x9d   :  { %493 = vadd.xlane.f32.xlu1 %v492_v13  ;;  %v174_v13 = vld [vmem:[%s8521_s0 + $0x500] sm:$0xff] }
  0x9e   :  { %489 = vadd.xlane.f32.xlu0 %v488_v37  ;;  %v4978_v29 = vpop.xlane.xlu1 %221  ;;  %v181_v37 = vld [vmem:[%s8521_s0 + $0x538] sm:$0xff] }
  0x9f   :  { %8931 = vst [vmem:[#allocation123_spill] sm:$0xff] %v4978_v29  ;;  %v4986_v41 = vpop.xlane.xlu0 %217  ;;  %v508_v29 = vadd.f32 %v507_v19, %v176_v25  ;;  %v515_v51 = vsel %vm182_vm0, %v181_v37, 0.0  ;;  %v511_v19 = vsel %vm182_vm0, %v179_v21, 0.0  ;;  %v775_v37 = vsel %vm182_vm0, %v606_v57, 0.0 }
  0xa0   :  { %8932 = vst [vmem:[#allocation124_spill] sm:$0xff] %v4986_v41  ;;  %v504_v41 = vadd.f32 %v503_v61, %v174_v13  ;;  %v516_v25 = vadd.f32 %v515_v51, %v180_v45  ;;  %v605_v13 = vmul.f32 %v3953_v10, %v3953_v10  ;;  %v610_v21 = vmul.f32 %v3943_v6, %v3943_v6 }
  0xa1   :  { %501 = vadd.xlane.f32.xlu1 %v500_v53  ;;  %v178_v53 = vld [vmem:[%s8521_s0 + $0x520] sm:$0xff]  ;;  %v607_v6 = vmul.f32 %v3916_v0, %v3916_v0  ;;  %v614_v51 = vmul.f32 %v3966_v14, %v3966_v14  ;;  %v611_v14 = vmul.f32 %v3985_v20, %v3985_v20 }
  0xa2   :  { %497 = vadd.xlane.f32.xlu0 %v496_v35  ;;  %v4999_v9 = vpop.xlane.xlu1 %229  ;;  %v604_v35 = vmul.f32 %v3933_v4, %v3933_v4  ;;  %v512_v11 = vadd.f32 %v511_v19, %v178_v53  ;;  %v776_v10 = vadd.f32 %v775_v37, %v605_v13  ;;  %v612_v19 = vmul.f32 %v3971_v15, %v3971_v15 }
  0xa3   :  { %8933 = vst [vmem:[#allocation125_spill] sm:$0xff] %v4999_v9  ;;  %v5007_v7 = vpop.xlane.xlu0 %225  ;;  %v791_v0 = vsel %vm182_vm0, %v614_v51, 0.0  ;;  %v618_v13 = vmul.f32 %v3992_v22, %v3992_v22  ;;  %v616_v37 = vmul.f32 %v3997_v23, %v3997_v23  ;;  %v615_v22 = vmul.f32 %v4011_v28, %v4011_v28 }
  0xa4   :  { %8934 = vst [vmem:[#allocation126_spill] sm:$0xff] %v5007_v7  ;;  %v603_v7 = vmul.f32 %v3926_v2, %v3926_v2  ;;  %v771_v4 = vsel %vm182_vm0, %v604_v35, 0.0  ;;  %v783_v2 = vsel %vm182_vm0, %v610_v21, 0.0  ;;  %v787_v15 = vsel %vm182_vm0, %v612_v19, 0.0 }
  0xa5   :  { %509 = vadd.xlane.f32.xlu1 %v508_v29  ;;  %v608_v29 = vmul.f32 %v3921_v1, %v3921_v1  ;;  %v617_v21 = vmul.f32 %v4004_v26, %v4004_v26  ;;  %v799_v20 = vsel %vm182_vm0, %v618_v13, 0.0  ;;  %v795_v23 = vsel %vm182_vm0, %v616_v37, 0.0 }
  0xa6   :  { %505 = vadd.xlane.f32.xlu0 %v504_v41  ;;  %v5017_v61 = vpop.xlane.xlu1 %237  ;;  %v609_v41 = vmul.f32 %v3938_v5, %v3938_v5  ;;  %v772_v45 = vadd.f32 %v771_v4, %v603_v7  ;;  %v613_v7 = vmul.f32 %v3978_v18, %v3978_v18  ;;  %v796_v51 = vadd.f32 %v795_v23, %v615_v22 }
  0xa7   :  { %v5024_v9 = vpop.xlane.xlu0 %233  ;;  %v779_v1 = vsel %vm182_vm0, %v608_v29, 0.0  ;;  %v788_v29 = vadd.f32 %v787_v15, %v611_v14  ;;  %v800_v26 = vadd.f32 %v799_v20, %v617_v21  ;;  %v630_v14 = vmul.f32 %v4070_v46, %v4070_v46 }
  0xa8   :  { %v784_v5 = vadd.f32 %v783_v2, %v609_v41  ;;  %v792_v18 = vadd.f32 %v791_v0, %v613_v7  ;;  %v621_v2 = vmul.f32 %v4030_v34, %v4030_v34  ;;  %v623_v7 = vmul.f32 %v4063_v44, %v4063_v44 }
  0xa9   :  { %517 = vadd.xlane.f32.xlu1 %v516_v25  ;;  %v780_v25 = vadd.f32 %v779_v1, %v607_v6  ;;  %v619_v6 = vmul.f32 %v4037_v36, %v4037_v36  ;;  %v626_v1 = vmul.f32 %v4044_v38, %v4044_v38  ;;  %v625_v36 = vmul.f32 %v4056_v42, %v4056_v42 }
  0xaa   :  { %513 = vadd.xlane.f32.xlu0 %v512_v11  ;;  %v5031_v57 = vpop.xlane.xlu1 %245  ;;  %v628_v15 = vmul.f32 %v4075_v47, %v4075_v47  ;;  %v629_v44 = vmul.f32 %v4082_v50, %v4082_v50  ;;  %v823_v21 = vsel %vm182_vm0, %v630_v14, 0.0  ;;  %v634_v46 = vmul.f32 %v4096_v54, %v4096_v54 }
  0xab   :  { %v5038_v53 = vpop.xlane.xlu0 %241  ;;  %v815_v38 = vsel %vm182_vm0, %v626_v1, 0.0  ;;  %v632_v47 = vmul.f32 %v4101_v55, %v4101_v55  ;;  %v631_v23 = vmul.f32 %v4115_v60, %v4115_v60  ;;  %v637_v60 = vmul.f32 %v4134_v8, %v4134_v8 }
  0xac   :  { %v816_v42 = vadd.f32 %v815_v38, %v625_v36  ;;  %v819_v22 = vsel %vm182_vm0, %v628_v15, 0.0  ;;  %v824_v50 = vadd.f32 %v823_v21, %v629_v44  ;;  %v831_v54 = vsel %vm182_vm0, %v634_v46, 0.0 }
  0xad   :  { %777 = vadd.xlane.f32.xlu1 %v776_v10  ;;  %v622_v10 = vmul.f32 %v4018_v30, %v4018_v30  ;;  %v827_v55 = vsel %vm182_vm0, %v632_v47, 0.0  ;;  %v641_v36 = vmul.f32 %v4160_v24, %v4160_v24  ;;  %v646_v38 = vmul.f32 %v4174_v32, %v4174_v32 }
  0xae   :  { %773 = vadd.xlane.f32.xlu0 %v772_v45  ;;  %v5045_v35 = vpop.xlane.xlu1 %253  ;;  %v620_v45 = vmul.f32 %v4023_v31, %v4023_v31  ;;  %v624_v31 = vmul.f32 %v4049_v39, %v4049_v39  ;;  %v644_v14 = vmul.f32 %v4179_v33, %v4179_v33  ;;  %v643_v44 = vmul.f32 %v4193_v43, %v4193_v43 }
  0xaf   :  { %v5052_v11 = vpop.xlane.xlu0 %249  ;;  %v807_v30 = vsel %vm182_vm0, %v622_v10, 0.0  ;;  %v633_v10 = vmul.f32 %v4108_v58, %v4108_v58  ;;  %v650_v32 = vmul.f32 %v4200_v48, %v4200_v48  ;;  %v648_v33 = vmul.f32 %v4205_v49, %v4205_v49 }
  0xb0   :  { %v808_v34 = vadd.f32 %v807_v30, %v621_v2  ;;  %v811_v39 = vsel %vm182_vm0, %v624_v31, 0.0  ;;  %v635_v31 = vmul.f32 %v4141_v12, %v4141_v12  ;;  %v649_v46 = vmul.f32 %v4212_v56, %v4212_v56 }
  0xb1   :  { %785 = vadd.xlane.f32.xlu1 %v784_v5  ;;  %v803_v5 = vsel %vm182_vm0, %v620_v45, 0.0  ;;  %v812_v37 = vadd.f32 %v811_v39, %v623_v7  ;;  %v832_v58 = vadd.f32 %v831_v54, %v633_v10  ;;  %v639_v7 = vmul.f32 %v4167_v27, %v4167_v27 }
  0xb2   :  { %781 = vadd.xlane.f32.xlu0 %v780_v25  ;;  %v5059_v4 = vpop.xlane.xlu1 %261  ;;  %v804_v0 = vadd.f32 %v803_v5, %v619_v6  ;;  %v636_v6 = vmul.f32 %v4127_v63, %v4127_v63  ;;  %v640_v63 = vmul.f32 %v4153_v17, %v4153_v17  ;;  %v645_v27 = vmul.f32 %v4186_v40, %v4186_v40 }
  0xb3   :  { %v5066_v41 = vpop.xlane.xlu0 %257  ;;  %v647_v47 = vmul.f32 %v4219_v59, %v4219_v59  ;;  %v863_v48 = vsel %vm182_vm0, %v650_v32, 0.0  ;;  %v859_v49 = vsel %vm182_vm0, %v648_v33, 0.0  ;;  %v8936_v59 = vld [vmem:[#allocation3_spill] sm:$0xff] }
  0xb4   :  { %v843_v17 = vsel %vm182_vm0, %v640_v63, 0.0  ;;  %v864_v56 = vadd.f32 %v863_v48, %v649_v46 }
  0xb5   :  { %793 = vadd.xlane.f32.xlu1 %v792_v18  ;;  %v844_v15 = vadd.f32 %v843_v17, %v639_v7  ;;  %v860_v54 = vadd.f32 %v859_v49, %v647_v47  ;;  %v8941_v7 = vld [vmem:[#allocation8_spill] sm:$0xff]  ;;  %v8947_v49 = vld [vmem:[#allocation13_spill] sm:$0xff] }
  0xb6   :  { %789 = vadd.xlane.f32.xlu0 %v788_v29  ;;  %v5075_v28 = vpop.xlane.xlu1 %269  ;;  %v627_v29 = vmul.f32 %v4089_v52, %v4089_v52 }
  0xb7   :  { %v5082_v19 = vpop.xlane.xlu0 %265 }
  0xb8   :  { %v820_v45 = vadd.f32 %v819_v22, %v627_v29  ;;  %v851_v29 = vsel %vm182_vm0, %v644_v14, 0.0 }
  0xb9   :  { %801 = vadd.xlane.f32.xlu1 %v800_v26  ;;  %v638_v26 = vmul.f32 %v4122_v62, %v4122_v62  ;;  %v642_v62 = vmul.f32 %v4148_v16, %v4148_v16  ;;  %v852_v22 = vadd.f32 %v851_v29, %v643_v44  ;;  %v8945_v29 = vld [vmem:[#allocation11_spill] sm:$0xff] }
  0xba   :  { %797 = vadd.xlane.f32.xlu0 %v796_v51  ;;  %v5089_v25 = vpop.xlane.xlu1 %277  ;;  %v828_v51 = vadd.f32 %v827_v55, %v631_v23  ;;  %v8935_v23 = vld [vmem:[#allocation2_spill] sm:$0xff]  ;;  %v653_v55 = vmul.f32 %v8936_v59, %v8936_v59 }
  0xbb   :  { %v5095_v13 = vpop.xlane.xlu0 %273  ;;  %v839_v1 = vsel %vm182_vm0, %v638_v26, 0.0  ;;  %v847_v16 = vsel %vm182_vm0, %v642_v62, 0.0 }
  0xbc   :  { %v840_v8 = vadd.f32 %v839_v1, %v637_v60  ;;  %v848_v24 = vadd.f32 %v847_v16, %v641_v36  ;;  %v8939_v1 = vld [vmem:[#allocation6_spill] sm:$0xff] }
  0xbd   :  { %809 = vadd.xlane.f32.xlu1 %v808_v34  ;;  %v835_v34 = vsel %vm182_vm0, %v636_v6, 0.0 }
  0xbe   :  { %805 = vadd.xlane.f32.xlu0 %v804_v0  ;;  %v5101_v18 = vpop.xlane.xlu1 %285  ;;  %v836_v0 = vadd.f32 %v835_v34, %v635_v31  ;;  %v656_v31 = vmul.f32 %v8939_v1, %v8939_v1 }
  0xbf   :  { %v5110_v20 = vpop.xlane.xlu0 %281 }
  0xc0   :  { %v875_v14 = vsel %vm182_vm0, %v656_v31, 0.0 }
  0xc1   :  { %817 = vadd.xlane.f32.xlu1 %v816_v42 }
  0xc2   :  { %813 = vadd.xlane.f32.xlu0 %v812_v37  ;;  %v5117_v52 = vpop.xlane.xlu1 %293  ;;  %v855_v37 = vsel %vm182_vm0, %v646_v38, 0.0 }
  0xc3   :  { %v5123_v2 = vpop.xlane.xlu0 %289  ;;  %v856_v40 = vadd.f32 %v855_v37, %v645_v27  ;;  %v8944_v37 = vld [vmem:[#allocation10_spill] sm:$0xff] }
  0xc4   :  { %v660_v44 = vmul.f32 %v8944_v37, %v8944_v37 }
  0xc5   :  { %825 = vadd.xlane.f32.xlu1 %v824_v50  ;;  %v654_v50 = vmul.f32 %v4226_v3, %v4226_v3  ;;  %v8938_v3 = vld [vmem:[#allocation5_spill] sm:$0xff] }
  0xc6   :  { %821 = vadd.xlane.f32.xlu0 %v820_v45  ;;  %v5129_v30 = vpop.xlane.xlu1 %301  ;;  %v652_v45 = vmul.f32 %v8935_v23, %v8935_v23  ;;  %v658_v60 = vmul.f32 %v8938_v3, %v8938_v3  ;;  %v8948_v23 = vld [vmem:[#allocation14_spill] sm:$0xff] }
  0xc7   :  { %v5138_v5 = vpop.xlane.xlu0 %297  ;;  %v871_v6 = vsel %vm182_vm0, %v654_v50, 0.0  ;;  %v666_v50 = vmul.f32 %v8947_v49, %v8947_v49 }
  0xc8   :  { %v867_v63 = vsel %vm182_vm0, %v652_v45, 0.0  ;;  %v872_v34 = vadd.f32 %v871_v6, %v653_v55  ;;  %v879_v38 = vsel %vm182_vm0, %v658_v60, 0.0  ;;  %v664_v45 = vmul.f32 %v8948_v23, %v8948_v23  ;;  %v8950_v55 = vld [vmem:[#allocation15_spill] sm:$0xff] }
  0xc9   :  { %833 = vadd.xlane.f32.xlu1 %v832_v58  ;;  %v8937_v58 = vld [vmem:[#allocation4_spill] sm:$0xff]  ;;  %v665_v6 = vmul.f32 %v8950_v55, %v8950_v55  ;;  %v895_v1 = vsel %vm182_vm0, %v666_v50, 0.0  ;;  %v8961_v50 = vld [vmem:[#allocation23_spill] sm:$0xff] }
  0xca   :  { %829 = vadd.xlane.f32.xlu0 %v828_v51  ;;  %v5145_v12 = vpop.xlane.xlu1 %309  ;;  %v651_v51 = vmul.f32 %v8937_v58, %v8937_v58  ;;  %v8951_v58 = vld [vmem:[#allocation16_spill] sm:$0xff]  ;;  %v891_v31 = vsel %vm182_vm0, %v664_v45, 0.0  ;;  %v673_v23 = vmul.f32 %v8961_v50, %v8961_v50 }
  0xcb   :  { %v5151_v39 = vpop.xlane.xlu0 %305  ;;  %v8962_v45 = vld [vmem:[#allocation24_spill] sm:$0xff] }
  0xcc   :  { %v868_v17 = vadd.f32 %v867_v63, %v651_v51  ;;  %v663_v51 = vmul.f32 %v8951_v58, %v8951_v58  ;;  %v8952_v63 = vld [vmem:[#allocation17_spill] sm:$0xff]  ;;  %v8974_v50 = vld [vmem:[#allocation32_spill] sm:$0xff] }
  0xcd   :  { %841 = vadd.xlane.f32.xlu1 %v840_v8  ;;  %v8940_v8 = vld [vmem:[#allocation7_spill] sm:$0xff] }
  0xce   :  { %837 = vadd.xlane.f32.xlu0 %v836_v0  ;;  %v5157_v42 = vpop.xlane.xlu1 %317  ;;  %v657_v36 = vmul.f32 %v8940_v8, %v8940_v8  ;;  %v655_v0 = vmul.f32 %v8941_v7, %v8941_v7  ;;  %v3892_v8 = vmov 0   ;;  %v8954_v7 = vld [vmem:[#allocation18_spill] sm:$0xff] }
  0xcf   :  { %v5166_v21 = vpop.xlane.xlu0 %313  ;;  %3549 = vset.pattern.permute.xlu1 %v3892_v8  ;;  %3548 = vset.pattern.permute.xlu0 %v3892_v8 }
  0xd0   :  { %v880_v32 = vadd.f32 %v879_v38, %v657_v36  ;;  %v876_v33 = vadd.f32 %v875_v14, %v655_v0  ;;  %v668_v0 = vmul.f32 %v8954_v7, %v8954_v7  ;;  %v892_v38 = vadd.f32 %v891_v31, %v663_v51  ;;  %v8955_v14 = vld [vmem:[#allocation19_spill] sm:$0xff]  ;;  %v8964_v51 = vld [vmem:[#allocation25_spill] sm:$0xff]  ;;  %v8966_v31 = vld [vmem:[#allocation26_spill] sm:$0xff] }
  0xd1   :  { %849 = vadd.xlane.f32.xlu1 %v848_v24  ;;  %v8942_v24 = vld [vmem:[#allocation9_spill] sm:$0xff]  ;;  %v8967_v7 = vld [vmem:[#allocation27_spill] sm:$0xff] }
  0xd2   :  { %845 = vadd.xlane.f32.xlu0 %v844_v15  ;;  %v5173_v43 = vpop.xlane.xlu1 %325  ;;  %v662_v15 = vmul.f32 %v8942_v24, %v8942_v24  ;;  %v669_v24 = vmul.f32 %v8955_v14, %v8955_v14  ;;  %v8969_v14 = vld [vmem:[#allocation28_spill] sm:$0xff] }
  0xd3   :  { %v5179_v10 = vpop.xlane.xlu0 %321 }
  0xd4   :  { %v887_v47 = vsel %vm182_vm0, %v662_v15, 0.0 }
  0xd5   :  { %857 = vadd.xlane.f32.xlu1 %v856_v40  ;;  %v661_v40 = vmul.f32 %v8945_v29, %v8945_v29 }
  0xd6   :  { %853 = vadd.xlane.f32.xlu0 %v852_v22  ;;  %v5185_v26 = vpop.xlane.xlu1 %333  ;;  %v8946_v22 = vld [vmem:[#allocation12_spill] sm:$0xff] }
  0xd7   :  { %v5194_v62 = vpop.xlane.xlu0 %329  ;;  %v659_v48 = vmul.f32 %v8946_v22, %v8946_v22  ;;  %v888_v59 = vadd.f32 %v887_v47, %v661_v40  ;;  %v8959_v40 = vld [vmem:[#allocation22_spill] sm:$0xff] }
  0xd8   :  { %v672_v47 = vmul.f32 %v8959_v40, %v8959_v40 }
  0xd9   :  { %865 = vadd.xlane.f32.xlu1 %v864_v56 }
  0xda   :  { %861 = vadd.xlane.f32.xlu0 %v860_v54  ;;  %v5201_v16 = vpop.xlane.xlu1 %341  ;;  %v883_v54 = vsel %vm182_vm0, %v660_v44, 0.0  ;;  %v8957_v44 = vld [vmem:[#allocation20_spill] sm:$0xff]  ;;  %v907_v58 = vsel %vm182_vm0, %v672_v47, 0.0 }
  0xdb   :  { %v5207_v27 = vpop.xlane.xlu0 %337  ;;  %v884_v60 = vadd.f32 %v883_v54, %v659_v48  ;;  %v899_v48 = vsel %vm182_vm0, %v668_v0, 0.0  ;;  %v671_v54 = vmul.f32 %v8962_v45, %v8962_v45  ;;  %v677_v0 = vmul.f32 %v8967_v7, %v8967_v7 }
  0xdc   :  { %8943 = vst [vmem:[#allocation2_spill] sm:$0xff] %v5207_v27 }
  0xdd   :  { %873 = vadd.xlane.f32.xlu1 %v872_v34  ;;  %v670_v34 = vmul.f32 %v8952_v63, %v8952_v63  ;;  %v676_v63 = vmul.f32 %v8966_v31, %v8966_v31  ;;  %v908_v8 = vadd.f32 %v907_v58, %v671_v54  ;;  %v8976_v58 = vld [vmem:[#allocation33_spill] sm:$0xff]  ;;  %v8978_v31 = vld [vmem:[#allocation34_spill] sm:$0xff] }
  0xde   :  { %869 = vadd.xlane.f32.xlu0 %v868_v17  ;;  %v5213_v46 = vpop.xlane.xlu1 %349  ;;  %v896_v17 = vadd.f32 %v895_v1, %v665_v6 }
  0xdf   :  { %v5222_v56 = vpop.xlane.xlu0 %345  ;;  %v903_v37 = vsel %vm182_vm0, %v670_v34, 0.0  ;;  %v915_v40 = vsel %vm182_vm0, %v676_v63, 0.0  ;;  %v684_v63 = vmul.f32 %v8978_v31, %v8978_v31 }
  0xe0   :  { %8949 = vst [vmem:[#allocation3_spill] sm:$0xff] %v5222_v56  ;;  %v904_v49 = vadd.f32 %v903_v37, %v669_v24  ;;  %v675_v24 = vmul.f32 %v8969_v14, %v8969_v14  ;;  %v8970_v37 = vld [vmem:[#allocation29_spill] sm:$0xff] }
  0xe1   :  { %881 = vadd.xlane.f32.xlu1 %v880_v32  ;;  %v667_v32 = vmul.f32 %v8957_v44, %v8957_v44  ;;  %v682_v44 = vmul.f32 %v8970_v37, %v8970_v37 }
  0xe2   :  { %877 = vadd.xlane.f32.xlu0 %v876_v33  ;;  %v5229_v3 = vpop.xlane.xlu1 %357  ;;  %v8958_v33 = vld [vmem:[#allocation21_spill] sm:$0xff]  ;;  %v916_v54 = vadd.f32 %v915_v40, %v675_v24  ;;  %v8981_v24 = vld [vmem:[#allocation36_spill] sm:$0xff] }
  0xe3   :  { %v5235_v36 = vpop.xlane.xlu0 %353  ;;  %v674_v29 = vmul.f32 %v8958_v33, %v8958_v33  ;;  %v900_v55 = vadd.f32 %v899_v48, %v667_v32  ;;  %v8971_v32 = vld [vmem:[#allocation30_spill] sm:$0xff]  ;;  %v8973_v48 = vld [vmem:[#allocation31_spill] sm:$0xff]  ;;  %v683_v37 = vmul.f32 %v8981_v24, %v8981_v24 }
  0xe4   :  { %8953 = vst [vmem:[#allocation4_spill] sm:$0xff] %v5235_v36  ;;  %v680_v33 = vmul.f32 %v8971_v32, %v8971_v32 }
  0xe5   :  { %889 = vadd.xlane.f32.xlu1 %v888_v59  ;;  %v911_v6 = vsel %vm182_vm0, %v674_v29, 0.0 }
  0xe6   :  { %885 = vadd.xlane.f32.xlu0 %v884_v60  ;;  %v5241_v15 = vpop.xlane.xlu1 %365  ;;  %v678_v60 = vmul.f32 %v8964_v51, %v8964_v51  ;;  %v912_v34 = vadd.f32 %v911_v6, %v673_v23  ;;  %v679_v23 = vmul.f32 %v8974_v50, %v8974_v50  ;;  %v923_v6 = vsel %vm182_vm0, %v680_v33, 0.0  ;;  %v8983_v33 = vld [vmem:[#allocation38_spill] sm:$0xff]  ;;  %v8985_v50 = vld [vmem:[#allocation39_spill] sm:$0xff] }
  0xe7   :  { %8956 = vst [vmem:[#allocation5_spill] sm:$0xff] %v5241_v15  ;;  %v5250_v22 = vpop.xlane.xlu0 %361  ;;  %v686_v51 = vmul.f32 %v8976_v58, %v8976_v58  ;;  %v688_v40 = vmul.f32 %v8983_v33, %v8983_v33  ;;  %v8991_v33 = vld [vmem:[#allocation43_spill] sm:$0xff] }
  0xe8   :  { %8960 = vst [vmem:[#allocation6_spill] sm:$0xff] %v5250_v22  ;;  %v924_v7 = vadd.f32 %v923_v6, %v679_v23  ;;  %v689_v23 = vmul.f32 %v8985_v50, %v8985_v50  ;;  %v8994_v50 = vld [vmem:[#allocation45_spill] sm:$0xff] }
  0xe9   :  { %897 = vadd.xlane.f32.xlu1 %v896_v17  ;;  %v935_v14 = vsel %vm182_vm0, %v686_v51, 0.0  ;;  %v939_v31 = vsel %vm182_vm0, %v688_v40, 0.0  ;;  %v8993_v40 = vld [vmem:[#allocation44_spill] sm:$0xff] }
  0xea   :  { %893 = vadd.xlane.f32.xlu0 %v892_v38  ;;  %v5257_v59 = vpop.xlane.xlu1 %373  ;;  %v919_v38 = vsel %vm182_vm0, %v678_v60, 0.0 }
  0xeb   :  { %8963 = vst [vmem:[#allocation7_spill] sm:$0xff] %v5257_v59  ;;  %v5263_v1 = vpop.xlane.xlu0 %369  ;;  %v920_v47 = vadd.f32 %v919_v38, %v677_v0  ;;  %v8979_v0 = vld [vmem:[#allocation35_spill] sm:$0xff] }
  0xec   :  { %8965 = vst [vmem:[#allocation8_spill] sm:$0xff] %v5263_v1 }
  0xed   :  { %905 = vadd.xlane.f32.xlu1 %v904_v49  ;;  %v681_v49 = vmul.f32 %v8973_v48, %v8973_v48  ;;  %v931_v48 = vsel %vm182_vm0, %v684_v63, 0.0 }
  0xee   :  { %901 = vadd.xlane.f32.xlu0 %v900_v55  ;;  %v5269_v17 = vpop.xlane.xlu1 %381  ;;  %v927_v55 = vsel %vm182_vm0, %v682_v44, 0.0  ;;  %v8982_v44 = vld [vmem:[#allocation37_spill] sm:$0xff]  ;;  %v932_v58 = vadd.f32 %v931_v48, %v683_v37  ;;  %v691_v48 = vmul.f32 %v8993_v40, %v8993_v40 }
  0xef   :  { %8968 = vst [vmem:[#allocation9_spill] sm:$0xff] %v5269_v17  ;;  %v5278_v29 = vpop.xlane.xlu0 %377  ;;  %v690_v32 = vmul.f32 %v8982_v44, %v8982_v44 }
  0xf0   :  { %8972 = vst [vmem:[#allocation10_spill] sm:$0xff] %v5278_v29  ;;  %v9087_v29 = vld [vmem:[#allocation115_spill] sm:$0xff] }
  0xf1   :  { %913 = vadd.xlane.f32.xlu1 %v912_v34  ;;  %v928_v34 = vadd.f32 %v927_v55, %v681_v49  ;;  %v943_v51 = vsel %vm182_vm0, %v690_v32, 0.0 }
  0xf2   :  { %909 = vadd.xlane.f32.xlu0 %v908_v8  ;;  %v5285_v45 = vpop.xlane.xlu1 %389  ;;  %v685_v8 = vmul.f32 %v8979_v0, %v8979_v0  ;;  %v8988_v0 = vld [vmem:[#allocation41_spill] sm:$0xff] }
  0xf3   :  { %8975 = vst [vmem:[#allocation11_spill] sm:$0xff] %v5285_v45  ;;  %v5291_v60 = vpop.xlane.xlu0 %385  ;;  %v694_v24 = vmul.f32 %v8988_v0, %v8988_v0  ;;  %v8995_v0 = vld [vmem:[#allocation46_spill] sm:$0xff] }
  0xf4   :  { %8977 = vst [vmem:[#allocation12_spill] sm:$0xff] %v5291_v60  ;;  %v936_v49 = vadd.f32 %v935_v14, %v685_v8  ;;  %v944_v14 = vadd.f32 %v943_v51, %v689_v23  ;;  %v9081_v60 = vld [vmem:[#allocation109_spill] sm:$0xff] }
  0xf5   :  { %921 = vadd.xlane.f32.xlu1 %v920_v47  ;;  %v951_v32 = vsel %vm182_vm0, %v694_v24, 0.0 }
  0xf6   :  { %917 = vadd.xlane.f32.xlu0 %v916_v54  ;;  %v5297_v38 = vpop.xlane.xlu1 %397  ;;  %v8986_v54 = vld [vmem:[#allocation40_spill] sm:$0xff] }
  0xf7   :  { %8980 = vst [vmem:[#allocation13_spill] sm:$0xff] %v5297_v38  ;;  %v5306_v47 = vpop.xlane.xlu0 %393  ;;  %v687_v55 = vmul.f32 %v8986_v54, %v8986_v54  ;;  %v698_v54 = vmul.f32 %v8994_v50, %v8994_v50 }
  0xf8   :  { %8984 = vst [vmem:[#allocation14_spill] sm:$0xff] %v5306_v47  ;;  %v9007_v47 = vld [vmem:[#allocation54_spill] sm:$0xff] }
  0xf9   :  { %929 = vadd.xlane.f32.xlu1 %v928_v34  ;;  %v8990_v34 = vld [vmem:[#allocation42_spill] sm:$0xff]  ;;  %v940_v44 = vadd.f32 %v939_v31, %v687_v55  ;;  %v8998_v31 = vld [vmem:[#allocation48_spill] sm:$0xff]  ;;  %v959_v50 = vsel %vm182_vm0, %v698_v54, 0.0 }
  0xfa   :  { %925 = vadd.xlane.f32.xlu0 %v924_v7  ;;  %v5313_v6 = vpop.xlane.xlu1 %405  ;;  %v692_v8 = vmul.f32 %v8990_v34, %v8990_v34  ;;  %v693_v7 = vmul.f32 %v8991_v33, %v8991_v33  ;;  %v696_v34 = vmul.f32 %v8995_v0, %v8995_v0  ;;  %v695_v24 = vmul.f32 %v8998_v31, %v8998_v31  ;;  %v9003_v31 = vld [vmem:[#allocation51_spill] sm:$0xff] }
  0xfb   :  { %8987 = vst [vmem:[#allocation15_spill] sm:$0xff] %v5313_v6  ;;  %v5319_v63 = vpop.xlane.xlu0 %401  ;;  %v9088_v6 = vld [vmem:[#allocation116_spill] sm:$0xff] }
  0xfc   :  { %8989 = vst [vmem:[#allocation16_spill] sm:$0xff] %v5319_v63  ;;  %v947_v23 = vsel %vm182_vm0, %v692_v8, 0.0  ;;  %v952_v55 = vadd.f32 %v951_v32, %v693_v7  ;;  %v955_v0 = vsel %vm182_vm0, %v696_v34, 0.0  ;;  %v9000_v63 = vld [vmem:[#allocation49_spill] sm:$0xff]  ;;  %v9005_v34 = vld [vmem:[#allocation52_spill] sm:$0xff] }
  0xfd   :  { %937 = vadd.xlane.f32.xlu1 %v936_v49  ;;  %v948_v40 = vadd.f32 %v947_v23, %v691_v48  ;;  %v699_v23 = vmul.f32 %v9005_v34, %v9005_v34 }
  0xfe   :  { %933 = vadd.xlane.f32.xlu0 %v932_v58  ;;  %v5325_v37 = vpop.xlane.xlu1 %413  ;;  %v8997_v58 = vld [vmem:[#allocation47_spill] sm:$0xff] }
  0xff   :  { %8992 = vst [vmem:[#allocation17_spill] sm:$0xff] %v5325_v37  ;;  %v5334_v49 = vpop.xlane.xlu0 %409  ;;  %v697_v51 = vmul.f32 %v8997_v58, %v8997_v58  ;;  %v956_v58 = vadd.f32 %v955_v0, %v695_v24  ;;  %v9010_v0 = vld [vmem:[#allocation56_spill] sm:$0xff] }
 0x100   :  { %8996 = vst [vmem:[#allocation18_spill] sm:$0xff] %v5334_v49  ;;  %v702_v49 = vmul.f32 %v9000_v63, %v9000_v63  ;;  %v9006_v63 = vld [vmem:[#allocation53_spill] sm:$0xff] }
 0x101   :  { %945 = vadd.xlane.f32.xlu1 %v944_v14  ;;  %v9002_v14 = vld [vmem:[#allocation50_spill] sm:$0xff]  ;;  %v960_v32 = vadd.f32 %v959_v50, %v697_v51 }
 0x102   :  { %941 = vadd.xlane.f32.xlu0 %v940_v44  ;;  %v5341_v33 = vpop.xlane.xlu1 %421  ;;  %v700_v7 = vmul.f32 %v9002_v14, %v9002_v14  ;;  %v701_v44 = vmul.f32 %v9003_v31, %v9003_v31  ;;  %v967_v54 = vsel %vm182_vm0, %v702_v49, 0.0  ;;  %v704_v14 = vmul.f32 %v9007_v47, %v9007_v47 }
 0x103   :  { %8999 = vst [vmem:[#allocation19_spill] sm:$0xff] %v5341_v33  ;;  %v5347_v8 = vpop.xlane.xlu0 %417  ;;  %v703_v49 = vmul.f32 %v9010_v0, %v9010_v0  ;;  %v9015_v0 = vld [vmem:[#allocation59_spill] sm:$0xff] }
 0x104   :  { %9001 = vst [vmem:[#allocation20_spill] sm:$0xff] %v5347_v8  ;;  %v706_v8 = vmul.f32 %v9006_v63, %v9006_v63  ;;  %v963_v51 = vsel %vm182_vm0, %v700_v7, 0.0  ;;  %v968_v24 = vadd.f32 %v967_v54, %v701_v44  ;;  %v971_v47 = vsel %vm182_vm0, %v704_v14, 0.0  ;;  %v9017_v14 = vld [vmem:[#allocation60_spill] sm:$0xff] }
 0x105   :  { %953 = vadd.xlane.f32.xlu1 %v952_v55  ;;  %v964_v34 = vadd.f32 %v963_v51, %v699_v23  ;;  %v707_v51 = vmul.f32 %v9017_v14, %v9017_v14 }
 0x106   :  { %949 = vadd.xlane.f32.xlu0 %v948_v40  ;;  %v5353_v48 = vpop.xlane.xlu1 %429  ;;  %v9009_v40 = vld [vmem:[#allocation55_spill] sm:$0xff]  ;;  %v975_v63 = vsel %vm182_vm0, %v706_v8, 0.0 }
 0x107   :  { %9004 = vst [vmem:[#allocation21_spill] sm:$0xff] %v5353_v48  ;;  %v5362_v55 = vpop.xlane.xlu0 %425  ;;  %v705_v50 = vmul.f32 %v9009_v40, %v9009_v40  ;;  %v9012_v48 = vld [vmem:[#allocation57_spill] sm:$0xff]  ;;  %v972_v40 = vadd.f32 %v971_v47, %v703_v49  ;;  %v9022_v47 = vld [vmem:[#allocation64_spill] sm:$0xff] }
 0x108   :  { %9008 = vst [vmem:[#allocation22_spill] sm:$0xff] %v5362_v55  ;;  %v710_v55 = vmul.f32 %v9012_v48, %v9012_v48  ;;  %v9018_v48 = vld [vmem:[#allocation61_spill] sm:$0xff] }
 0x109   :  { %961 = vadd.xlane.f32.xlu1 %v960_v32  ;;  %v9014_v32 = vld [vmem:[#allocation58_spill] sm:$0xff]  ;;  %v976_v54 = vadd.f32 %v975_v63, %v705_v50 }
 0x10a   :  { %957 = vadd.xlane.f32.xlu0 %v956_v58  ;;  %v5369_v31 = vpop.xlane.xlu1 %437  ;;  %v708_v44 = vmul.f32 %v9014_v32, %v9014_v32  ;;  %v709_v58 = vmul.f32 %v9015_v0, %v9015_v0  ;;  %v983_v8 = vsel %vm182_vm0, %v710_v55, 0.0  ;;  %v711_v55 = vmul.f32 %v9022_v47, %v9022_v47  ;;  %v9027_v47 = vld [vmem:[#allocation67_spill] sm:$0xff] }
 0x10b   :  { %9011 = vst [vmem:[#allocation23_spill] sm:$0xff] %v5369_v31  ;;  %v5375_v7 = vpop.xlane.xlu0 %433  ;;  %v9019_v31 = vld [vmem:[#allocation62_spill] sm:$0xff] }
 0x10c   :  { %9013 = vst [vmem:[#allocation24_spill] sm:$0xff] %v5375_v7  ;;  %v714_v7 = vmul.f32 %v9018_v48, %v9018_v48  ;;  %v712_v32 = vmul.f32 %v9019_v31, %v9019_v31  ;;  %v979_v50 = vsel %vm182_vm0, %v708_v44, 0.0  ;;  %v984_v49 = vadd.f32 %v983_v8, %v709_v58 }
 0x10d   :  { %969 = vadd.xlane.f32.xlu1 %v968_v24  ;;  %v980_v14 = vadd.f32 %v979_v50, %v707_v51 }
 0x10e   :  { %965 = vadd.xlane.f32.xlu0 %v964_v34  ;;  %v5381_v23 = vpop.xlane.xlu1 %445  ;;  %v9021_v34 = vld [vmem:[#allocation63_spill] sm:$0xff]  ;;  %v991_v48 = vsel %vm182_vm0, %v714_v7, 0.0  ;;  %v987_v31 = vsel %vm182_vm0, %v712_v32, 0.0  ;;  %v9029_v32 = vld [vmem:[#allocation68_spill] sm:$0xff] }
 0x10f   :  { %9016 = vst [vmem:[#allocation25_spill] sm:$0xff] %v5381_v23  ;;  %v5390_v24 = vpop.xlane.xlu0 %441  ;;  %v713_v63 = vmul.f32 %v9021_v34, %v9021_v34  ;;  %v9024_v23 = vld [vmem:[#allocation65_spill] sm:$0xff]  ;;  %v988_v34 = vadd.f32 %v987_v31, %v711_v55  ;;  %v715_v50 = vmul.f32 %v9029_v32, %v9029_v32  ;;  %v9034_v31 = vld [vmem:[#allocation72_spill] sm:$0xff] }
 0x110   :  { %9020 = vst [vmem:[#allocation26_spill] sm:$0xff] %v5390_v24  ;;  %v718_v24 = vmul.f32 %v9024_v23, %v9024_v23  ;;  %v9030_v23 = vld [vmem:[#allocation69_spill] sm:$0xff] }
 0x111   :  { %977 = vadd.xlane.f32.xlu1 %v976_v54  ;;  %v9026_v54 = vld [vmem:[#allocation66_spill] sm:$0xff]  ;;  %v992_v8 = vadd.f32 %v991_v48, %v713_v63 }
 0x112   :  { %973 = vadd.xlane.f32.xlu0 %v972_v40  ;;  %v5397_v0 = vpop.xlane.xlu1 %453  ;;  %v716_v58 = vmul.f32 %v9026_v54, %v9026_v54  ;;  %v717_v40 = vmul.f32 %v9027_v47, %v9027_v47  ;;  %v999_v7 = vsel %vm182_vm0, %v718_v24, 0.0  ;;  %v719_v24 = vmul.f32 %v9034_v31, %v9034_v31  ;;  %v9039_v31 = vld [vmem:[#allocation75_spill] sm:$0xff] }
 0x113   :  { %9023 = vst [vmem:[#allocation27_spill] sm:$0xff] %v5397_v0  ;;  %v5403_v44 = vpop.xlane.xlu0 %449  ;;  %v9031_v0 = vld [vmem:[#allocation70_spill] sm:$0xff] }
 0x114   :  { %9025 = vst [vmem:[#allocation28_spill] sm:$0xff] %v5403_v44  ;;  %v722_v44 = vmul.f32 %v9030_v23, %v9030_v23  ;;  %v720_v54 = vmul.f32 %v9031_v0, %v9031_v0  ;;  %v995_v63 = vsel %vm182_vm0, %v716_v58, 0.0  ;;  %v1000_v55 = vadd.f32 %v999_v7, %v717_v40 }
 0x115   :  { %985 = vadd.xlane.f32.xlu1 %v984_v49  ;;  %v996_v32 = vadd.f32 %v995_v63, %v715_v50 }
 0x116   :  { %981 = vadd.xlane.f32.xlu0 %v980_v14  ;;  %v5409_v51 = vpop.xlane.xlu1 %461  ;;  %v9033_v14 = vld [vmem:[#allocation71_spill] sm:$0xff]  ;;  %v1007_v23 = vsel %vm182_vm0, %v722_v44, 0.0  ;;  %v1003_v0 = vsel %vm182_vm0, %v720_v54, 0.0  ;;  %v9041_v54 = vld [vmem:[#allocation76_spill] sm:$0xff] }
 0x117   :  { %9028 = vst [vmem:[#allocation29_spill] sm:$0xff] %v5409_v51  ;;  %v5418_v49 = vpop.xlane.xlu0 %457  ;;  %v721_v48 = vmul.f32 %v9033_v14, %v9033_v14  ;;  %v9036_v51 = vld [vmem:[#allocation73_spill] sm:$0xff]  ;;  %v1004_v14 = vadd.f32 %v1003_v0, %v719_v24  ;;  %v723_v63 = vmul.f32 %v9041_v54, %v9041_v54  ;;  %v9046_v0 = vld [vmem:[#allocation80_spill] sm:$0xff] }
 0x118   :  { %9032 = vst [vmem:[#allocation30_spill] sm:$0xff] %v5418_v49  ;;  %v726_v49 = vmul.f32 %v9036_v51, %v9036_v51  ;;  %v9042_v51 = vld [vmem:[#allocation77_spill] sm:$0xff] }
 0x119   :  { %993 = vadd.xlane.f32.xlu1 %v992_v8  ;;  %v9038_v8 = vld [vmem:[#allocation74_spill] sm:$0xff]  ;;  %v1008_v7 = vadd.f32 %v1007_v23, %v721_v48 }
 0x11a   :  { %989 = vadd.xlane.f32.xlu0 %v988_v34  ;;  %v5425_v47 = vpop.xlane.xlu1 %469  ;;  %v724_v40 = vmul.f32 %v9038_v8, %v9038_v8  ;;  %v725_v34 = vmul.f32 %v9039_v31, %v9039_v31  ;;  %v1015_v44 = vsel %vm182_vm0, %v726_v49, 0.0  ;;  %v727_v49 = vmul.f32 %v9046_v0, %v9046_v0  ;;  %v9051_v0 = vld [vmem:[#allocation83_spill] sm:$0xff] }
 0x11b   :  { %9035 = vst [vmem:[#allocation31_spill] sm:$0xff] %v5425_v47  ;;  %v5431_v58 = vpop.xlane.xlu0 %465  ;;  %v9043_v47 = vld [vmem:[#allocation78_spill] sm:$0xff] }
 0x11c   :  { %9037 = vst [vmem:[#allocation32_spill] sm:$0xff] %v5431_v58  ;;  %v730_v58 = vmul.f32 %v9042_v51, %v9042_v51  ;;  %v728_v8 = vmul.f32 %v9043_v47, %v9043_v47  ;;  %v1011_v48 = vsel %vm182_vm0, %v724_v40, 0.0  ;;  %v1016_v24 = vadd.f32 %v1015_v44, %v725_v34 }
 0x11d   :  { %1001 = vadd.xlane.f32.xlu1 %v1000_v55  ;;  %v1012_v54 = vadd.f32 %v1011_v48, %v723_v63 }
 0x11e   :  { %997 = vadd.xlane.f32.xlu0 %v996_v32  ;;  %v5437_v50 = vpop.xlane.xlu1 %477  ;;  %v9045_v32 = vld [vmem:[#allocation79_spill] sm:$0xff]  ;;  %v1023_v51 = vsel %vm182_vm0, %v730_v58, 0.0  ;;  %v1019_v47 = vsel %vm182_vm0, %v728_v8, 0.0  ;;  %v9053_v8 = vld [vmem:[#allocation84_spill] sm:$0xff] }
 0x11f   :  { %9040 = vst [vmem:[#allocation33_spill] sm:$0xff] %v5437_v50  ;;  %v5446_v55 = vpop.xlane.xlu0 %473  ;;  %v729_v23 = vmul.f32 %v9045_v32, %v9045_v32  ;;  %v9048_v50 = vld [vmem:[#allocation81_spill] sm:$0xff]  ;;  %v1020_v32 = vadd.f32 %v1019_v47, %v727_v49  ;;  %v731_v48 = vmul.f32 %v9053_v8, %v9053_v8  ;;  %v9058_v47 = vld [vmem:[#allocation88_spill] sm:$0xff] }
 0x120   :  { %9044 = vst [vmem:[#allocation34_spill] sm:$0xff] %v5446_v55  ;;  %v734_v55 = vmul.f32 %v9048_v50, %v9048_v50  ;;  %v9054_v50 = vld [vmem:[#allocation85_spill] sm:$0xff] }
 0x121   :  { %1009 = vadd.xlane.f32.xlu1 %v1008_v7  ;;  %v9050_v7 = vld [vmem:[#allocation82_spill] sm:$0xff]  ;;  %v1024_v44 = vadd.f32 %v1023_v51, %v729_v23 }
 0x122   :  { %1005 = vadd.xlane.f32.xlu0 %v1004_v14  ;;  %v5453_v31 = vpop.xlane.xlu1 %485  ;;  %v732_v34 = vmul.f32 %v9050_v7, %v9050_v7  ;;  %v733_v14 = vmul.f32 %v9051_v0, %v9051_v0  ;;  %v1031_v58 = vsel %vm182_vm0, %v734_v55, 0.0  ;;  %v735_v55 = vmul.f32 %v9058_v47, %v9058_v47  ;;  %v9063_v47 = vld [vmem:[#allocation91_spill] sm:$0xff] }
 0x123   :  { %9047 = vst [vmem:[#allocation35_spill] sm:$0xff] %v5453_v31  ;;  %v5459_v40 = vpop.xlane.xlu0 %481  ;;  %v9055_v31 = vld [vmem:[#allocation86_spill] sm:$0xff] }
 0x124   :  { %9049 = vst [vmem:[#allocation36_spill] sm:$0xff] %v5459_v40  ;;  %v738_v40 = vmul.f32 %v9054_v50, %v9054_v50  ;;  %v736_v7 = vmul.f32 %v9055_v31, %v9055_v31  ;;  %v1027_v23 = vsel %vm182_vm0, %v732_v34, 0.0  ;;  %v1032_v49 = vadd.f32 %v1031_v58, %v733_v14 }
 0x125   :  { %1017 = vadd.xlane.f32.xlu1 %v1016_v24  ;;  %v1028_v8 = vadd.f32 %v1027_v23, %v731_v48 }
 0x126   :  { %1013 = vadd.xlane.f32.xlu0 %v1012_v54  ;;  %v5465_v63 = vpop.xlane.xlu1 %493  ;;  %v9057_v54 = vld [vmem:[#allocation87_spill] sm:$0xff]  ;;  %v1039_v50 = vsel %vm182_vm0, %v738_v40, 0.0  ;;  %v1035_v31 = vsel %vm182_vm0, %v736_v7, 0.0  ;;  %v9065_v7 = vld [vmem:[#allocation92_spill] sm:$0xff] }
 0x127   :  { %9052 = vst [vmem:[#allocation37_spill] sm:$0xff] %v5465_v63  ;;  %v5474_v24 = vpop.xlane.xlu0 %489  ;;  %v737_v51 = vmul.f32 %v9057_v54, %v9057_v54  ;;  %v9060_v63 = vld [vmem:[#allocation89_spill] sm:$0xff]  ;;  %v1036_v54 = vadd.f32 %v1035_v31, %v735_v55  ;;  %v739_v23 = vmul.f32 %v9065_v7, %v9065_v7  ;;  %v9070_v31 = vld [vmem:[#allocation96_spill] sm:$0xff] }
 0x128   :  { %9056 = vst [vmem:[#allocation38_spill] sm:$0xff] %v5474_v24  ;;  %v742_v24 = vmul.f32 %v9060_v63, %v9060_v63  ;;  %v9066_v63 = vld [vmem:[#allocation93_spill] sm:$0xff] }
 0x129   :  { %1025 = vadd.xlane.f32.xlu1 %v1024_v44  ;;  %v9062_v44 = vld [vmem:[#allocation90_spill] sm:$0xff]  ;;  %v1040_v58 = vadd.f32 %v1039_v50, %v737_v51 }
 0x12a   :  { %1021 = vadd.xlane.f32.xlu0 %v1020_v32  ;;  %v5481_v0 = vpop.xlane.xlu1 %501  ;;  %v740_v14 = vmul.f32 %v9062_v44, %v9062_v44  ;;  %v741_v32 = vmul.f32 %v9063_v47, %v9063_v47  ;;  %v1047_v40 = vsel %vm182_vm0, %v742_v24, 0.0  ;;  %v743_v24 = vmul.f32 %v9070_v31, %v9070_v31  ;;  %v9075_v31 = vld [vmem:[#allocation100_spill] sm:$0xff] }
 0x12b   :  { %9059 = vst [vmem:[#allocation39_spill] sm:$0xff] %v5481_v0  ;;  %v5487_v34 = vpop.xlane.xlu0 %497  ;;  %v9067_v0 = vld [vmem:[#allocation94_spill] sm:$0xff] }
 0x12c   :  { %9061 = vst [vmem:[#allocation40_spill] sm:$0xff] %v5487_v34  ;;  %v746_v34 = vmul.f32 %v9066_v63, %v9066_v63  ;;  %v744_v44 = vmul.f32 %v9067_v0, %v9067_v0  ;;  %v1043_v51 = vsel %vm182_vm0, %v740_v14, 0.0  ;;  %v1048_v55 = vadd.f32 %v1047_v40, %v741_v32 }
 0x12d   :  { %1033 = vadd.xlane.f32.xlu1 %v1032_v49  ;;  %v1044_v7 = vadd.f32 %v1043_v51, %v739_v23  ;;  %v9076_v51 = vld [vmem:[#allocation102_spill] sm:$0xff] }
 0x12e   :  { %1029 = vadd.xlane.f32.xlu0 %v1028_v8  ;;  %v5493_v48 = vpop.xlane.xlu1 %509  ;;  %v9069_v8 = vld [vmem:[#allocation95_spill] sm:$0xff]  ;;  %v1055_v63 = vsel %vm182_vm0, %v746_v34, 0.0  ;;  %v1051_v0 = vsel %vm182_vm0, %v744_v44, 0.0  ;;  %v747_v44 = vmul.f32 %v9076_v51, %v9076_v51 }
 0x12f   :  { %9064 = vst [vmem:[#allocation41_spill] sm:$0xff] %v5493_v48  ;;  %v5502_v49 = vpop.xlane.xlu0 %505  ;;  %v745_v50 = vmul.f32 %v9069_v8, %v9069_v8  ;;  %v9072_v48 = vld [vmem:[#allocation97_spill] sm:$0xff]  ;;  %v1052_v8 = vadd.f32 %v1051_v0, %v743_v24  ;;  %v9079_v24 = vld [vmem:[#allocation106_spill] sm:$0xff] }
 0x130   :  { %9068 = vst [vmem:[#allocation42_spill] sm:$0xff] %v5502_v49  ;;  %v750_v49 = vmul.f32 %v9072_v48, %v9072_v48 }
 0x131   :  { %1041 = vadd.xlane.f32.xlu1 %v1040_v58  ;;  %v9074_v58 = vld [vmem:[#allocation98_spill] sm:$0xff]  ;;  %v1056_v40 = vadd.f32 %v1055_v63, %v745_v50  ;;  %v9080_v63 = vld [vmem:[#allocation108_spill] sm:$0xff] }
 0x132   :  { %1037 = vadd.xlane.f32.xlu0 %v1036_v54  ;;  %v5509_v47 = vpop.xlane.xlu1 %517  ;;  %v748_v32 = vmul.f32 %v9074_v58, %v9074_v58  ;;  %v749_v54 = vmul.f32 %v9075_v31, %v9075_v31  ;;  %v1063_v34 = vsel %vm182_vm0, %v750_v49, 0.0  ;;  %v751_v49 = vmul.f32 %v9080_v63, %v9080_v63 }
 0x133   :  { %9071 = vst [vmem:[#allocation43_spill] sm:$0xff] %v5509_v47  ;;  %v5515_v14 = vpop.xlane.xlu0 %513  ;;  %v9077_v47 = vld [vmem:[#allocation103_spill] sm:$0xff] }
 0x134   :  { %9073 = vst [vmem:[#allocation44_spill] sm:$0xff] %v5515_v14  ;;  %v754_v48 = vmul.f32 %v9077_v47, %v9077_v47  ;;  %v9078_v14 = vld [vmem:[#allocation104_spill] sm:$0xff]  ;;  %v1064_v50 = vadd.f32 %v1063_v34, %v749_v54  ;;  %v9083_v54 = vld [vmem:[#allocation107_spill] sm:$0xff] }
 0x135   :  { %1049 = vadd.xlane.f32.xlu1 %v1048_v55  ;;  %v752_v33 = vmul.f32 %v9078_v14, %v9078_v14  ;;  %v1059_v55 = vsel %vm182_vm0, %v748_v32, 0.0  ;;  %v758_v14 = vmul.f32 %v9081_v60, %v9081_v60  ;;  %v9082_v32 = vld [vmem:[#allocation110_spill] sm:$0xff]  ;;  %v5540_v34 = vmul.f32 0.0051020407, %v9083_v54 }
 0x136   :  { %1045 = vadd.xlane.f32.xlu0 %v1044_v7  ;;  %v778_v23 = vpop.xlane.xlu1 %777  ;;  %v753_v7 = vmul.f32 %v9079_v24, %v9079_v24  ;;  %v1060_v31 = vadd.f32 %v1059_v55, %v747_v44  ;;  %v1071_v51 = vsel %vm182_vm0, %v754_v48, 0.0  ;;  %v9086_v55 = vld [vmem:[#allocation114_spill] sm:$0xff]  ;;  %v760_v54 = vmul.f32 %v9088_v6, %v9088_v6 }
 0x137   :  { %v774_v58 = vpop.xlane.xlu0 %773  ;;  %v1067_v47 = vsel %vm182_vm0, %v752_v33, 0.0  ;;  %9084 = vst [vmem:[#allocation45_spill] sm:$0xff] %v5540_v34  ;;  %v1079_v33 = vsel %vm182_vm0, %v758_v14, 0.0  ;;  %v755_v60 = vmul.f32 %v9086_v55, %v9086_v55 }
 0x138   :  { %v1072_v24 = vadd.f32 %v1071_v51, %v753_v7  ;;  %v1068_v63 = vadd.f32 %v1067_v47, %v751_v49  ;;  %v9089_v49 = vld [vmem:[#allocation99_spill] sm:$0xff]  ;;  %v1360_v47 = vmul.f32 %v5540_v34, %v5540_v34 }
 0x139   :  { %1057 = vadd.xlane.f32.xlu1 %v1056_v40  ;;  %v756_v40 = vmul.f32 %v9082_v32, %v9082_v32  ;;  %v762_v32 = vmul.f32 %v9087_v29, %v9087_v29  ;;  %v5557_v51 = vmul.f32 0.0051020407, %v9089_v49  ;;  %v9092_v29 = vld [vmem:[#allocation120_spill] sm:$0xff]  ;;  %v1083_v49 = vsel %vm182_vm0, %v760_v54, 0.0 }
 0x13a   :  { %1053 = vadd.xlane.f32.xlu0 %v1052_v8  ;;  %v786_v0 = vpop.xlane.xlu1 %785  ;;  %v9085_v8 = vld [vmem:[#allocation112_spill] sm:$0xff]  ;;  %v759_v38 = vmul.f32 %v9092_v29, %v9092_v29  ;;  %v9097_v29 = vld [vmem:[#allocation105_spill] sm:$0xff] }
 0x13b   :  { %v782_v37 = vpop.xlane.xlu0 %781  ;;  %v757_v44 = vmul.f32 %v9085_v8, %v9085_v8  ;;  %v1075_v7 = vsel %vm182_vm0, %v756_v40, 0.0  ;;  %9090 = vst [vmem:[#allocation46_spill] sm:$0xff] %v5557_v51  ;;  %v9091_v8 = vld [vmem:[#allocation118_spill] sm:$0xff]  ;;  %v1087_v40 = vsel %vm182_vm0, %v762_v32, 0.0  ;;  %v1361_v32 = vmul.f32 %v5557_v51, %v5557_v51 }
 0x13c   :  { %v761_v55 = vmul.f32 %v9091_v8, %v9091_v8  ;;  %v1076_v1 = vadd.f32 %v1075_v7, %v755_v60  ;;  %v1277_v60 = vmul.f32 0.0051020407, %v782_v37  ;;  %v1084_v7 = vadd.f32 %v1083_v49, %v759_v38  ;;  %v3719_v37 = vld [vmem:[%s8521_s0 + $0x500] sm:$0xff] }
 0x13d   :  { %1065 = vadd.xlane.f32.xlu1 %v1064_v50  ;;  %v1080_v14 = vadd.f32 %v1079_v33, %v757_v44  ;;  %v9095_v33 = vld [vmem:[#allocation101_spill] sm:$0xff] }
 0x13e   :  { %1061 = vadd.xlane.f32.xlu0 %v1060_v31  ;;  %v5544_v48 = vpop.xlane.xlu1 %793  ;;  %v1276_v31 = vmul.f32 0.0051020407, %v778_v23  ;;  %v9093_v23 = vld [vmem:[#allocation121_spill] sm:$0xff]  ;;  %v5576_v8 = vmul.f32 0.0051020407, %v9095_v33  ;;  %v1088_v54 = vadd.f32 %v1087_v40, %v761_v55 }
 0x13f   :  { %v5553_v50 = vpop.xlane.xlu0 %789  ;;  %v766_v22 = vmul.f32 %v9093_v23, %v9093_v23  ;;  %v3718_v23 = vld [vmem:[%s8521_s0 + $0x510] sm:$0xff]  ;;  %v1278_v40 = vmul.f32 0.0051020407, %v786_v0 }
 0x140   :  { %9096 = vst [vmem:[#allocation47_spill] sm:$0xff] %v5576_v8  ;;  %v1444_v45 = vsub.f32 %v1276_v31, %v1360_v47  ;;  %v765_v36 = vmul.f32 %v3718_v23, %v3718_v23  ;;  %v763_v31 = vmul.f32 %v3719_v37, %v3719_v37  ;;  %v3720_v47 = vld [vmem:[%s8521_s0 + $0x538] sm:$0xff] }
 0x141   :  { %1073 = vadd.xlane.f32.xlu1 %v1072_v24  ;;  %v9094_v24 = vld [vmem:[#allocation122_spill] sm:$0xff]  ;;  %v1095_v17 = vsel %vm182_vm0, %v766_v22, 0.0  ;;  %v770_v38 = vmul.f32 %v3720_v47, %v3720_v47  ;;  %v3721_v22 = vld [vmem:[%s8521_s0 + $0x528] sm:$0xff]  ;;  %v1445_v47 = vsub.f32 %v1277_v60, %v1361_v32 }
 0x142   :  { %1069 = vadd.xlane.f32.xlu0 %v1068_v63  ;;  %v5565_v6 = vpop.xlane.xlu1 %801  ;;  %v764_v44 = vmul.f32 %v9094_v24, %v9094_v24  ;;  %v5579_v63 = vmul.f32 0.0051020407, %v9097_v29  ;;  %v1275_v24 = vmul.f32 0.0051020407, %v774_v58  ;;  %v768_v58 = vmul.f32 %v3721_v22, %v3721_v22 }
 0x143   :  { %v5571_v34 = vpop.xlane.xlu0 %797  ;;  %v1359_v29 = vmul.f32 %v5576_v8, %v5576_v8  ;;  %v1528_v37 = vmax.f32 %v1444_v45, 0.0  ;;  %v1096_v56 = vadd.f32 %v1095_v17, %v765_v36  ;;  %v1103_v15 = vsel %vm182_vm0, %v770_v38, 0.0  ;;  %v3723_v45 = vld [vmem:[%s8521_s0 + $0x520] sm:$0xff]  ;;  %v9101_v36 = vld [vmem:[#allocation125_spill] sm:$0xff] }
 0x144   :  { %v1362_v23 = vmul.f32 %v5579_v63, %v5579_v63  ;;  %v767_v60 = vmul.f32 %v3723_v45, %v3723_v45  ;;  %v5619_v17 = vmul.f32 0.0051020407, %v9101_v36  ;;  %v1279_v38 = vmul.f32 0.0051020407, %v5553_v50 }
 0x145   :  { %1081 = vadd.xlane.f32.xlu1 %v1080_v14  ;;  %v9098_v14 = vld [vmem:[#allocation123_spill] sm:$0xff]  ;;  %v1443_v22 = vsub.f32 %v1275_v24, %v1359_v29  ;;  %v1696_v24 = vadd.f32 1e-05, %v1528_v37  ;;  %v5633_v37 = vmul.f32 0.0051020407, %v5017_v61 }
 0x146   :  { %1077 = vadd.xlane.f32.xlu0 %v1076_v1  ;;  %v810_v33 = vpop.xlane.xlu1 %809  ;;  %v5594_v55 = vmul.f32 0.0051020407, %v9098_v14  ;;  %v1091_v1 = vsel %vm182_vm0, %v764_v44, 0.0  ;;  %v9100_v14 = vld [vmem:[#allocation113_spill] sm:$0xff]  ;;  %v3722_v44 = vld [vmem:[%s8521_s0 + $0x530] sm:$0xff] }
 0x147   :  { %v5596_v49 = vpop.xlane.xlu0 %805  ;;  %v5607_v51 = vmul.f32 0.0051020407, %v9100_v14  ;;  %v1284_v0 = vmul.f32 0.0051020407, %v810_v33  ;;  %v769_v59 = vmul.f32 %v3722_v44, %v3722_v44  ;;  %v1092_v8 = vadd.f32 %v1091_v1, %v763_v31  ;;  %v9102_v1 = vld [vmem:[#allocation111_spill] sm:$0xff] }
 0x148   :  { %9099 = vst [vmem:[#allocation48_spill] sm:$0xff] %v5594_v55  ;;  %v1368_v32 = vmul.f32 %v5594_v55, %v5594_v55  ;;  %v1529_v31 = vmax.f32 %v1445_v47, 0.0  ;;  %v5626_v29 = vmul.f32 0.0051020407, %v9102_v1  ;;  %v1527_v36 = vmax.f32 %v1443_v22, 0.0 }
 0x149   :  { %1089 = vadd.xlane.f32.xlu1 %v1088_v54  ;;  %v1446_v54 = vsub.f32 %v1278_v40, %v1362_v23  ;;  %v1104_v44 = vadd.f32 %v1103_v15, %v769_v59  ;;  %v1363_v45 = vmul.f32 %v5607_v51, %v5607_v51  ;;  %3550 = vrsqrt.f32 %v1696_v24 }
 0x14a   :  { %1085 = vadd.xlane.f32.xlu0 %v1084_v7  ;;  %v818_v27 = vpop.xlane.xlu1 %817  ;;  %v1099_v7 = vsel %vm182_vm0, %v768_v58, 0.0  ;;  %v1452_v14 = vsub.f32 %v1284_v0, %v1368_v32  ;;  %v1370_v58 = vmul.f32 %v5619_v17, %v5619_v17  ;;  %v1280_v15 = vmul.f32 0.0051020407, %v5544_v48  ;;  %v9103_v0 = vld [vmem:[#allocation119_spill] sm:$0xff] }
 0x14b   :  { %v5621_v33 = vpop.xlane.xlu0 %813  ;;  %v1286_v55 = vmul.f32 0.0051020407, %v818_v27  ;;  %v1100_v23 = vadd.f32 %v1099_v7, %v767_v60  ;;  %v1530_v50 = vmax.f32 %v1446_v54, 0.0  ;;  %v1447_v59 = vsub.f32 %v1279_v38, %v1363_v45 }
 0x14c   :  { %v5639_v22 = vmul.f32 0.0051020407, %v9103_v0  ;;  %v1536_v27 = vmax.f32 %v1452_v14, 0.0  ;;  %v1695_v60 = vadd.f32 1e-05, %v1527_v36  ;;  %v1372_v7 = vmul.f32 %v5633_v37, %v5633_v37 }
 0x14d   :  { %1097 = vadd.xlane.f32.xlu1 %v1096_v56  ;;  %v1697_v56 = vadd.f32 1e-05, %v1529_v31  ;;  %v1454_v32 = vsub.f32 %v1286_v55, %v1370_v58  ;;  %v5646_v24 = vmul.f32 0.0051020407, %v5031_v57  ;;  %v1698_v48 = vadd.f32 1e-05, %v1530_v50 }
 0x14e   :  { %1093 = vadd.xlane.f32.xlu0 %v1092_v8  ;;  %v826_v40 = vpop.xlane.xlu1 %825  ;;  %9104 = vst [vmem:[#allocation49_spill] sm:$0xff] %v5639_v22  ;;  %v1364_v8 = vmul.f32 %v5626_v29, %v5626_v29  ;;  %v1531_v1 = vmax.f32 %v1447_v59, 0.0  ;;  %v1281_v14 = vmul.f32 0.0051020407, %v5571_v34  ;;  %v1365_v55 = vmul.f32 %v5639_v22, %v5639_v22 }
 0x14f   :  { %v5635_v47 = vpop.xlane.xlu0 %821  ;;  %v1288_v61 = vmul.f32 0.0051020407, %v826_v40  ;;  %3552 = vrsqrt.f32 %v1697_v56  ;;  %v1704_v36 = vadd.f32 1e-05, %v1536_v27  ;;  %v1538_v40 = vmax.f32 %v1454_v32, 0.0 }
 0x150   :  { %v1448_v38 = vsub.f32 %v1280_v15, %v1364_v8  ;;  %3554 = vrsqrt.f32 %v1695_v60  ;;  %v1374_v50 = vmul.f32 %v5646_v24, %v5646_v24  ;;  %v5659_v56 = vmul.f32 0.0051020407, %v5045_v35  ;;  %v9107_v60 = vld [vmem:[#allocation124_spill] sm:$0xff] }
 0x151   :  { %1105 = vadd.xlane.f32.xlu1 %v1104_v44  ;;  %v9105_v44 = vld [vmem:[#allocation117_spill] sm:$0xff]  ;;  %3556 = vrsqrt.f32 %v1698_v48  ;;  %v1699_v59 = vadd.f32 1e-05, %v1531_v1  ;;  %v1282_v0 = vmul.f32 0.0051020407, %v5565_v6  ;;  %v1449_v8 = vsub.f32 %v1281_v14, %v1365_v55  ;;  %v9109_v48 = vld [vmem:[#allocation126_spill] sm:$0xff] }
 0x152   :  { %1101 = vadd.xlane.f32.xlu0 %v1100_v23  ;;  %v834_v54 = vpop.xlane.xlu1 %833  ;;  %v5652_v45 = vmul.f32 0.0051020407, %v9105_v44  ;;  %v1456_v23 = vsub.f32 %v1288_v61, %v1372_v7  ;;  %9106 = vst [vmem:[#allocation50_spill] sm:$0xff] %v5659_v56  ;;  %v1532_v15 = vmax.f32 %v1448_v38, 0.0  ;;  %v5667_v32 = vmul.f32 0.0051020407, %v9107_v60 }
 0x153   :  { %v5648_v31 = vpop.xlane.xlu0 %829  ;;  %v1290_v57 = vmul.f32 0.0051020407, %v834_v54  ;;  %3558 = vrsqrt.f32 %v1704_v36  ;;  %v1706_v61 = vadd.f32 1e-05, %v1538_v40  ;;  %v5670_v22 = vmul.f32 0.0051020407, %v9109_v48 }
 0x154   :  { %v1366_v27 = vmul.f32 %v5652_v45, %v5652_v45  ;;  %9108 = vst [vmem:[#allocation51_spill] sm:$0xff] %v5667_v32  ;;  %v1540_v54 = vmax.f32 %v1456_v23, 0.0  ;;  %v1376_v38 = vmul.f32 %v5659_v56, %v5659_v56  ;;  %v5675_v6 = vmul.f32 0.0051020407, %v5059_v4  ;;  %v1612_v4 = vld [vmem:[%s8522_s1 + $0x8] sm:$0xff] }
 0x155   :  { %v1458_v7 = vsub.f32 %v1290_v57, %v1374_v50  ;;  %9110 = vst [vmem:[#allocation52_spill] sm:$0xff] %v5670_v22  ;;  %v1283_v1 = vmul.f32 0.0051020407, %v5596_v49  ;;  %v1700_v55 = vadd.f32 1e-05, %v1532_v15  ;;  %3560 = vrsqrt.f32 %v1699_v59 }
 0x156   :  { %v842_v58 = vpop.xlane.xlu1 %841  ;;  %v1450_v36 = vsub.f32 %v1282_v0, %v1366_v27  ;;  %v1533_v40 = vmax.f32 %v1449_v8, 0.0  ;;  %v3551_v23 = vpop.eup %3550  ;;  %v1367_v57 = vmul.f32 %v5667_v32, %v5667_v32  ;;  %3562 = vrsqrt.f32 %v1706_v61 }
 0x157   :  { %v5661_v34 = vpop.xlane.xlu0 %837  ;;  %v1292_v35 = vmul.f32 0.0051020407, %v842_v58  ;;  %v5683_v58 = vmul.f32 0.0051020407, %v5024_v9  ;;  %v1708_v49 = vadd.f32 1e-05, %v1540_v54  ;;  %v1378_v59 = vmul.f32 %v5675_v6, %v5675_v6 }
 0x158   :  { %v1542_v60 = vmax.f32 %v1458_v7, 0.0  ;;  %v5691_v0 = vmul.f32 0.0051020407, %v5075_v28  ;;  %v1451_v8 = vsub.f32 %v1283_v1, %v1367_v57  ;;  %v1285_v9 = vmul.f32 0.0051020407, %v5621_v33  ;;  %v1613_v33 = vld [vmem:[%s8522_s1 + $0x10] sm:$0xff] }
 0x159   :  { %9111 = vst [vmem:[#allocation53_spill] sm:$0xff] %v5683_v58  ;;  %v1460_v48 = vsub.f32 %v1292_v35, %v1376_v38  ;;  %3564 = vrsqrt.f32 %v1700_v55  ;;  %v1701_v32 = vadd.f32 1e-05, %v1533_v40  ;;  %v5696_v56 = vmul.f32 %v3551_v23, %v1612_v4 }
 0x15a   :  { %v850_v44 = vpop.xlane.xlu1 %849  ;;  %9112 = vst [vmem:[#allocation54_spill] sm:$0xff] %v5691_v0  ;;  %v1369_v54 = vmul.f32 %v5670_v22, %v5670_v22  ;;  %v5701_v7 = vmul.f32 0.0051020407, %v5038_v53  ;;  %v1371_v38 = vmul.f32 %v5683_v58, %v5683_v58  ;;  %3566 = vrsqrt.f32 %v1708_v49  ;;  %v1611_v49 = vld [vmem:[%s8522_s1] sm:$0xff] }
 0x15b   :  { %v5678_v14 = vpop.xlane.xlu0 %845  ;;  %v1294_v50 = vmul.f32 0.0051020407, %v850_v44  ;;  %v1534_v44 = vmax.f32 %v1450_v36, 0.0  ;;  %v1710_v1 = vadd.f32 1e-05, %v1542_v60  ;;  %v1544_v55 = vmax.f32 %v1460_v48, 0.0 }
 0x15c   :  { %v3553_v61 = vpop.eup %3552  ;;  %9113 = vst [vmem:[#allocation55_spill] sm:$0xff] %v5701_v7  ;;  %v1380_v53 = vmul.f32 %v5691_v0, %v5691_v0  ;;  %v5712_v23 = vmul.f32 0.0051020407, %v5089_v25  ;;  %v1535_v57 = vmax.f32 %v1451_v8, 0.0  ;;  %3568 = vrsqrt.f32 %v1701_v32 }
 0x15d   :  { %v1462_v35 = vsub.f32 %v1294_v50, %v1378_v59  ;;  %v3555_v40 = vpop.eup %3554  ;;  %v1453_v50 = vsub.f32 %v1285_v9, %v1369_v54  ;;  %v1702_v48 = vadd.f32 1e-05, %v1534_v44  ;;  %v5720_v59 = vmul.f32 %v3553_v61, %v1613_v33  ;;  %v1614_v54 = vld [vmem:[%s8522_s1 + $0x18] sm:$0xff] }
 0x15e   :  { %v858_v15 = vpop.xlane.xlu1 %857  ;;  %9114 = vst [vmem:[#allocation56_spill] sm:$0xff] %v5712_v23  ;;  %v3557_v60 = vpop.eup %3556  ;;  %v5724_v58 = vmul.f32 %v5701_v7, %v5701_v7  ;;  %v5730_v22 = vmul.f32 0.0051020407, %v5052_v11  ;;  %3570 = vrsqrt.f32 %v1710_v1  ;;  %v1712_v32 = vadd.f32 1e-05, %v1544_v55  ;;  %v1620_v11 = vld [vmem:[%s8522_s1 + $0x48] sm:$0xff] }
 0x15f   :  { %v5694_v27 = vpop.xlane.xlu0 %853  ;;  %v1296_v28 = vmul.f32 0.0051020407, %v858_v15  ;;  %v1287_v15 = vmul.f32 0.0051020407, %v5635_v47  ;;  %v1546_v25 = vmax.f32 %v1462_v35, 0.0  ;;  %v5733_v44 = vmul.f32 %v3555_v40, %v1611_v49 }
 0x160   :  { %v3559_v0 = vpop.eup %3558  ;;  %9115 = vst [vmem:[#allocation57_spill] sm:$0xff] %v5730_v22  ;;  %v1382_v61 = vmul.f32 %v5712_v23, %v5712_v23  ;;  %v5738_v35 = vmul.f32 0.0051020407, %v5101_v18  ;;  %v1537_v33 = vmax.f32 %v1453_v50, 0.0  ;;  %3572 = vrsqrt.f32 %v1702_v48  ;;  %v1615_v50 = vld [vmem:[%s8522_s1 + $0x20] sm:$0xff] }
 0x161   :  { %v1464_v8 = vsub.f32 %v1296_v28, %v1380_v53  ;;  %v1703_v28 = vadd.f32 1e-05, %v1535_v57  ;;  %v1455_v1 = vsub.f32 %v1287_v15, %v1371_v38  ;;  %v1289_v55 = vmul.f32 0.0051020407, %v5648_v31 }
 0x162   :  { %v866_v36 = vpop.xlane.xlu1 %865  ;;  %2206 = vperm.xlu1 %3549, %v5696_v56   ;;  %9116 = vst [vmem:[#allocation58_spill] sm:$0xff] %v5738_v35  ;;  %v5747_v40 = vmul.f32 %v3557_v60, %v1614_v54  ;;  %v3561_v53 = vpop.eup %3560  ;;  %v1714_v49 = vadd.f32 1e-05, %v1546_v25  ;;  %v5754_v23 = vmul.f32 %v5730_v22, %v5730_v22  ;;  %v5757_v38 = vmul.f32 0.0051020407, %v5066_v41  ;;  %v1622_v41 = vld [vmem:[%s8522_s1 + $0x58] sm:$0xff] }
 0x163   :  { %v5714_v4 = vpop.xlane.xlu0 %861  ;;  %v1298_v9 = vmul.f32 0.0051020407, %v866_v36  ;;  %v1548_v18 = vmax.f32 %v1464_v8, 0.0  ;;  %3574 = vrsqrt.f32 %v1712_v32  ;;  %v5760_v60 = vmul.f32 %v3559_v0, %v1620_v11  ;;  %v3563_v48 = vpop.eup %3562  ;;  %v1616_v11 = vld [vmem:[%s8522_s1 + $0x28] sm:$0xff] }
 0x164   :  { %9117 = vst [vmem:[#allocation59_spill] sm:$0xff] %v5757_v38  ;;  %v1384_v15 = vmul.f32 %v5738_v35, %v5738_v35  ;;  %v5765_v25 = vmul.f32 0.0051020407, %v5117_v52  ;;  %3576 = vrsqrt.f32 %v1703_v28  ;;  %v1705_v8 = vadd.f32 1e-05, %v1537_v33 }
 0x165   :  { %v1466_v7 = vsub.f32 %v1298_v9, %v1382_v61  ;;  %v1539_v54 = vmax.f32 %v1455_v1, 0.0  ;;  %v1457_v32 = vsub.f32 %v1289_v55, %v5724_v58  ;;  %v1291_v0 = vmul.f32 0.0051020407, %v5661_v34 }
 0x166   :  { %v874_v47 = vpop.xlane.xlu1 %873  ;;  %2211 = vperm.xlu1 %3549, %v5720_v59   ;;  %9118 = vst [vmem:[#allocation60_spill] sm:$0xff] %v5765_v25  ;;  %v3565_v61 = vpop.eup %3564  ;;  %3578 = vrsqrt.f32 %v1714_v49  ;;  %v1716_v52 = vadd.f32 1e-05, %v1548_v18  ;;  %v1377_v1 = vmul.f32 %v5757_v38, %v5757_v38  ;;  %v5783_v58 = vmul.f32 0.0051020407, %v5082_v19  ;;  %v1624_v19 = vld [vmem:[%s8522_s1 + $0x68] sm:$0xff] }
 0x167   :  { %v5740_v36 = vpop.xlane.xlu0 %869  ;;  %v1300_v57 = vmul.f32 0.0051020407, %v874_v47  ;;  %v5775_v47 = vmul.f32 %v3561_v53, %v1615_v50  ;;  %v1550_v28 = vmax.f32 %v1466_v7, 0.0  ;;  %v5786_v53 = vmul.f32 %v3563_v48, %v1622_v41  ;;  %v3567_v49 = vpop.eup %3566 }
 0x168   :  { %2201 = vperm.xlu0 %3548, %v5733_v44   ;;  %9119 = vst [vmem:[#allocation61_spill] sm:$0xff] %v5783_v58  ;;  %v1386_v7 = vmul.f32 %v5765_v25, %v5765_v25  ;;  %v5791_v18 = vmul.f32 0.0051020407, %v5129_v30  ;;  %3580 = vrsqrt.f32 %v1705_v8  ;;  %v1459_v48 = vsub.f32 %v1291_v0, %v5754_v23  ;;  %v1617_v25 = vld [vmem:[%s8522_s1 + $0x30] sm:$0xff] }
 0x169   :  { %v1468_v33 = vsub.f32 %v1300_v57, %v1384_v15  ;;  %v1293_v57 = vmul.f32 0.0051020407, %v5678_v14  ;;  %v1541_v15 = vmax.f32 %v1457_v32, 0.0  ;;  %v5801_v41 = vmul.f32 %v3565_v61, %v1616_v11  ;;  %v3569_v38 = vpop.eup %3568 }
 0x16a   :  { %v882_v31 = vpop.xlane.xlu1 %881  ;;  %2216 = vperm.xlu1 %3549, %v5747_v40   ;;  %9120 = vst [vmem:[#allocation62_spill] sm:$0xff] %v5791_v18  ;;  %v5804_v30 = vmul.f32 0.0051020407, %v5095_v13  ;;  %3582 = vrsqrt.f32 %v1716_v52  ;;  %v1718_v14 = vadd.f32 1e-05, %v1550_v28  ;;  %v5813_v61 = vmul.f32 %v3567_v49, %v1624_v19 }
 0x16b   :  { %v5767_v9 = vpop.xlane.xlu0 %877  ;;  %v1302_v34 = vmul.f32 0.0051020407, %v882_v31  ;;  %v1707_v31 = vadd.f32 1e-05, %v1539_v54  ;;  %v1552_v8 = vmax.f32 %v1468_v33, 0.0  ;;  %v3571_v11 = vpop.eup %3570  ;;  %v1388_v13 = vmul.f32 %v5791_v18, %v5791_v18 }
 0x16c   :  { %2246 = vperm.xlu0 %3548, %v5760_v60   ;;  %9121 = vst [vmem:[#allocation63_spill] sm:$0xff] %v5804_v30  ;;  %v5810_v54 = vmul.f32 0.0051020407, %v5110_v20  ;;  %v5818_v52 = vmul.f32 0.0051020407, %v5145_v12  ;;  %v1461_v28 = vsub.f32 %v1293_v57, %v1377_v1  ;;  %v1626_v20 = vld [vmem:[%s8522_s1 + $0x78] sm:$0xff]  ;;  %v5827_v49 = vmul.f32 %v3569_v38, %v1617_v25 }
 0x16d   :  { %v1470_v32 = vsub.f32 %v1302_v34, %v1386_v7  ;;  %v1295_v33 = vmul.f32 0.0051020407, %v5694_v27  ;;  %3584 = vrsqrt.f32 %v1707_v31  ;;  %v1709_v34 = vadd.f32 1e-05, %v1541_v15  ;;  %v3573_v7 = vpop.eup %3572  ;;  %v1618_v57 = vld [vmem:[%s8522_s1 + $0x38] sm:$0xff] }
 0x16e   :  { %v890_v55 = vpop.xlane.xlu1 %889  ;;  %2221 = vperm.xlu1 %3549, %v5775_v47   ;;  %9122 = vst [vmem:[#allocation64_spill] sm:$0xff] %v5810_v54  ;;  %9123 = vst [vmem:[#allocation65_spill] sm:$0xff] %v5818_v52  ;;  %v1379_v12 = vmul.f32 %v5783_v58, %v5783_v58  ;;  %3586 = vrsqrt.f32 %v1718_v14  ;;  %v1720_v1 = vadd.f32 1e-05, %v1552_v8  ;;  %v1381_v19 = vmul.f32 %v5804_v30, %v5804_v30 }
 0x16f   :  { %v5794_v50 = vpop.xlane.xlu0 %885  ;;  %v1304_v23 = vmul.f32 0.0051020407, %v890_v55  ;;  %v1543_v55 = vmax.f32 %v1459_v48, 0.0  ;;  %v1554_v31 = vmax.f32 %v1470_v32, 0.0  ;;  %v5837_v38 = vmul.f32 %v3571_v11, %v1626_v20  ;;  %v1628_v32 = vld [vmem:[%s8522_s1 + $0x88] sm:$0xff] }
 0x170   :  { %2256 = vperm.xlu0 %3548, %v5786_v53   ;;  %v3575_v25 = vpop.eup %3574  ;;  %v1390_v14 = vmul.f32 %v5818_v52, %v5818_v52  ;;  %v1545_v8 = vmax.f32 %v1461_v28, 0.0  ;;  %v1297_v58 = vmul.f32 0.0051020407, %v5714_v4  ;;  %3588 = vrsqrt.f32 %v1709_v34 }
 0x171   :  { %v1472_v15 = vsub.f32 %v1304_v23, %v1388_v13  ;;  %v3577_v23 = vpop.eup %3576  ;;  %v5848_v13 = vmul.f32 0.0051020407, %v5157_v42  ;;  %v1711_v11 = vadd.f32 1e-05, %v1543_v55  ;;  %v5851_v20 = vmul.f32 %v3573_v7, %v1618_v57  ;;  %v1619_v42 = vld [vmem:[%s8522_s1 + $0x40] sm:$0xff] }
 0x172   :  { %v898_v0 = vpop.xlane.xlu1 %897  ;;  %2226 = vperm.xlu1 %3549, %v5801_v41   ;;  %v5855_v28 = vmul.f32 %v5810_v54, %v5810_v54  ;;  %v5858_v4 = vmul.f32 0.0051020407, %v5123_v2  ;;  %3590 = vrsqrt.f32 %v1720_v1  ;;  %v1722_v34 = vadd.f32 1e-05, %v1554_v31  ;;  %v1630_v2 = vld [vmem:[%s8522_s1 + $0x98] sm:$0xff] }
 0x173   :  { %v5821_v22 = vpop.xlane.xlu0 %893  ;;  %v1306_v27 = vmul.f32 0.0051020407, %v898_v0  ;;  %v1463_v0 = vsub.f32 %v1295_v33, %v1379_v12  ;;  %9124 = vst [vmem:[#allocation66_spill] sm:$0xff] %v5848_v13  ;;  %v3579_v12 = vpop.eup %3578  ;;  %v1556_v55 = vmax.f32 %v1472_v15, 0.0  ;;  %v5864_v7 = vmul.f32 %v3575_v25, %v1628_v32 }
 0x174   :  { %2266 = vperm.xlu0 %3548, %v5813_v61   ;;  %9125 = vst [vmem:[#allocation67_spill] sm:$0xff] %v5858_v4  ;;  %v1713_v57 = vadd.f32 1e-05, %v1545_v8  ;;  %v1392_v31 = vmul.f32 %v5848_v13, %v5848_v13  ;;  %v5875_v15 = vmul.f32 0.0051020407, %v5173_v43  ;;  %3592 = vrsqrt.f32 %v1711_v11  ;;  %v1621_v8 = vld [vmem:[%s8522_s1 + $0x50] sm:$0xff] }
 0x175   :  { %v1474_v33 = vsub.f32 %v1306_v27, %v1390_v14  ;;  %v1547_v1 = vmax.f32 %v1463_v0, 0.0  ;;  %v1465_v27 = vsub.f32 %v1297_v58, %v1381_v19  ;;  %v1299_v14 = vmul.f32 0.0051020407, %v5740_v36  ;;  %v3581_v35 = vpop.eup %3580  ;;  %v9139_v13 = vld [vmem:[#allocation5_spill] sm:$0xff] }
 0x176   :  { %v906_v48 = vpop.xlane.xlu1 %905  ;;  %2231 = vperm.xlu1 %3549, %v5827_v49   ;;  %9126 = vst [vmem:[#allocation68_spill] sm:$0xff] %v5875_v15  ;;  %v5881_v25 = vmul.f32 0.0051020407, %v5138_v5  ;;  %v5884_v58 = vmul.f32 0.0051020407, %v5185_v26  ;;  %v5886_v19 = vmul.f32 %v3579_v12, %v1630_v2  ;;  %3594 = vrsqrt.f32 %v1722_v34  ;;  %v1632_v5 = vld [vmem:[%s8522_s1 + $0xa8] sm:$0xff] }
 0x177   :  { %v5842_v18 = vpop.xlane.xlu0 %901  ;;  %v1308_v30 = vmul.f32 0.0051020407, %v906_v48  ;;  %v5878_v48 = vmul.f32 %v3577_v23, %v1619_v42  ;;  %v1558_v36 = vmax.f32 %v1474_v33, 0.0  ;;  %v3583_v43 = vpop.eup %3582  ;;  %v1724_v0 = vadd.f32 1e-05, %v1556_v55 }
 0x178   :  { %2276 = vperm.xlu0 %3548, %v5837_v38   ;;  %9127 = vst [vmem:[#allocation69_spill] sm:$0xff] %v5881_v25  ;;  %9128 = vst [vmem:[#allocation70_spill] sm:$0xff] %v5884_v58  ;;  %3596 = vrsqrt.f32 %v1713_v57  ;;  %v1715_v26 = vadd.f32 1e-05, %v1547_v1  ;;  %v1549_v33 = vmax.f32 %v1465_v27, 0.0  ;;  %v1467_v42 = vsub.f32 %v1299_v14, %v5855_v28  ;;  %v1623_v14 = vld [vmem:[%s8522_s1 + $0x60] sm:$0xff] }
 0x179   :  { %v1476_v32 = vsub.f32 %v1308_v30, %v1392_v31  ;;  %v1385_v34 = vmul.f32 %v5858_v4, %v5858_v4  ;;  %v1394_v30 = vmul.f32 %v5875_v15, %v5875_v15  ;;  %v5904_v55 = vmul.f32 %v3581_v35, %v1621_v8 }
 0x17a   :  { %v914_v52 = vpop.xlane.xlu1 %913  ;;  %2236 = vperm.xlu1 %3549, %v5851_v20   ;;  %v3585_v2 = vpop.eup %3584  ;;  %v5908_v57 = vmul.f32 %v5881_v25, %v5881_v25  ;;  %v5911_v28 = vmul.f32 0.0051020407, %v5151_v39  ;;  %v1726_v1 = vadd.f32 1e-05, %v1558_v36  ;;  %v5913_v27 = vmul.f32 %v3583_v43, %v1632_v5  ;;  %v1634_v39 = vld [vmem:[%s8522_s1 + $0xb8] sm:$0xff] }
 0x17b   :  { %v5870_v54 = vpop.xlane.xlu0 %909  ;;  %v1310_v11 = vmul.f32 0.0051020407, %v914_v52  ;;  %v1301_v52 = vmul.f32 0.0051020407, %v5767_v9  ;;  %v3587_v9 = vpop.eup %3586  ;;  %3598 = vrsqrt.f32 %v1724_v0  ;;  %v1560_v31 = vmax.f32 %v1476_v32, 0.0 }
 0x17c   :  { %2286 = vperm.xlu0 %3548, %v5864_v7   ;;  %9129 = vst [vmem:[#allocation71_spill] sm:$0xff] %v5911_v28  ;;  %v1396_v36 = vmul.f32 %v5884_v58, %v5884_v58  ;;  %3600 = vrsqrt.f32 %v1715_v26  ;;  %v1717_v43 = vadd.f32 1e-05, %v1549_v33  ;;  %v1551_v5 = vmax.f32 %v1467_v42, 0.0 }
 0x17d   :  { %v1478_v35 = vsub.f32 %v1310_v11, %v1394_v30  ;;  %v5927_v0 = vmul.f32 0.0051020407, %v5201_v16  ;;  %v1469_v32 = vsub.f32 %v1301_v52, %v1385_v34  ;;  %v1303_v11 = vmul.f32 0.0051020407, %v5794_v50  ;;  %v3589_v30 = vpop.eup %3588  ;;  %v1625_v16 = vld [vmem:[%s8522_s1 + $0x70] sm:$0xff] }
 0x17e   :  { %v922_v23 = vpop.xlane.xlu1 %921  ;;  %2241 = vperm.xlu1 %3549, %v5878_v48   ;;  %v1389_v15 = vmul.f32 %v5911_v28, %v5911_v28  ;;  %v5936_v26 = vmul.f32 0.0051020407, %v5166_v21  ;;  %3602 = vrsqrt.f32 %v1726_v1  ;;  %v5938_v33 = vmul.f32 %v3587_v9, %v1634_v39  ;;  %v1636_v21 = vld [vmem:[%s8522_s1 + $0xc8] sm:$0xff] }
 0x17f   :  { %v5896_v12 = vpop.xlane.xlu0 %917  ;;  %v1312_v8 = vmul.f32 0.0051020407, %v922_v23  ;;  %9130 = vst [vmem:[#allocation72_spill] sm:$0xff] %v5927_v0  ;;  %v5931_v23 = vmul.f32 %v3585_v2, %v1623_v14  ;;  %v3591_v42 = vpop.eup %3590  ;;  %v1728_v50 = vadd.f32 1e-05, %v1560_v31  ;;  %v1562_v34 = vmax.f32 %v1478_v35, 0.0 }
 0x180   :  { %2296 = vperm.xlu0 %3548, %v5886_v19   ;;  %9131 = vst [vmem:[#allocation73_spill] sm:$0xff] %v5936_v26  ;;  %v5948_v1 = vmul.f32 0.0051020407, %v5213_v46  ;;  %3604 = vrsqrt.f32 %v1717_v43  ;;  %v1719_v9 = vadd.f32 1e-05, %v1551_v5  ;;  %v1398_v31 = vmul.f32 %v5927_v0, %v5927_v0 }
 0x181   :  { %v1480_v52 = vsub.f32 %v1312_v8, %v1396_v36  ;;  %v1305_v39 = vmul.f32 0.0051020407, %v5821_v22  ;;  %v1471_v35 = vsub.f32 %v1303_v11, %v5908_v57  ;;  %v5957_v8 = vmul.f32 %v3589_v30, %v1625_v16  ;;  %v3593_v36 = vpop.eup %3592 }
 0x182   :  { %v930_v4 = vpop.xlane.xlu1 %929  ;;  %2251 = vperm.xlu1 %3549, %v5904_v55   ;;  %9132 = vst [vmem:[#allocation74_spill] sm:$0xff] %v5948_v1  ;;  %v5961_v46 = vmul.f32 %v5936_v26, %v5936_v26  ;;  %v5964_v43 = vmul.f32 0.0051020407, %v5179_v10  ;;  %v5966_v5 = vmul.f32 %v3591_v42, %v1636_v21  ;;  %3606 = vrsqrt.f32 %v1728_v50  ;;  %v1638_v50 = vld [vmem:[%s8522_s1 + $0xd8] sm:$0xff] }
 0x183   :  { %v5924_v25 = vpop.xlane.xlu0 %925  ;;  %v1314_v2 = vmul.f32 0.0051020407, %v930_v4  ;;  %v1553_v4 = vmax.f32 %v1469_v32, 0.0  ;;  %v1627_v32 = vld [vmem:[%s8522_s1 + $0x80] sm:$0xff]  ;;  %v1730_v57 = vadd.f32 1e-05, %v1562_v34  ;;  %v3595_v0 = vpop.eup %3594  ;;  %v1400_v26 = vmul.f32 %v5948_v1, %v5948_v1 }
 0x184   :  { %2306 = vperm.xlu0 %3548, %v5913_v27   ;;  %9133 = vst [vmem:[#allocation75_spill] sm:$0xff] %v5964_v43  ;;  %9134 = vst [vmem:[#allocation76_spill] sm:$0xff] %v5966_v5  ;;  %v1564_v11 = vmax.f32 %v1480_v52, 0.0  ;;  %v5975_v10 = vmul.f32 0.0051020407, %v5229_v3  ;;  %3608 = vrsqrt.f32 %v1719_v9  ;;  %v1473_v42 = vsub.f32 %v1305_v39, %v1389_v15  ;;  %v1629_v3 = vld [vmem:[%s8522_s1 + $0x90] sm:$0xff] }
 0x185   :  { %v1482_v30 = vsub.f32 %v1314_v2, %v1398_v31  ;;  %v3597_v34 = vpop.eup %3596  ;;  %v1721_v52 = vadd.f32 1e-05, %v1553_v4  ;;  %v1555_v2 = vmax.f32 %v1471_v35, 0.0  ;;  %v1307_v21 = vmul.f32 0.0051020407, %v5842_v18 }
 0x186   :  { %v938_v14 = vpop.xlane.xlu1 %937  ;;  %2261 = vperm.xlu1 %3549, %v5931_v23   ;;  %9135 = vst [vmem:[#allocation77_spill] sm:$0xff] %v5975_v10  ;;  %v5984_v31 = vmul.f32 %v3593_v36, %v1627_v32  ;;  %v5991_v15 = vmul.f32 %v5964_v43, %v5964_v43  ;;  %v5994_v9 = vmul.f32 0.0051020407, %v5194_v62  ;;  %3610 = vrsqrt.f32 %v1730_v57 }
 0x187   :  { %v5951_v28 = vpop.xlane.xlu0 %933  ;;  %v1316_v22 = vmul.f32 0.0051020407, %v938_v14  ;;  %v1732_v35 = vadd.f32 1e-05, %v1564_v11  ;;  %v1566_v18 = vmax.f32 %v1482_v30, 0.0  ;;  %v5997_v36 = vmul.f32 %v3595_v0, %v1638_v50 }
 0x188   :  { %2316 = vperm.xlu0 %3548, %v5938_v33   ;;  %9136 = vst [vmem:[#allocation78_spill] sm:$0xff] %v5984_v31  ;;  %9137 = vst [vmem:[#allocation79_spill] sm:$0xff] %v5994_v9  ;;  %v3599_v32 = vpop.eup %3598  ;;  %v1402_v58 = vmul.f32 %v5975_v10, %v5975_v10  ;;  %v6002_v43 = vmul.f32 0.0051020407, %v9139_v13  ;;  %3612 = vrsqrt.f32 %v1721_v52  ;;  %v1723_v0 = vadd.f32 1e-05, %v1555_v2 }
 0x189   :  { %v1484_v39 = vsub.f32 %v1316_v22, %v1400_v26  ;;  %9138 = vst [vmem:[#allocation80_spill] sm:$0xff] %v5997_v36  ;;  %v6006_v26 = vmul.f32 %v3597_v34, %v1629_v3  ;;  %v1640_v22 = vld [vmem:[%s8522_s1 + $0xe8] sm:$0xff]  ;;  %v3601_v57 = vpop.eup %3600  ;;  %v1475_v11 = vsub.f32 %v1307_v21, %v5961_v46  ;;  %v1309_v30 = vmul.f32 0.0051020407, %v5870_v54  ;;  %v1631_v13 = vld [vmem:[%s8522_s1 + $0xa0] sm:$0xff] }
 0x18a   :  { %v946_v16 = vpop.xlane.xlu1 %945  ;;  %2271 = vperm.xlu1 %3549, %v5957_v8   ;;  %9140 = vst [vmem:[#allocation81_spill] sm:$0xff] %v6002_v43  ;;  %v9142_v52 = vld [vmem:[#allocation2_spill] sm:$0xff]  ;;  %3614 = vrsqrt.f32 %v1732_v35  ;;  %v1734_v46 = vadd.f32 1e-05, %v1566_v18  ;;  %v6025_v21 = vmul.f32 %v3599_v32, %v1640_v22  ;;  %v1404_v10 = vmul.f32 %v6002_v43, %v6002_v43 }
 0x18b   :  { %v5977_v14 = vpop.xlane.xlu0 %941  ;;  %v1318_v4 = vmul.f32 0.0051020407, %v946_v16  ;;  %9141 = vst [vmem:[#allocation82_spill] sm:$0xff] %v6006_v26  ;;  %v6019_v16 = vmul.f32 %v5994_v9, %v5994_v9  ;;  %v3603_v3 = vpop.eup %3602  ;;  %v6022_v2 = vmul.f32 0.0051020407, %v9142_v52  ;;  %3616 = vrsqrt.f32 %v1723_v0  ;;  %v9148_v0 = vld [vmem:[#allocation3_spill] sm:$0xff] }
 0x18c   :  { %2326 = vperm.xlu0 %3548, %v5966_v5   ;;  %v1557_v5 = vmax.f32 %v1473_v42, 0.0  ;;  %v1568_v42 = vmax.f32 %v1484_v39, 0.0  ;;  %9144 = vst [vmem:[#allocation84_spill] sm:$0xff] %v6025_v21  ;;  %v1559_v18 = vmax.f32 %v1475_v11, 0.0  ;;  %v1477_v32 = vsub.f32 %v1309_v30, %v5991_v15 }
 0x18d   :  { %v1486_v50 = vsub.f32 %v1318_v4, %v1402_v58  ;;  %9143 = vst [vmem:[#allocation83_spill] sm:$0xff] %v6022_v2  ;;  %v1642_v4 = vld [vmem:[%s8522_s1 + $0xf8] sm:$0xff]  ;;  %v3605_v35 = vpop.eup %3604  ;;  %v1311_v22 = vmul.f32 0.0051020407, %v5896_v12  ;;  %v6047_v43 = vmul.f32 %v6022_v2, %v6022_v2  ;;  %v6050_v11 = vmul.f32 0.0051020407, %v9148_v0 }
 0x18e   :  { %v954_v1 = vpop.xlane.xlu1 %953  ;;  %2281 = vperm.xlu1 %3549, %v5984_v31   ;;  %v1725_v39 = vadd.f32 1e-05, %v1557_v5  ;;  %v1633_v5 = vld [vmem:[%s8522_s1 + $0xb0] sm:$0xff]  ;;  %3618 = vrsqrt.f32 %v1734_v46  ;;  %v6053_v12 = vmul.f32 %v3603_v3, %v1642_v4  ;;  %v1644_v46 = vld [vmem:[%s8522_s1 + $0x108] sm:$0xff]  ;;  %v1727_v2 = vadd.f32 1e-05, %v1559_v18 }
 0x18f   :  { %v6004_v62 = vpop.xlane.xlu0 %949  ;;  %v1320_v34 = vmul.f32 0.0051020407, %v954_v1  ;;  %v6034_v1 = vmul.f32 %v3601_v57, %v1631_v13  ;;  %v1570_v57 = vmax.f32 %v1486_v50, 0.0  ;;  %9149 = vst [vmem:[#allocation87_spill] sm:$0xff] %v6050_v11  ;;  %v3607_v30 = vpop.eup %3606  ;;  %v9151_v50 = vld [vmem:[#allocation9_spill] sm:$0xff]  ;;  %v1561_v3 = vmax.f32 %v1477_v32, 0.0 }
 0x190   :  { %2336 = vperm.xlu0 %3548, %v5997_v36   ;;  %v9145_v36 = vld [vmem:[#allocation7_spill] sm:$0xff]  ;;  %9150 = vst [vmem:[#allocation88_spill] sm:$0xff] %v6053_v12  ;;  %3620 = vrsqrt.f32 %v1725_v39  ;;  %v1479_v4 = vsub.f32 %v1311_v22, %v6019_v16  ;;  %v1635_v39 = vld [vmem:[%s8522_s1 + $0xc0] sm:$0xff] }
 0x191   :  { %v6030_v9 = vmul.f32 0.0051020407, %v9145_v36  ;;  %9147 = vst [vmem:[#allocation86_spill] sm:$0xff] %v6034_v1  ;;  %v1736_v36 = vadd.f32 1e-05, %v1568_v42  ;;  %v1488_v13 = vsub.f32 %v1320_v34, %v1404_v10  ;;  %v3609_v0 = vpop.eup %3608 }
 0x192   :  { %v962_v54 = vpop.xlane.xlu1 %961  ;;  %2291 = vperm.xlu1 %3549, %v6006_v26   ;;  %v6058_v10 = vmul.f32 0.0051020407, %v9151_v50 }
 0x193   :  { %9146 = vst [vmem:[#allocation85_spill] sm:$0xff] %v6030_v9  ;;  %v6032_v58 = vpop.xlane.xlu0 %957  ;;  %v1322_v52 = vmul.f32 0.0051020407, %v962_v54  ;;  %v1406_v42 = vmul.f32 %v6030_v9, %v6030_v9  ;;  %v6062_v54 = vmul.f32 %v3605_v35, %v1633_v5  ;;  %3622 = vrsqrt.f32 %v1736_v36  ;;  %v3611_v22 = vpop.eup %3610  ;;  %v9157_v36 = vld [vmem:[#allocation11_spill] sm:$0xff] }
 0x194   :  { %2346 = vperm.xlu0 %3548, %v6025_v21   ;;  %9152 = vst [vmem:[#allocation89_spill] sm:$0xff] %v6058_v10  ;;  %v1738_v35 = vadd.f32 1e-05, %v1570_v57  ;;  %v1572_v5 = vmax.f32 %v1488_v13, 0.0  ;;  %v1399_v9 = vmul.f32 %v6050_v11, %v6050_v11  ;;  %v9154_v21 = vld [vmem:[#allocation4_spill] sm:$0xff]  ;;  %3624 = vrsqrt.f32 %v1727_v2 }
 0x195   :  { %9153 = vst [vmem:[#allocation90_spill] sm:$0xff] %v6062_v54  ;;  %v1490_v50 = vsub.f32 %v1322_v52, %v1406_v42  ;;  %v6076_v18 = vmul.f32 0.0051020407, %v9154_v21  ;;  %v6084_v57 = vmul.f32 0.0051020407, %v9157_v36  ;;  %v6089_v42 = vmul.f32 %v3609_v0, %v1635_v39  ;;  %v1646_v21 = vld [vmem:[%s8522_s1 + $0x118] sm:$0xff]  ;;  %v3613_v11 = vpop.eup %3612 }
 0x196   :  { %v970_v15 = vpop.xlane.xlu1 %969  ;;  %2301 = vperm.xlu1 %3549, %v6034_v1   ;;  %v1313_v1 = vmul.f32 0.0051020407, %v5924_v25  ;;  %v6079_v25 = vmul.f32 %v3607_v30, %v1644_v46  ;;  %v1315_v13 = vmul.f32 0.0051020407, %v5951_v28  ;;  %v1563_v30 = vmax.f32 %v1479_v4, 0.0  ;;  %v9160_v36 = vld [vmem:[#allocation6_spill] sm:$0xff] }
 0x197   :  { %v6060_v34 = vpop.xlane.xlu0 %965  ;;  %9155 = vst [vmem:[#allocation91_spill] sm:$0xff] %v6076_v18  ;;  %v1324_v32 = vmul.f32 0.0051020407, %v970_v15  ;;  %9158 = vst [vmem:[#allocation93_spill] sm:$0xff] %v6084_v57  ;;  %v1729_v15 = vadd.f32 1e-05, %v1561_v3  ;;  %3626 = vrsqrt.f32 %v1738_v35  ;;  %v1410_v35 = vmul.f32 %v6084_v57, %v6084_v57 }
 0x198   :  { %2356 = vperm.xlu0 %3548, %v6053_v12   ;;  %9156 = vst [vmem:[#allocation92_spill] sm:$0xff] %v6079_v25  ;;  %v1408_v12 = vmul.f32 %v6058_v10, %v6058_v10  ;;  %9159 = vst [vmem:[#allocation94_spill] sm:$0xff] %v6089_v42  ;;  %v1481_v46 = vsub.f32 %v1313_v1, %v6047_v43  ;;  %v6097_v10 = vmul.f32 0.0051020407, %v9160_v36  ;;  %v1740_v28 = vadd.f32 1e-05, %v1572_v5  ;;  %v3615_v1 = vpop.eup %3614 }
 0x199   :  { %v1637_v0 = vld [vmem:[%s8522_s1 + $0xd0] sm:$0xff]  ;;  %v6106_v43 = vmul.f32 %v3611_v22, %v1646_v21  ;;  %v9165_v5 = vld [vmem:[#allocation13_spill] sm:$0xff]  ;;  %v1483_v36 = vsub.f32 %v1315_v13, %v1399_v9  ;;  %3628 = vrsqrt.f32 %v1729_v15  ;;  %v3617_v21 = vpop.eup %3616  ;;  %v1639_v13 = vld [vmem:[%s8522_s1 + $0xe0] sm:$0xff] }
 0x19a   :  { %v978_v16 = vpop.xlane.xlu1 %977  ;;  %2311 = vperm.xlu1 %3549, %v6062_v54   ;;  %9161 = vst [vmem:[#allocation95_spill] sm:$0xff] %v6097_v10  ;;  %v1574_v54 = vmax.f32 %v1490_v50, 0.0  ;;  %v9162_v39 = vld [vmem:[#allocation8_spill] sm:$0xff]  ;;  %v1492_v2 = vsub.f32 %v1324_v32, %v1408_v12  ;;  %v6111_v50 = vmul.f32 0.0051020407, %v9165_v5  ;;  %v1648_v12 = vld [vmem:[%s8522_s1 + $0x128] sm:$0xff]  ;;  %v6120_v22 = vmul.f32 %v3613_v11, %v1637_v0 }
 0x19b   :  { %v6087_v52 = vpop.xlane.xlu0 %973  ;;  %v6103_v26 = vmul.f32 0.0051020407, %v9162_v39  ;;  %v1326_v3 = vmul.f32 0.0051020407, %v978_v16  ;;  %9164 = vst [vmem:[#allocation97_spill] sm:$0xff] %v6106_v43  ;;  %v1565_v16 = vmax.f32 %v1481_v46, 0.0  ;;  %v1401_v39 = vmul.f32 %v6076_v18, %v6076_v18  ;;  %v3619_v0 = vpop.eup %3618 }
 0x19c   :  { %2366 = vperm.xlu0 %3548, %v6079_v25   ;;  %9166 = vst [vmem:[#allocation98_spill] sm:$0xff] %v6111_v50  ;;  %v1317_v25 = vmul.f32 0.0051020407, %v5977_v14  ;;  %v1731_v32 = vadd.f32 1e-05, %v1563_v30  ;;  %9167 = vst [vmem:[#allocation100_spill] sm:$0xff] %v6120_v22  ;;  %3630 = vrsqrt.f32 %v1740_v28  ;;  %v1403_v15 = vmul.f32 %v6097_v10, %v6097_v10 }
 0x19d   :  { %9163 = vst [vmem:[#allocation96_spill] sm:$0xff] %v6103_v26  ;;  %v1742_v9 = vadd.f32 1e-05, %v1574_v54  ;;  %v1576_v30 = vmax.f32 %v1492_v2, 0.0  ;;  %v1494_v46 = vsub.f32 %v1326_v3, %v1410_v35  ;;  %v6130_v11 = vmul.f32 %v3615_v1, %v1648_v12  ;;  %v1650_v2 = vld [vmem:[%s8522_s1 + $0x138] sm:$0xff]  ;;  %v3621_v3 = vpop.eup %3620  ;;  %v9169_v35 = vld [vmem:[#allocation15_spill] sm:$0xff] }
 0x19e   :  { %v986_v4 = vpop.xlane.xlu1 %985  ;;  %2321 = vperm.xlu1 %3549, %v6089_v42   ;;  %v1412_v28 = vmul.f32 %v6111_v50, %v6111_v50  ;;  %v1567_v54 = vmax.f32 %v1483_v36, 0.0  ;;  %v1319_v18 = vmul.f32 0.0051020407, %v6004_v62  ;;  %v6141_v10 = vmul.f32 0.0051020407, %v9169_v35  ;;  %v9172_v62 = vld [vmem:[#allocation10_spill] sm:$0xff] }
 0x19f   :  { %v6114_v31 = vpop.xlane.xlu0 %981  ;;  %v1328_v14 = vmul.f32 0.0051020407, %v986_v4  ;;  %9168 = vst [vmem:[#allocation102_spill] sm:$0xff] %v6130_v11  ;;  %v1485_v4 = vsub.f32 %v1317_v25, %v1401_v39  ;;  %3632 = vrsqrt.f32 %v1731_v32  ;;  %v1733_v1 = vadd.f32 1e-05, %v1565_v16  ;;  %v1641_v35 = vld [vmem:[%s8522_s1 + $0xf0] sm:$0xff] }
 0x1a0   :  { %2376 = vperm.xlu0 %3548, %v6106_v43   ;;  %9170 = vst [vmem:[#allocation103_spill] sm:$0xff] %v6141_v10  ;;  %v6144_v12 = vmul.f32 %v3617_v21, %v1639_v13  ;;  %v6148_v25 = vmul.f32 %v6103_v26, %v6103_v26  ;;  %v6151_v36 = vmul.f32 0.0051020407, %v9172_v62  ;;  %3634 = vrsqrt.f32 %v1742_v9  ;;  %v3623_v50 = vpop.eup %3622  ;;  %v1652_v13 = vld [vmem:[%s8522_s1 + $0x148] sm:$0xff] }
 0x1a1   :  { %v1496_v39 = vsub.f32 %v1328_v14, %v1412_v28  ;;  %v1744_v32 = vadd.f32 1e-05, %v1576_v30  ;;  %v1578_v16 = vmax.f32 %v1494_v46, 0.0  ;;  %v6157_v21 = vmul.f32 %v3619_v0, %v1650_v2  ;;  %v9175_v46 = vld [vmem:[#allocation17_spill] sm:$0xff]  ;;  %v3625_v2 = vpop.eup %3624  ;;  %v9205_v43 = vld [vmem:[#allocation27_spill] sm:$0xff] }
 0x1a2   :  { %v994_v5 = vpop.xlane.xlu1 %993  ;;  %2331 = vperm.xlu1 %3549, %v6120_v22   ;;  %9171 = vst [vmem:[#allocation104_spill] sm:$0xff] %v6144_v12  ;;  %9173 = vst [vmem:[#allocation106_spill] sm:$0xff] %v6151_v36  ;;  %v1735_v62 = vadd.f32 1e-05, %v1567_v54  ;;  %v1569_v9 = vmax.f32 %v1485_v4, 0.0  ;;  %v1487_v14 = vsub.f32 %v1319_v18, %v1403_v15  ;;  %v1414_v30 = vmul.f32 %v6141_v10, %v6141_v10  ;;  %v9180_v18 = vld [vmem:[#allocation19_spill] sm:$0xff] }
 0x1a3   :  { %v6135_v57 = vpop.xlane.xlu0 %989  ;;  %v1330_v22 = vmul.f32 0.0051020407, %v994_v5  ;;  %9174 = vst [vmem:[#allocation108_spill] sm:$0xff] %v6157_v21  ;;  %v1321_v28 = vmul.f32 0.0051020407, %v6032_v58  ;;  %3636 = vrsqrt.f32 %v1733_v1  ;;  %v6171_v0 = vmul.f32 %v3621_v3, %v1641_v35 }
 0x1a4   :  { %2386 = vperm.xlu0 %3548, %v6130_v11   ;;  %v6168_v5 = vmul.f32 0.0051020407, %v9175_v46  ;;  %v6177_v15 = vmul.f32 0.0051020407, %v9180_v18  ;;  %v1580_v58 = vmax.f32 %v1496_v39, 0.0  ;;  %v6179_v4 = vmul.f32 %v3623_v50, %v1652_v13  ;;  %v1643_v46 = vld [vmem:[%s8522_s1 + $0x100] sm:$0xff]  ;;  %v3627_v10 = vpop.eup %3626 }
 0x1a5   :  { %9177 = vst [vmem:[#allocation110_spill] sm:$0xff] %v6171_v0  ;;  %3638 = vrsqrt.f32 %v1744_v32  ;;  %v1746_v1 = vadd.f32 1e-05, %v1578_v16  ;;  %v1737_v39 = vadd.f32 1e-05, %v1569_v9  ;;  %v1571_v50 = vmax.f32 %v1487_v14, 0.0 }
 0x1a6   :  { %v1002_v11 = vpop.xlane.xlu1 %1001  ;;  %2341 = vperm.xlu1 %3549, %v6144_v12   ;;  %9176 = vst [vmem:[#allocation109_spill] sm:$0xff] %v6168_v5  ;;  %v9178_v12 = vld [vmem:[#allocation12_spill] sm:$0xff]  ;;  %9181 = vst [vmem:[#allocation112_spill] sm:$0xff] %v6177_v15  ;;  %3640 = vrsqrt.f32 %v1735_v62  ;;  %v1489_v13 = vsub.f32 %v1321_v28, %v6148_v25  ;;  %v1407_v32 = vmul.f32 %v6151_v36, %v6151_v36  ;;  %v9184_v25 = vld [vmem:[#allocation14_spill] sm:$0xff]  ;;  %v1748_v14 = vadd.f32 1e-05, %v1580_v58 }
 0x1a7   :  { %v6163_v26 = vpop.xlane.xlu0 %997  ;;  %v6174_v54 = vmul.f32 0.0051020407, %v9178_v12  ;;  %9182 = vst [vmem:[#allocation114_spill] sm:$0xff] %v6179_v4  ;;  %v1332_v3 = vmul.f32 0.0051020407, %v1002_v11  ;;  %v1654_v12 = vld [vmem:[%s8522_s1 + $0x158] sm:$0xff]  ;;  %v6197_v16 = vmul.f32 %v3625_v2, %v1643_v46  ;;  %3642 = vrsqrt.f32 %v1746_v1 }
 0x1a8   :  { %2396 = vperm.xlu0 %3548, %v6157_v21   ;;  %v1498_v21 = vsub.f32 %v1330_v22, %v1414_v30  ;;  %v1416_v22 = vmul.f32 %v6168_v5, %v6168_v5  ;;  %v1323_v11 = vmul.f32 0.0051020407, %v6060_v34  ;;  %v3629_v30 = vpop.eup %3628  ;;  %v6204_v9 = vmul.f32 0.0051020407, %v9184_v25  ;;  %v1645_v36 = vld [vmem:[%s8522_s1 + $0x110] sm:$0xff]  ;;  %v1656_v25 = vld [vmem:[%s8522_s1 + $0x168] sm:$0xff] }
 0x1a9   :  { %9179 = vst [vmem:[#allocation107_spill] sm:$0xff] %v6174_v54  ;;  %9183 = vst [vmem:[#allocation115_spill] sm:$0xff] %v6197_v16  ;;  %v6201_v62 = vmul.f32 %v6174_v54, %v6174_v54  ;;  %v6206_v28 = vmul.f32 %v3627_v10, %v1654_v12  ;;  %v3631_v34 = vpop.eup %3630  ;;  %v1418_v10 = vmul.f32 %v6177_v15, %v6177_v15  ;;  %3644 = vrsqrt.f32 %v1737_v39  ;;  %v9190_v15 = vld [vmem:[#allocation16_spill] sm:$0xff] }
 0x1aa   :  { %v1010_v35 = vpop.xlane.xlu1 %1009  ;;  %2351 = vperm.xlu1 %3549, %v6171_v0   ;;  %9185 = vst [vmem:[#allocation116_spill] sm:$0xff] %v6204_v9  ;;  %v1582_v5 = vmax.f32 %v1498_v21, 0.0  ;;  %v1500_v2 = vsub.f32 %v1332_v3, %v1416_v22  ;;  %v1739_v58 = vadd.f32 1e-05, %v1571_v50  ;;  %v1573_v12 = vmax.f32 %v1489_v13, 0.0  ;;  %v9187_v0 = vld [vmem:[#allocation21_spill] sm:$0xff] }
 0x1ab   :  { %v6189_v18 = vpop.xlane.xlu0 %1005  ;;  %9186 = vst [vmem:[#allocation99_spill] sm:$0xff] %v6206_v28  ;;  %v1334_v46 = vmul.f32 0.0051020407, %v1010_v35  ;;  %v6220_v1 = vmul.f32 0.0051020407, %v9187_v0  ;;  %v1491_v21 = vsub.f32 %v1323_v11, %v1407_v32  ;;  %v6224_v35 = vmul.f32 %v3629_v30, %v1645_v36  ;;  %v1647_v0 = vld [vmem:[%s8522_s1 + $0x120] sm:$0xff] }
 0x1ac   :  { %2406 = vperm.xlu0 %3548, %v6179_v4   ;;  %v1325_v3 = vmul.f32 0.0051020407, %v6087_v52  ;;  %v3633_v22 = vpop.eup %3632  ;;  %v6229_v39 = vmul.f32 0.0051020407, %v9190_v15  ;;  %3646 = vrsqrt.f32 %v1748_v14  ;;  %v6231_v50 = vmul.f32 %v3631_v34, %v1656_v25  ;;  %v1658_v15 = vld [vmem:[%s8522_s1 + $0x178] sm:$0xff] }
 0x1ad   :  { %9188 = vst [vmem:[#allocation118_spill] sm:$0xff] %v6220_v1  ;;  %9189 = vst [vmem:[#allocation120_spill] sm:$0xff] %v6224_v35  ;;  %v3635_v13 = vpop.eup %3634  ;;  %v1750_v52 = vadd.f32 1e-05, %v1582_v5  ;;  %v1584_v32 = vmax.f32 %v1500_v2, 0.0  ;;  %v1502_v11 = vsub.f32 %v1334_v46, %v1418_v10  ;;  %3648 = vrsqrt.f32 %v1739_v58  ;;  %v9196_v58 = vld [vmem:[#allocation18_spill] sm:$0xff] }
 0x1ae   :  { %v1018_v4 = vpop.xlane.xlu1 %1017  ;;  %2361 = vperm.xlu1 %3549, %v6197_v16   ;;  %v1411_v16 = vmul.f32 %v6204_v9, %v6204_v9  ;;  %9191 = vst [vmem:[#allocation121_spill] sm:$0xff] %v6229_v39  ;;  %9192 = vst [vmem:[#allocation122_spill] sm:$0xff] %v6231_v50  ;;  %v9193_v9 = vld [vmem:[#allocation23_spill] sm:$0xff]  ;;  %v1741_v34 = vadd.f32 1e-05, %v1573_v12  ;;  %v1420_v5 = vmul.f32 %v6220_v1, %v6220_v1 }
 0x1af   :  { %v6217_v54 = vpop.xlane.xlu0 %1013  ;;  %v1336_v36 = vmul.f32 0.0051020407, %v1018_v4  ;;  %v6241_v14 = vmul.f32 0.0051020407, %v9193_v9  ;;  %v1327_v25 = vmul.f32 0.0051020407, %v6114_v31  ;;  %v1493_v2 = vsub.f32 %v1325_v3, %v6201_v62 }
 0x1b0   :  { %2416 = vperm.xlu0 %3548, %v6206_v28   ;;  %v1575_v4 = vmax.f32 %v1491_v21, 0.0  ;;  %v6250_v46 = vmul.f32 %v3633_v22, %v1647_v0  ;;  %v3637_v10 = vpop.eup %3636  ;;  %v6254_v9 = vmul.f32 %v6229_v39, %v6229_v39  ;;  %v6257_v12 = vmul.f32 0.0051020407, %v9196_v58  ;;  %v1649_v21 = vld [vmem:[%s8522_s1 + $0x130] sm:$0xff]  ;;  %v9199_v58 = vld [vmem:[#allocation25_spill] sm:$0xff] }
 0x1b1   :  { %9194 = vst [vmem:[#allocation101_spill] sm:$0xff] %v6241_v14  ;;  %3650 = vrsqrt.f32 %v1750_v52  ;;  %v1752_v62 = vadd.f32 1e-05, %v1584_v32  ;;  %v1586_v3 = vmax.f32 %v1502_v11, 0.0  ;;  %v1504_v22 = vsub.f32 %v1336_v36, %v1420_v5  ;;  %v1660_v52 = vld [vmem:[%s8522_s1 + $0x188] sm:$0xff] }
 0x1b2   :  { %v1026_v30 = vpop.xlane.xlu1 %1025  ;;  %2371 = vperm.xlu1 %3549, %v6224_v35   ;;  %9195 = vst [vmem:[#allocation105_spill] sm:$0xff] %v6250_v46  ;;  %9197 = vst [vmem:[#allocation123_spill] sm:$0xff] %v6257_v12  ;;  %v6259_v35 = vmul.f32 %v3635_v13, %v1658_v15  ;;  %v3639_v1 = vpop.eup %3638  ;;  %v1422_v39 = vmul.f32 %v6241_v14, %v6241_v14  ;;  %3652 = vrsqrt.f32 %v1741_v34  ;;  %v1743_v11 = vadd.f32 1e-05, %v1575_v4  ;;  %v1651_v34 = vld [vmem:[%s8522_s1 + $0x140] sm:$0xff] }
 0x1b3   :  { %v6244_v28 = vpop.xlane.xlu0 %1021  ;;  %v1338_v31 = vmul.f32 0.0051020407, %v1026_v30  ;;  %v1495_v13 = vsub.f32 %v1327_v25, %v1411_v16  ;;  %v3641_v32 = vpop.eup %3640  ;;  %v1577_v36 = vmax.f32 %v1493_v2, 0.0  ;;  %v1329_v15 = vmul.f32 0.0051020407, %v6135_v57  ;;  %v9202_v25 = vld [vmem:[#allocation20_spill] sm:$0xff] }
 0x1b4   :  { %2426 = vperm.xlu0 %3548, %v6231_v50   ;;  %9198 = vst [vmem:[#allocation113_spill] sm:$0xff] %v6259_v35  ;;  %v6268_v50 = vmul.f32 0.0051020407, %v9199_v58  ;;  %v6277_v5 = vmul.f32 %v3637_v10, %v1649_v21  ;;  %v6284_v16 = vmul.f32 %v6257_v12, %v6257_v12  ;;  %v6287_v58 = vmul.f32 0.0051020407, %v9202_v25  ;;  %v3643_v21 = vpop.eup %3642 }
 0x1b5   :  { %v1506_v14 = vsub.f32 %v1338_v31, %v1422_v39  ;;  %3654 = vrsqrt.f32 %v1752_v62  ;;  %v1754_v2 = vadd.f32 1e-05, %v1586_v3  ;;  %v1588_v57 = vmax.f32 %v1504_v22, 0.0  ;;  %v1662_v31 = vld [vmem:[%s8522_s1 + $0x198] sm:$0xff] }
 0x1b6   :  { %v1034_v0 = vpop.xlane.xlu1 %1033  ;;  %2381 = vperm.xlu1 %3549, %v6250_v46   ;;  %9200 = vst [vmem:[#allocation125_spill] sm:$0xff] %v6268_v50  ;;  %9201 = vst [vmem:[#allocation111_spill] sm:$0xff] %v6277_v5  ;;  %v6290_v10 = vmul.f32 %v3639_v1, %v1660_v52  ;;  %v6295_v12 = vmul.f32 0.0051020407, %v9205_v43  ;;  %v1579_v42 = vmax.f32 %v1495_v13, 0.0  ;;  %v6299_v39 = vmul.f32 %v3641_v32, %v1651_v34  ;;  %v3645_v62 = vpop.eup %3644  ;;  %v1653_v43 = vld [vmem:[%s8522_s1 + $0x150] sm:$0xff] }
 0x1b7   :  { %v6270_v30 = vpop.xlane.xlu0 %1029  ;;  %9203 = vst [vmem:[#allocation119_spill] sm:$0xff] %v6287_v58  ;;  %v1340_v4 = vmul.f32 0.0051020407, %v1034_v0  ;;  %3656 = vrsqrt.f32 %v1743_v11  ;;  %v1745_v1 = vadd.f32 1e-05, %v1577_v36  ;;  %v1497_v3 = vsub.f32 %v1329_v15, %v6254_v9  ;;  %v9208_v11 = vld [vmem:[#allocation22_spill] sm:$0xff] }
 0x1b8   :  { %2436 = vperm.xlu0 %3548, %v6259_v35   ;;  %9204 = vst [vmem:[#allocation117_spill] sm:$0xff] %v6290_v10  ;;  %v1424_v35 = vmul.f32 %v6268_v50, %v6268_v50  ;;  %9206 = vst [vmem:[#allocation124_spill] sm:$0xff] %v6295_v12  ;;  %v1331_v22 = vmul.f32 0.0051020407, %v6163_v26  ;;  %v6312_v0 = vmul.f32 %v6287_v58, %v6287_v58  ;;  %v1590_v13 = vmax.f32 %v1506_v14, 0.0 }
 0x1b9   :  { %9207 = vst [vmem:[#allocation126_spill] sm:$0xff] %v6299_v39  ;;  %v3647_v34 = vpop.eup %3646  ;;  %v6315_v36 = vmul.f32 0.0051020407, %v9208_v11  ;;  %3658 = vrsqrt.f32 %v1754_v2  ;;  %v1756_v9 = vadd.f32 1e-05, %v1588_v57  ;;  %v6318_v15 = vmul.f32 %v3643_v21, %v1662_v31 }
 0x1ba   :  { %v1042_v46 = vpop.xlane.xlu1 %1041  ;;  %2391 = vperm.xlu1 %3549, %v6277_v5   ;;  %v1508_v52 = vsub.f32 %v1340_v4, %v1424_v35  ;;  %v1426_v50 = vmul.f32 %v6295_v12, %v6295_v12  ;;  %v1747_v14 = vadd.f32 1e-05, %v1579_v42  ;;  %v1664_v4 = vld [vmem:[%s8522_s1 + $0x1a8] sm:$0xff]  ;;  %v3649_v2 = vpop.eup %3648  ;;  %3660 = vrsqrt.f32 %v1745_v1  ;;  %v1655_v42 = vld [vmem:[%s8522_s1 + $0x160] sm:$0xff]  ;;  %v9214_v1 = vld [vmem:[#allocation24_spill] sm:$0xff] }
 0x1bb   :  { %v6297_v25 = vpop.xlane.xlu0 %1037  ;;  %v1342_v32 = vmul.f32 0.0051020407, %v1042_v46  ;;  %9209 = vst [vmem:[#allocation5_spill] sm:$0xff] %v6315_v36  ;;  %9210 = vst [vmem:[#allocation2_spill] sm:$0xff] %v6318_v15  ;;  %v6327_v46 = vmul.f32 %v3645_v62, %v1653_v43  ;;  %v1581_v57 = vmax.f32 %v1497_v3, 0.0  ;;  %v1499_v21 = vsub.f32 %v1331_v22, %v6284_v16 }
 0x1bc   :  { %2446 = vperm.xlu0 %3548, %v6290_v10   ;;  %v9211_v10 = vld [vmem:[#allocation29_spill] sm:$0xff]  ;;  %v1333_v31 = vmul.f32 0.0051020407, %v6189_v18  ;;  %v1592_v62 = vmax.f32 %v1508_v52, 0.0  ;;  %v6340_v12 = vmul.f32 %v6315_v36, %v6315_v36  ;;  %v6343_v3 = vmul.f32 0.0051020407, %v9214_v1 }
 0x1bd   :  { %v6323_v58 = vmul.f32 0.0051020407, %v9211_v10  ;;  %9213 = vst [vmem:[#allocation3_spill] sm:$0xff] %v6327_v46  ;;  %v1758_v10 = vadd.f32 1e-05, %v1590_v13  ;;  %v1510_v43 = vsub.f32 %v1342_v32, %v1426_v50  ;;  %3662 = vrsqrt.f32 %v1756_v9  ;;  %v9217_v52 = vld [vmem:[#allocation31_spill] sm:$0xff] }
 0x1be   :  { %v1050_v26 = vpop.xlane.xlu1 %1049  ;;  %2401 = vperm.xlu1 %3549, %v6299_v39   ;;  %9215 = vst [vmem:[#allocation9_spill] sm:$0xff] %v6343_v3  ;;  %v6346_v18 = vmul.f32 %v3647_v34, %v1664_v4  ;;  %v3651_v22 = vpop.eup %3650  ;;  %v6351_v50 = vmul.f32 0.0051020407, %v9217_v52  ;;  %3664 = vrsqrt.f32 %v1747_v14  ;;  %v1666_v9 = vld [vmem:[%s8522_s1 + $0x1b8] sm:$0xff]  ;;  %v1749_v36 = vadd.f32 1e-05, %v1581_v57 }
 0x1bf   :  { %9212 = vst [vmem:[#allocation7_spill] sm:$0xff] %v6323_v58  ;;  %v6325_v35 = vpop.xlane.xlu0 %1045  ;;  %v1344_v11 = vmul.f32 0.0051020407, %v1050_v26  ;;  %v1428_v13 = vmul.f32 %v6323_v58, %v6323_v58  ;;  %v6355_v26 = vmul.f32 %v3649_v2, %v1655_v42  ;;  %v3653_v1 = vpop.eup %3652  ;;  %v1583_v34 = vmax.f32 %v1499_v21, 0.0  ;;  %v1657_v14 = vld [vmem:[%s8522_s1 + $0x170] sm:$0xff] }
 0x1c0   :  { %2456 = vperm.xlu0 %3548, %v6318_v15   ;;  %9216 = vst [vmem:[#allocation4_spill] sm:$0xff] %v6346_v18  ;;  %9218 = vst [vmem:[#allocation11_spill] sm:$0xff] %v6351_v50  ;;  %v1501_v4 = vsub.f32 %v1333_v31, %v6312_v0  ;;  %3666 = vrsqrt.f32 %v1758_v10  ;;  %v1760_v2 = vadd.f32 1e-05, %v1592_v62  ;;  %v1594_v42 = vmax.f32 %v1510_v43, 0.0  ;;  %v9220_v15 = vld [vmem:[#allocation26_spill] sm:$0xff] }
 0x1c1   :  { %9219 = vst [vmem:[#allocation6_spill] sm:$0xff] %v6355_v26  ;;  %v1512_v52 = vsub.f32 %v1344_v11, %v1428_v13  ;;  %v1421_v58 = vmul.f32 %v6343_v3, %v6343_v3  ;;  %v6369_v57 = vmul.f32 0.0051020407, %v9220_v15  ;;  %v9223_v10 = vld [vmem:[#allocation33_spill] sm:$0xff]  ;;  %v1337_v43 = vmul.f32 0.0051020407, %v6244_v28 }
 0x1c2   :  { %v1058_v16 = vpop.xlane.xlu1 %1057  ;;  %2411 = vperm.xlu1 %3549, %v6327_v46   ;;  %v1335_v46 = vmul.f32 0.0051020407, %v6217_v54  ;;  %v6372_v54 = vmul.f32 %v3651_v22, %v1666_v9  ;;  %v3655_v31 = vpop.eup %3654  ;;  %v6377_v62 = vmul.f32 0.0051020407, %v9223_v10  ;;  %v6382_v13 = vmul.f32 %v3653_v1, %v1657_v14  ;;  %v1668_v15 = vld [vmem:[%s8522_s1 + $0x1c8] sm:$0xff]  ;;  %v9225_v10 = vld [vmem:[#allocation28_spill] sm:$0xff] }
 0x1c3   :  { %v6353_v32 = vpop.xlane.xlu0 %1053  ;;  %9221 = vst [vmem:[#allocation8_spill] sm:$0xff] %v6369_v57  ;;  %v1346_v21 = vmul.f32 0.0051020407, %v1058_v16  ;;  %3668 = vrsqrt.f32 %v1749_v36  ;;  %v1751_v16 = vadd.f32 1e-05, %v1583_v34  ;;  %v1585_v22 = vmax.f32 %v1501_v4, 0.0 }
 0x1c4   :  { %2466 = vperm.xlu0 %3548, %v6346_v18   ;;  %9222 = vst [vmem:[#allocation13_spill] sm:$0xff] %v6372_v54  ;;  %v1430_v18 = vmul.f32 %v6351_v50, %v6351_v50  ;;  %9224 = vst [vmem:[#allocation15_spill] sm:$0xff] %v6377_v62  ;;  %v1503_v9 = vsub.f32 %v1335_v46, %v6340_v12  ;;  %v3657_v3 = vpop.eup %3656  ;;  %v6390_v50 = vmul.f32 0.0051020407, %v9225_v10  ;;  %3670 = vrsqrt.f32 %v1760_v2  ;;  %v1659_v1 = vld [vmem:[%s8522_s1 + $0x180] sm:$0xff] }
 0x1c5   :  { %v1762_v28 = vadd.f32 1e-05, %v1594_v42  ;;  %v9227_v14 = vld [vmem:[#allocation30_spill] sm:$0xff]  ;;  %v6399_v12 = vmul.f32 %v3655_v31, %v1668_v15  ;;  %v1432_v2 = vmul.f32 %v6377_v62, %v6377_v62  ;;  %v9229_v42 = vld [vmem:[#allocation35_spill] sm:$0xff]  ;;  %v1505_v10 = vsub.f32 %v1337_v43, %v1421_v58  ;;  %v1661_v43 = vld [vmem:[%s8522_s1 + $0x190] sm:$0xff] }
 0x1c6   :  { %v1066_v0 = vpop.xlane.xlu1 %1065  ;;  %2421 = vperm.xlu1 %3549, %v6355_v26   ;;  %9226 = vst [vmem:[#allocation10_spill] sm:$0xff] %v6390_v50  ;;  %v1596_v26 = vmax.f32 %v1512_v52, 0.0  ;;  %v6396_v39 = vmul.f32 0.0051020407, %v9227_v14  ;;  %v1514_v36 = vsub.f32 %v1346_v21, %v1430_v18  ;;  %v3659_v46 = vpop.eup %3658  ;;  %v6404_v52 = vmul.f32 0.0051020407, %v9229_v42 }
 0x1c7   :  { %v6380_v11 = vpop.xlane.xlu0 %1061  ;;  %v1348_v34 = vmul.f32 0.0051020407, %v1066_v0  ;;  %v1670_v18 = vld [vmem:[%s8522_s1 + $0x1d8] sm:$0xff]  ;;  %3672 = vrsqrt.f32 %v1751_v16  ;;  %v1753_v21 = vadd.f32 1e-05, %v1585_v22  ;;  %v1587_v0 = vmax.f32 %v1503_v9, 0.0  ;;  %v3661_v15 = vpop.eup %3660 }
 0x1c8   :  { %2476 = vperm.xlu0 %3548, %v6372_v54   ;;  %9228 = vst [vmem:[#allocation17_spill] sm:$0xff] %v6396_v39  ;;  %9230 = vst [vmem:[#allocation12_spill] sm:$0xff] %v6404_v52  ;;  %v1339_v54 = vmul.f32 0.0051020407, %v6270_v30  ;;  %v6413_v31 = vmul.f32 %v3657_v3, %v1659_v1  ;;  %v1423_v14 = vmul.f32 %v6369_v57, %v6369_v57  ;;  %3674 = vrsqrt.f32 %v1762_v28 }
 0x1c9   :  { %v1764_v58 = vadd.f32 1e-05, %v1596_v26  ;;  %v1598_v42 = vmax.f32 %v1514_v36, 0.0  ;;  %v1516_v62 = vsub.f32 %v1348_v34, %v1432_v2  ;;  %v6421_v22 = vmul.f32 %v3659_v46, %v1670_v18  ;;  %v1672_v36 = vld [vmem:[%s8522_s1 + $0x1e8] sm:$0xff] }
 0x1ca   :  { %v1074_v4 = vpop.xlane.xlu1 %1073  ;;  %2431 = vperm.xlu1 %3549, %v6382_v13   ;;  %9231 = vst [vmem:[#allocation19_spill] sm:$0xff] %v6413_v31  ;;  %v3663_v3 = vpop.eup %3662  ;;  %v1434_v9 = vmul.f32 %v6404_v52, %v6404_v52  ;;  %v1589_v1 = vmax.f32 %v1505_v10, 0.0  ;;  %v1507_v57 = vsub.f32 %v1339_v54, %v1423_v14  ;;  %v1341_v26 = vmul.f32 0.0051020407, %v6297_v25  ;;  %v1663_v14 = vld [vmem:[%s8522_s1 + $0x1a0] sm:$0xff] }
 0x1cb   :  { %v6407_v5 = vpop.xlane.xlu0 %1069  ;;  %v1350_v30 = vmul.f32 0.0051020407, %v1074_v4  ;;  %9232 = vst [vmem:[#allocation14_spill] sm:$0xff] %v6421_v22  ;;  %v3665_v34 = vpop.eup %3664  ;;  %v9233_v4 = vld [vmem:[#allocation37_spill] sm:$0xff]  ;;  %3676 = vrsqrt.f32 %v1753_v21  ;;  %v1755_v46 = vadd.f32 1e-05, %v1587_v0  ;;  %v6435_v18 = vmul.f32 %v3661_v15, %v1661_v43 }
 0x1cc   :  { %2486 = vperm.xlu0 %3548, %v6399_v12   ;;  %v6432_v2 = vmul.f32 0.0051020407, %v9233_v4  ;;  %v1425_v54 = vmul.f32 %v6390_v50, %v6390_v50  ;;  %v1427_v25 = vmul.f32 %v6396_v39, %v6396_v39  ;;  %3678 = vrsqrt.f32 %v1764_v58  ;;  %v1674_v43 = vld [vmem:[%s8522_s1 + $0x1f8] sm:$0xff] }
 0x1cd   :  { %9235 = vst [vmem:[#allocation16_spill] sm:$0xff] %v6435_v18  ;;  %v1518_v10 = vsub.f32 %v1350_v30, %v1434_v9  ;;  %v3667_v4 = vpop.eup %3666  ;;  %v1766_v52 = vadd.f32 1e-05, %v1598_v42  ;;  %v1600_v21 = vmax.f32 %v1516_v62, 0.0  ;;  %v6445_v15 = vmul.f32 %v3663_v3, %v1672_v36  ;;  %v9237_v42 = vld [vmem:[#allocation39_spill] sm:$0xff] }
 0x1ce   :  { %v1082_v16 = vpop.xlane.xlu1 %1081  ;;  %2441 = vperm.xlu1 %3549, %v6413_v31   ;;  %9234 = vst [vmem:[#allocation21_spill] sm:$0xff] %v6432_v2  ;;  %v1757_v39 = vadd.f32 1e-05, %v1589_v1  ;;  %v1591_v58 = vmax.f32 %v1507_v57, 0.0  ;;  %v1509_v30 = vsub.f32 %v1341_v26, %v1425_v54  ;;  %v1343_v9 = vmul.f32 0.0051020407, %v6325_v35 }
 0x1cf   :  { %v6426_v28 = vpop.xlane.xlu0 %1077  ;;  %v1352_v0 = vmul.f32 0.0051020407, %v1082_v16  ;;  %9236 = vst [vmem:[#allocation23_spill] sm:$0xff] %v6445_v15  ;;  %v1436_v62 = vmul.f32 %v6432_v2, %v6432_v2  ;;  %v6456_v16 = vmul.f32 0.0051020407, %v9237_v42  ;;  %3680 = vrsqrt.f32 %v1755_v46  ;;  %v9242_v57 = vld [vmem:[#allocation41_spill] sm:$0xff] }
 0x1d0   :  { %2496 = vperm.xlu0 %3548, %v6421_v22   ;;  %v6459_v3 = vmul.f32 %v3665_v34, %v1663_v14  ;;  %v3669_v36 = vpop.eup %3668  ;;  %v6465_v26 = vmul.f32 0.0051020407, %v9242_v57  ;;  %v1602_v35 = vmax.f32 %v1518_v10, 0.0  ;;  %v6467_v54 = vmul.f32 %v3667_v4, %v1674_v43  ;;  %v1665_v42 = vld [vmem:[%s8522_s1 + $0x1b0] sm:$0xff] }
 0x1d1   :  { %9238 = vst [vmem:[#allocation18_spill] sm:$0xff] %v6456_v16  ;;  %v3671_v2 = vpop.eup %3670  ;;  %3682 = vrsqrt.f32 %v1766_v52  ;;  %v1768_v46 = vadd.f32 1e-05, %v1600_v21  ;;  %v1759_v10 = vadd.f32 1e-05, %v1591_v58  ;;  %v1593_v4 = vmax.f32 %v1509_v30, 0.0 }
 0x1d2   :  { %v1090_v31 = vpop.xlane.xlu1 %1089  ;;  %2451 = vperm.xlu1 %3549, %v6435_v18   ;;  %9239 = vst [vmem:[#allocation25_spill] sm:$0xff] %v6459_v3  ;;  %v9240_v18 = vld [vmem:[#allocation32_spill] sm:$0xff]  ;;  %9243 = vst [vmem:[#allocation27_spill] sm:$0xff] %v6465_v26  ;;  %3684 = vrsqrt.f32 %v1757_v39  ;;  %v1511_v43 = vsub.f32 %v1343_v9, %v1427_v25  ;;  %v1438_v57 = vmul.f32 %v6456_v16, %v6456_v16  ;;  %v1345_v22 = vmul.f32 0.0051020407, %v6353_v32  ;;  %v1667_v32 = vld [vmem:[%s8522_s1 + $0x1c0] sm:$0xff] }
 0x1d3   :  { %v6451_v50 = vpop.xlane.xlu0 %1085  ;;  %v6462_v1 = vmul.f32 0.0051020407, %v9240_v18  ;;  %9244 = vst [vmem:[#allocation22_spill] sm:$0xff] %v6467_v54  ;;  %v1354_v34 = vmul.f32 0.0051020407, %v1090_v31  ;;  %v1676_v18 = vld [vmem:[%s8522_s1 + $0x208] sm:$0xff]  ;;  %v6480_v52 = vmul.f32 %v3669_v36, %v1665_v42  ;;  %3686 = vrsqrt.f32 %v1768_v46 }
 0x1d4   :  { %2506 = vperm.xlu0 %3548, %v6445_v15   ;;  %v1520_v15 = vsub.f32 %v1352_v0, %v1436_v62  ;;  %v3673_v31 = vpop.eup %3672  ;;  %v9246_v0 = vld [vmem:[#allocation34_spill] sm:$0xff]  ;;  %v1770_v39 = vadd.f32 1e-05, %v1602_v35  ;;  %v6489_v25 = vmul.f32 %v3671_v2, %v1676_v18  ;;  %v1678_v35 = vld [vmem:[%s8522_s1 + $0x218] sm:$0xff]  ;;  %v1440_v2 = vmul.f32 %v6465_v26, %v6465_v26 }
 0x1d5   :  { %9241 = vst [vmem:[#allocation20_spill] sm:$0xff] %v6462_v1  ;;  %9245 = vst [vmem:[#allocation29_spill] sm:$0xff] %v6480_v52  ;;  %v1429_v21 = vmul.f32 %v6462_v1, %v6462_v1  ;;  %v6485_v62 = vmul.f32 0.0051020407, %v9246_v0  ;;  %v3675_v30 = vpop.eup %3674  ;;  %v1522_v36 = vsub.f32 %v1354_v34, %v1438_v57  ;;  %3688 = vrsqrt.f32 %v1759_v10  ;;  %v9248_v1 = vld [vmem:[#allocation43_spill] sm:$0xff] }
 0x1d6   :  { %v1098_v14 = vpop.xlane.xlu1 %1097  ;;  %2461 = vperm.xlu1 %3549, %v6459_v3   ;;  %v1604_v9 = vmax.f32 %v1520_v15, 0.0  ;;  %v1761_v18 = vadd.f32 1e-05, %v1593_v4  ;;  %v1595_v0 = vmax.f32 %v1511_v43, 0.0  ;;  %v1347_v15 = vmul.f32 0.0051020407, %v6380_v11 }
 0x1d7   :  { %9247 = vst [vmem:[#allocation24_spill] sm:$0xff] %v6485_v62  ;;  %v6487_v58 = vpop.xlane.xlu0 %1093  ;;  %v1356_v42 = vmul.f32 0.0051020407, %v1098_v14  ;;  %v1513_v46 = vsub.f32 %v1345_v22, %v1429_v21  ;;  %v6505_v34 = vmul.f32 %v3673_v31, %v1667_v32  ;;  %v1431_v57 = vmul.f32 %v6485_v62, %v6485_v62  ;;  %v1669_v22 = vld [vmem:[%s8522_s1 + $0x1d0] sm:$0xff]  ;;  %v9252_v62 = vld [vmem:[#allocation38_spill] sm:$0xff] }
 0x1d8   :  { %2516 = vperm.xlu0 %3548, %v6467_v54   ;;  %v6501_v54 = vmul.f32 0.0051020407, %v9248_v1  ;;  %v3677_v14 = vpop.eup %3676  ;;  %3690 = vrsqrt.f32 %v1770_v39  ;;  %v6512_v10 = vmul.f32 %v3675_v30, %v1678_v35  ;;  %v1772_v11 = vadd.f32 1e-05, %v1604_v9 }
 0x1d9   :  { %v3679_v1 = vpop.eup %3678  ;;  %v1606_v4 = vmax.f32 %v1522_v36, 0.0  ;;  %v1524_v43 = vsub.f32 %v1356_v42, %v1440_v2  ;;  %3692 = vrsqrt.f32 %v1761_v18  ;;  %v1763_v39 = vadd.f32 1e-05, %v1595_v0 }
 0x1da   :  { %v1106_v16 = vpop.xlane.xlu1 %1105  ;;  %2471 = vperm.xlu1 %3549, %v6480_v52   ;;  %9249 = vst [vmem:[#allocation31_spill] sm:$0xff] %v6501_v54  ;;  %v9250_v52 = vld [vmem:[#allocation36_spill] sm:$0xff]  ;;  %v1349_v32 = vmul.f32 0.0051020407, %v6407_v5  ;;  %v1442_v9 = vmul.f32 %v6501_v54, %v6501_v54  ;;  %v1597_v36 = vmax.f32 %v1513_v46, 0.0  ;;  %v1515_v42 = vsub.f32 %v1347_v15, %v1431_v57  ;;  %v1671_v5 = vld [vmem:[%s8522_s1 + $0x1e0] sm:$0xff] }
 0x1db   :  { %v6510_v3 = vmul.f32 0.0051020407, %v9250_v52  ;;  %v1358_v31 = vmul.f32 0.0051020407, %v1106_v16  ;;  %v1680_v52 = vld [vmem:[%s8522_s1 + $0x228] sm:$0xff]  ;;  %v6524_v30 = vpop.xlane.xlu0 %1101  ;;  %v6529_v16 = vmul.f32 %v3677_v14, %v1669_v22  ;;  %3694 = vrsqrt.f32 %v1772_v11 }
 0x1dc   :  { %2526 = vperm.xlu0 %3548, %v6489_v25   ;;  %v3681_v35 = vpop.eup %3680  ;;  %v6534_v18 = vmul.f32 0.0051020407, %v9252_v62  ;;  %v6536_v0 = vmul.f32 %v3679_v1, %v1680_v52  ;;  %v1774_v46 = vadd.f32 1e-05, %v1606_v4  ;;  %v1608_v15 = vmax.f32 %v1524_v43, 0.0  ;;  %v1682_v62 = vld [vmem:[%s8522_s1 + $0x238] sm:$0xff] }
 0x1dd   :  { %9251 = vst [vmem:[#allocation26_spill] sm:$0xff] %v6510_v3  ;;  %v1433_v2 = vmul.f32 %v6510_v3, %v6510_v3  ;;  %v1526_v57 = vsub.f32 %v1358_v31, %v1442_v9  ;;  %3696 = vrsqrt.f32 %v1763_v39  ;;  %v1765_v52 = vadd.f32 1e-05, %v1597_v36  ;;  %v1673_v43 = vld [vmem:[%s8522_s1 + $0x1f0] sm:$0xff] }
 0x1de   :  { %v6517_v21 = vpop.permute.xlu1 %2206  ;;  %2481 = vperm.xlu1 %3549, %v6505_v34   ;;  %9253 = vst [vmem:[#allocation33_spill] sm:$0xff] %v6534_v18  ;;  %v3683_v14 = vpop.eup %3682  ;;  %v1599_v26 = vmax.f32 %v1515_v42, 0.0  ;;  %v1351_v11 = vmul.f32 0.0051020407, %v6426_v28  ;;  %v6551_v4 = vmul.f32 %v3681_v35, %v1671_v5  ;;  %v1435_v31 = vmul.f32 %v6534_v18, %v6534_v18  ;;  %v9256_v39 = vld [vmem:[#allocation40_spill] sm:$0xff] }
 0x1df   :  { %v1517_v22 = vsub.f32 %v1349_v32, %v1433_v2  ;;  %v3685_v1 = vpop.eup %3684  ;;  %v6559_v32 = vmul.f32 0.0051020407, %v9256_v39  ;;  %3698 = vrsqrt.f32 %v1774_v46  ;;  %v1776_v9 = vadd.f32 1e-05, %v1608_v15  ;;  %v1684_v39 = vld [vmem:[%s8522_s1 + $0x248] sm:$0xff] }
 0x1e0   :  { %2536 = vperm.xlu0 %3548, %v6512_v10   ;;  %v1610_v36 = vmax.f32 %v1526_v57, 0.0  ;;  %v6564_v28 = vmul.f32 %v3683_v14, %v1682_v62  ;;  %v3687_v35 = vpop.eup %3686  ;;  %3700 = vrsqrt.f32 %v1765_v52  ;;  %v1767_v46 = vadd.f32 1e-05, %v1599_v26  ;;  %v1675_v14 = vld [vmem:[%s8522_s1 + $0x200] sm:$0xff] }
 0x1e1   :  { %9257 = vst [vmem:[#allocation35_spill] sm:$0xff] %v6559_v32  ;;  %v1601_v2 = vmax.f32 %v1517_v22, 0.0  ;;  %v1519_v15 = vsub.f32 %v1351_v11, %v1435_v31  ;;  %v1353_v57 = vmul.f32 0.0051020407, %v6451_v50  ;;  %v1437_v22 = vmul.f32 %v6559_v32, %v6559_v32  ;;  %v1686_v32 = vld [vmem:[%s8522_s1 + $0x258] sm:$0xff] }
 0x1e2   :  { %v6541_v54 = vpop.permute.xlu1 %2211  ;;  %2491 = vperm.xlu1 %3549, %v6529_v16   ;;  %v3689_v18 = vpop.eup %3688  ;;  %3702 = vrsqrt.f32 %v1776_v9  ;;  %v6586_v50 = vmul.f32 %v3687_v35, %v1684_v39  ;;  %v1677_v35 = vld [vmem:[%s8522_s1 + $0x210] sm:$0xff] }
 0x1e3   :  { %9254 = vst [vmem:[#allocation28_spill] sm:$0xff] %v6541_v54  ;;  %v6544_v3 = vpop.permute.xlu0 %2201  ;;  %v6568_v54 = vmul.f32 %v3685_v1, %v1673_v43  ;;  %v9259_v1 = vld [vmem:[#allocation42_spill] sm:$0xff]  ;;  %v1769_v26 = vadd.f32 1e-05, %v1601_v2  ;;  %v6590_v31 = vmul.f32 %v3689_v18, %v1675_v14  ;;  %3704 = vrsqrt.f32 %v1767_v46  ;;  %v9263_v2 = vld [vmem:[#allocation44_spill] sm:$0xff] }
 0x1e4   :  { %9255 = vst [vmem:[#allocation30_spill] sm:$0xff] %v6544_v3  ;;  %2546 = vperm.xlu0 %3548, %v6536_v0   ;;  %v6581_v43 = vmul.f32 0.0051020407, %v9259_v1  ;;  %v1778_v3 = vadd.f32 1e-05, %v1610_v36  ;;  %v1603_v1 = vmax.f32 %v1519_v15, 0.0  ;;  %v1521_v9 = vsub.f32 %v1353_v57, %v1437_v22 }
 0x1e5   :  { %v3691_v62 = vpop.eup %3690  ;;  %v1355_v36 = vmul.f32 0.0051020407, %v6487_v58  ;;  %v6603_v39 = vmul.f32 0.0051020407, %v9263_v2  ;;  %v1688_v22 = vld [vmem:[%s8522_s1 + $0x268] sm:$0xff] }
 0x1e6   :  { %v6561_v42 = vpop.permute.xlu1 %2216  ;;  %2501 = vperm.xlu1 %3549, %v6551_v4   ;;  %9260 = vst [vmem:[#allocation39_spill] sm:$0xff] %v6581_v43  ;;  %v1439_v18 = vmul.f32 %v6581_v43, %v6581_v43  ;;  %3706 = vrsqrt.f32 %v1778_v3  ;;  %v6608_v46 = vmul.f32 %v3691_v62, %v1686_v32  ;;  %v1771_v2 = vadd.f32 1e-05, %v1603_v1  ;;  %v1679_v32 = vld [vmem:[%s8522_s1 + $0x220] sm:$0xff] }
 0x1e7   :  { %v6566_v5 = vpop.permute.xlu0 %2246  ;;  %9264 = vst [vmem:[#allocation34_spill] sm:$0xff] %v6603_v39  ;;  %3708 = vrsqrt.f32 %v1769_v26 }
 0x1e8   :  { %9258 = vst [vmem:[#allocation37_spill] sm:$0xff] %v6566_v5  ;;  %2556 = vperm.xlu0 %3548, %v6564_v28   ;;  %v3693_v5 = vpop.eup %3692  ;;  %v1523_v3 = vsub.f32 %v1355_v36, %v1439_v18  ;;  %3710 = vrsqrt.f32 %v1771_v2 }
 0x1e9   :  { %v3695_v58 = vpop.eup %3694  ;;  %v6612_v57 = vmul.f32 %v3693_v5, %v1677_v35  ;;  %v1441_v5 = vmul.f32 %v6603_v39, %v6603_v39 }
 0x1ea   :  { %v6583_v52 = vpop.permute.xlu1 %2221  ;;  %2511 = vperm.xlu1 %3549, %v6568_v54   ;;  %v3697_v43 = vpop.eup %3696  ;;  %v6627_v26 = vmul.f32 %v3695_v58, %v1688_v22  ;;  %v1607_v18 = vmax.f32 %v1523_v3, 0.0  ;;  %v1681_v58 = vld [vmem:[%s8522_s1 + $0x230] sm:$0xff] }
 0x1eb   :  { %9261 = vst [vmem:[#allocation32_spill] sm:$0xff] %v6583_v52  ;;  %v6588_v11 = vpop.permute.xlu0 %2256  ;;  %v1605_v52 = vmax.f32 %v1521_v9, 0.0  ;;  %v6631_v36 = vmul.f32 %v3697_v43, %v1679_v32 }
 0x1ec   :  { %9262 = vst [vmem:[#allocation41_spill] sm:$0xff] %v6588_v11  ;;  %2566 = vperm.xlu0 %3548, %v6586_v50   ;;  %v1357_v11 = vmul.f32 0.0051020407, %v6524_v30  ;;  %v3699_v1 = vpop.eup %3698  ;;  %v1690_v30 = vld [vmem:[%s8522_s1 + $0x278] sm:$0xff] }
 0x1ed   :  { %9268 = vst [vmem:[#allocation40_spill] sm:$0xff] %v6631_v36  ;;  %v1773_v35 = vadd.f32 1e-05, %v1605_v52  ;;  %v3701_v39 = vpop.eup %3700  ;;  %v6643_v43 = vmul.f32 %v3699_v1, %v1690_v30  ;;  %v1692_v52 = vld [vmem:[%s8522_s1 + $0x288] sm:$0xff]  ;;  %v1683_v1 = vld [vmem:[%s8522_s1 + $0x240] sm:$0xff] }
 0x1ee   :  { %v6605_v14 = vpop.permute.xlu1 %2226  ;;  %2521 = vperm.xlu1 %3549, %v6590_v31   ;;  %v6651_v3 = vmul.f32 %v3701_v39, %v1681_v58  ;;  %v1685_v58 = vld [vmem:[%s8522_s1 + $0x250] sm:$0xff] }
 0x1ef   :  { %v6610_v15 = vpop.permute.xlu0 %2266  ;;  %v3703_v32 = vpop.eup %3702  ;;  %3712 = vrsqrt.f32 %v1773_v35 }
 0x1f0   :  { %9265 = vst [vmem:[#allocation43_spill] sm:$0xff] %v6610_v15  ;;  %2576 = vperm.xlu0 %3548, %v6608_v46   ;;  %v1525_v15 = vsub.f32 %v1357_v11, %v1441_v5  ;;  %v1775_v11 = vadd.f32 1e-05, %v1607_v18  ;;  %9270 = vst [vmem:[#allocation44_spill] sm:$0xff] %v6651_v3  ;;  %v3705_v5 = vpop.eup %3704 }
 0x1f1   :  { %v6667_v18 = vmul.f32 %v3705_v5, %v1683_v1 }
 0x1f2   :  { %v6624_v62 = vpop.permute.xlu1 %2231  ;;  %2531 = vperm.xlu1 %3549, %v6612_v57   ;;  %v1609_v2 = vmax.f32 %v1525_v15, 0.0  ;;  %v1694_v15 = vld [vmem:[%s8522_s1 + $0x298] sm:$0xff]  ;;  %3714 = vrsqrt.f32 %v1775_v11  ;;  %v1948_v11 = vld [vmem:[%s8523_s2 + $0x8] sm:$0xff] }
 0x1f3   :  { %9266 = vst [vmem:[#allocation36_spill] sm:$0xff] %v6624_v62  ;;  %v6629_v9 = vpop.permute.xlu0 %2276 }
 0x1f4   :  { %9267 = vst [vmem:[#allocation38_spill] sm:$0xff] %v6629_v9  ;;  %2586 = vperm.xlu0 %3548, %v6627_v26   ;;  %v3707_v9 = vpop.eup %3706  ;;  %v1777_v35 = vadd.f32 1e-05, %v1609_v2 }
 0x1f5   :  { %v3709_v39 = vpop.eup %3708 }
 0x1f6   :  { %v6640_v22 = vpop.permute.xlu1 %2236  ;;  %2541 = vperm.xlu1 %3549, %v6631_v36   ;;  %3716 = vrsqrt.f32 %v1777_v35  ;;  %v6685_v2 = vmul.f32 %v3709_v39, %v1685_v58  ;;  %v3711_v5 = vpop.eup %3710  ;;  %v1950_v39 = vld [vmem:[%s8523_s2 + $0x18] sm:$0xff] }
 0x1f7   :  { %v6645_v62 = vpop.permute.xlu0 %2286 }
 0x1f8   :  { %9269 = vst [vmem:[#allocation42_spill] sm:$0xff] %v6645_v62  ;;  %2596 = vperm.xlu0 %3548, %v6643_v43   ;;  %v6659_v62 = vmul.f32 %v3703_v32, %v1692_v52  ;;  %v6675_v52 = vmul.f32 %v3707_v9, %v1694_v15  ;;  %v1687_v9 = vld [vmem:[%s8522_s1 + $0x260] sm:$0xff] }
 0x1f9   :  { %v6700_v35 = vmul.f32 %v3711_v5, %v1687_v9 }
 0x1fa   :  { %v6656_v30 = vpop.permute.xlu1 %2241  ;;  %2551 = vperm.xlu1 %3549, %v6651_v3  }
 0x1fb   :  { %9271 = vst [vmem:[#allocation127_spill] sm:$0xff] %v6656_v30  ;;  %v6661_v36 = vpop.permute.xlu0 %2296 }
 0x1fc   :  { %9272 = vst [vmem:[#allocation128_spill] sm:$0xff] %v6661_v36  ;;  %2606 = vperm.xlu0 %3548, %v6659_v62   ;;  %v9273_v36 = vld [vmem:[#allocation45_spill] sm:$0xff]  ;;  %v3713_v58 = vpop.eup %3712 }
 0x1fd   :  { %v2032_v30 = vmul.f32 %v5696_v56, %v9273_v36  ;;  %v2034_v36 = vmul.f32 %v5747_v40, %v5579_v63  ;;  %v2036_v63 = vmul.f32 %v5801_v41, %v5626_v29  ;;  %v2038_v29 = vmul.f32 %v5851_v20, %v5652_v45  ;;  %v9280_v45 = vld [vmem:[#allocation48_spill] sm:$0xff] }
 0x1fe   :  { %v6672_v32 = vpop.permute.xlu1 %2251  ;;  %2561 = vperm.xlu1 %3549, %v6667_v18   ;;  %v2040_v20 = vmul.f32 %v5760_v60, %v9280_v45 }
 0x1ff   :  { %v6679_v3 = vpop.permute.xlu0 %2306  ;;  %v2116_v56 = vsub.f32 %v1948_v11, %v2032_v30  ;;  %v2118_v30 = vsub.f32 %v1950_v39, %v2034_v36  ;;  %v1952_v11 = vld [vmem:[%s8523_s2 + $0x28] sm:$0xff]  ;;  %v3715_v9 = vpop.eup %3714 }
 0x200   :  { %9274 = vst [vmem:[#allocation45_spill] sm:$0xff] %v6679_v3  ;;  %2616 = vperm.xlu0 %3548, %v6675_v52   ;;  %v2120_v36 = vsub.f32 %v1952_v11, %v2036_v63 }
 0x202   :  { %v6690_v1 = vpop.permute.xlu1 %2261  ;;  %2571 = vperm.xlu1 %3549, %v6685_v2  }
 0x203   :  { %9275 = vst [vmem:[#allocation129_spill] sm:$0xff] %v6690_v1  ;;  %v6695_v15 = vpop.permute.xlu0 %2316  ;;  %v1689_v1 = vld [vmem:[%s8522_s1 + $0x270] sm:$0xff] }
 0x204   :  { %2794 = vperm.xlu0 %3548, %v2116_v56   ;;  %v6715_v5 = vmul.f32 %v3713_v58, %v1689_v1  ;;  %v1691_v56 = vld [vmem:[%s8522_s1 + $0x280] sm:$0xff]  ;;  %v1954_v1 = vld [vmem:[%s8523_s2 + $0x38] sm:$0xff]  ;;  %v3717_v58 = vpop.eup %3716 }
 0x205   :  { %v6730_v39 = vmul.f32 %v3715_v9, %v1691_v56  ;;  %v2122_v63 = vsub.f32 %v1954_v1, %v2038_v29  ;;  %v1956_v9 = vld [vmem:[%s8523_s2 + $0x48] sm:$0xff]  ;;  %v2042_v1 = vmul.f32 %v5786_v53, %v5619_v17  ;;  %v2044_v17 = vmul.f32 %v5813_v61, %v5633_v37 }
 0x206   :  { %v6705_v3 = vpop.permute.xlu1 %2271  ;;  %2581 = vperm.xlu1 %3549, %v6700_v35   ;;  %v2124_v60 = vsub.f32 %v1956_v9, %v2040_v20  ;;  %v1951_v9 = vld [vmem:[%s8523_s2 + $0x20] sm:$0xff]  ;;  %v2046_v37 = vmul.f32 %v5837_v38, %v5646_v24 }
 0x207   :  { %9276 = vst [vmem:[#allocation130_spill] sm:$0xff] %v6705_v3  ;;  %v6710_v40 = vpop.permute.xlu0 %2326  ;;  %v9285_v24 = vld [vmem:[#allocation50_spill] sm:$0xff] }
 0x208   :  { %2804 = vperm.xlu0 %3548, %v2118_v30   ;;  %v1693_v30 = vld [vmem:[%s8522_s1 + $0x290] sm:$0xff]  ;;  %v2048_v38 = vmul.f32 %v5864_v7, %v9285_v24  ;;  %v2050_v7 = vmul.f32 %v5886_v19, %v5675_v6  ;;  %v9288_v6 = vld [vmem:[#allocation54_spill] sm:$0xff] }
 0x209   :  { %v6745_v56 = vmul.f32 %v3717_v58, %v1693_v30  ;;  %v1958_v58 = vld [vmem:[%s8523_s2 + $0x58] sm:$0xff]  ;;  %v9283_v30 = vld [vmem:[#allocation46_spill] sm:$0xff]  ;;  %v2052_v19 = vmul.f32 %v5913_v27, %v9288_v6  ;;  %v9290_v27 = vld [vmem:[#allocation56_spill] sm:$0xff] }
 0x20a   :  { %v6720_v3 = vpop.permute.xlu1 %2281  ;;  %2591 = vperm.xlu1 %3549, %v6715_v5   ;;  %v2126_v20 = vsub.f32 %v1958_v58, %v2042_v1  ;;  %v1962_v58 = vld [vmem:[%s8523_s2 + $0x78] sm:$0xff]  ;;  %v9293_v6 = vld [vmem:[#allocation76_spill] sm:$0xff] }
 0x20b   :  { %9277 = vst [vmem:[#allocation131_spill] sm:$0xff] %v6720_v3  ;;  %v6725_v41 = vpop.permute.xlu0 %2336 }
 0x20c   :  { %9278 = vst [vmem:[#allocation132_spill] sm:$0xff] %v6725_v41  ;;  %2814 = vperm.xlu0 %3548, %v2120_v36   ;;  %v9281_v36 = vld [vmem:[#allocation47_spill] sm:$0xff] }
 0x20d   :  { %v2031_v41 = vmul.f32 %v5733_v44, %v9281_v36  ;;  %v1949_v36 = vld [vmem:[%s8523_s2 + $0x10] sm:$0xff] }
 0x20e   :  { %v6735_v3 = vpop.permute.xlu1 %2291  ;;  %2601 = vperm.xlu1 %3549, %v6730_v39  }
 0x20f   :  { %9279 = vst [vmem:[#allocation133_spill] sm:$0xff] %v6735_v3  ;;  %v6740_v11 = vpop.permute.xlu0 %2346  ;;  %v1947_v3 = vld [vmem:[%s8523_s2] sm:$0xff] }
 0x210   :  { %2824 = vperm.xlu0 %3548, %v2122_v63   ;;  %v2115_v44 = vsub.f32 %v1947_v3, %v2031_v41  ;;  %v2033_v63 = vmul.f32 %v5720_v59, %v9283_v30  ;;  %v1960_v3 = vld [vmem:[%s8523_s2 + $0x68] sm:$0xff]  ;;  %v2035_v59 = vmul.f32 %v5775_v47, %v5607_v51  ;;  %v9284_v51 = vld [vmem:[#allocation49_spill] sm:$0xff]  ;;  %v1953_v30 = vld [vmem:[%s8523_s2 + $0x30] sm:$0xff] }
 0x211   :  { %v2128_v1 = vsub.f32 %v1960_v3, %v2044_v17  ;;  %v2037_v47 = vmul.f32 %v5827_v49, %v9284_v51  ;;  %v1964_v17 = vld [vmem:[%s8523_s2 + $0x88] sm:$0xff] }
 0x212   :  { %v6752_v29 = vpop.permute.xlu1 %2301  ;;  %2611 = vperm.xlu1 %3549, %v6745_v56   ;;  %v2117_v41 = vsub.f32 %v1949_v36, %v2033_v63  ;;  %v2130_v36 = vsub.f32 %v1962_v58, %v2046_v37  ;;  %v9286_v49 = vld [vmem:[#allocation51_spill] sm:$0xff]  ;;  %v1966_v58 = vld [vmem:[%s8523_s2 + $0x98] sm:$0xff] }
 0x213   :  { %9282 = vst [vmem:[#allocation48_spill] sm:$0xff] %v6752_v29  ;;  %v6757_v45 = vpop.permute.xlu0 %2356  ;;  %v2121_v3 = vsub.f32 %v1953_v30, %v2037_v47  ;;  %v1957_v47 = vld [vmem:[%s8523_s2 + $0x50] sm:$0xff] }
 0x214   :  { %2834 = vperm.xlu0 %3548, %v2124_v60  }
 0x216   :  { %v6767_v29 = vpop.permute.xlu1 %2311  ;;  %2789 = vperm.xlu1 %3549, %v2115_v44   ;;  %v2119_v44 = vsub.f32 %v1951_v9, %v2035_v59  ;;  %v1955_v59 = vld [vmem:[%s8523_s2 + $0x40] sm:$0xff] }
 0x217   :  { %v6771_v53 = vpop.permute.xlu0 %2366 }
 0x218   :  { %2844 = vperm.xlu0 %3548, %v2126_v20  }
 0x21a   :  { %v6781_v60 = vpop.permute.xlu1 %2321  ;;  %2799 = vperm.xlu1 %3549, %v2117_v41   ;;  %v2039_v41 = vmul.f32 %v5878_v48, %v9286_v49  ;;  %v9287_v48 = vld [vmem:[#allocation52_spill] sm:$0xff]  ;;  %v1959_v49 = vld [vmem:[%s8523_s2 + $0x60] sm:$0xff] }
 0x21b   :  { %v6785_v61 = vpop.permute.xlu0 %2376  ;;  %v2041_v51 = vmul.f32 %v5904_v55, %v9287_v48  ;;  %v9289_v55 = vld [vmem:[#allocation53_spill] sm:$0xff] }
 0x21c   :  { %2854 = vperm.xlu0 %3548, %v2128_v1   ;;  %v2132_v1 = vsub.f32 %v1964_v17, %v2048_v38  ;;  %v1968_v38 = vld [vmem:[%s8523_s2 + $0xa8] sm:$0xff] }
 0x21d   :  { %v2125_v17 = vsub.f32 %v1957_v47, %v2041_v51  ;;  %v1961_v51 = vld [vmem:[%s8523_s2 + $0x70] sm:$0xff] }
 0x21e   :  { %v6795_v63 = vpop.permute.xlu1 %2331  ;;  %2809 = vperm.xlu1 %3549, %v2119_v44   ;;  %v2123_v44 = vsub.f32 %v1955_v59, %v2039_v41  ;;  %v2136_v59 = vsub.f32 %v1968_v38, %v2052_v19 }
 0x21f   :  { %v6799_v20 = vpop.permute.xlu0 %2386 }
 0x220   :  { %2864 = vperm.xlu0 %3548, %v2130_v36   ;;  %v2134_v36 = vsub.f32 %v1966_v58, %v2050_v7  ;;  %v1970_v58 = vld [vmem:[%s8523_s2 + $0xb8] sm:$0xff] }
 0x222   :  { %v6809_v9 = vpop.permute.xlu1 %2341  ;;  %2819 = vperm.xlu1 %3549, %v2121_v3   ;;  %v2043_v3 = vmul.f32 %v5931_v23, %v9289_v55  ;;  %v9291_v23 = vld [vmem:[#allocation55_spill] sm:$0xff] }
 0x223   :  { %v6813_v37 = vpop.permute.xlu0 %2396  ;;  %v2045_v48 = vmul.f32 %v5957_v8, %v9291_v23  ;;  %v9294_v8 = vld [vmem:[#allocation57_spill] sm:$0xff] }
 0x224   :  { %2874 = vperm.xlu0 %3548, %v2132_v1   ;;  %v2054_v1 = vmul.f32 %v5938_v33, %v9290_v27  ;;  %v9292_v33 = vld [vmem:[#allocation58_spill] sm:$0xff] }
 0x225   :  { %v2056_v19 = vmul.f32 %v9293_v6, %v9292_v33  ;;  %v2129_v55 = vsub.f32 %v1961_v51, %v2045_v48  ;;  %v1974_v48 = vld [vmem:[%s8523_s2 + $0xd8] sm:$0xff]  ;;  %v9301_v6 = vld [vmem:[#allocation82_spill] sm:$0xff] }
 0x226   :  { %v6823_v30 = vpop.permute.xlu1 %2351  ;;  %2829 = vperm.xlu1 %3549, %v2123_v44   ;;  %v2127_v44 = vsub.f32 %v1959_v49, %v2043_v3  ;;  %v9295_v3 = vld [vmem:[#allocation78_spill] sm:$0xff] }
 0x227   :  { %v6827_v24 = vpop.permute.xlu0 %2406  ;;  %v2047_v49 = vmul.f32 %v9295_v3, %v9294_v8  ;;  %v1965_v3 = vld [vmem:[%s8523_s2 + $0x90] sm:$0xff] }
 0x228   :  { %2884 = vperm.xlu0 %3548, %v2134_v36   ;;  %v2138_v36 = vsub.f32 %v1970_v58, %v2054_v1  ;;  %v9297_v58 = vld [vmem:[#allocation60_spill] sm:$0xff] }
 0x22a   :  { %v6837_v41 = vpop.permute.xlu1 %2361  ;;  %2839 = vperm.xlu1 %3549, %v2125_v17   ;;  %v1972_v17 = vld [vmem:[%s8523_s2 + $0xc8] sm:$0xff] }
 0x22b   :  { %v6841_v7 = vpop.permute.xlu0 %2416  ;;  %v2140_v1 = vsub.f32 %v1972_v17, %v2056_v19  ;;  %v9303_v17 = vld [vmem:[#allocation62_spill] sm:$0xff] }
 0x22c   :  { %2894 = vperm.xlu0 %3548, %v2136_v59   ;;  %v1963_v59 = vld [vmem:[%s8523_s2 + $0x80] sm:$0xff] }
 0x22d   :  { %v2131_v51 = vsub.f32 %v1963_v59, %v2047_v49  ;;  %v1976_v49 = vld [vmem:[%s8523_s2 + $0xe8] sm:$0xff] }
 0x22e   :  { %v6851_v47 = vpop.permute.xlu1 %2371  ;;  %2849 = vperm.xlu1 %3549, %v2127_v44   ;;  %v9298_v44 = vld [vmem:[#allocation80_spill] sm:$0xff] }
 0x22f   :  { %v6855_v38 = vpop.permute.xlu0 %2426  ;;  %v2058_v23 = vmul.f32 %v9298_v44, %v9297_v58  ;;  %v9304_v58 = vld [vmem:[#allocation84_spill] sm:$0xff] }
 0x230   :  { %2904 = vperm.xlu0 %3548, %v2138_v36   ;;  %v9300_v36 = vld [vmem:[#allocation59_spill] sm:$0xff]  ;;  %v2060_v44 = vmul.f32 %v9304_v58, %v9303_v17  ;;  %v9310_v17 = vld [vmem:[#allocation88_spill] sm:$0xff] }
 0x231   :  { %v2049_v8 = vmul.f32 %v9301_v6, %v9300_v36  ;;  %v2142_v19 = vsub.f32 %v1974_v48, %v2058_v23  ;;  %v9307_v36 = vld [vmem:[#allocation86_spill] sm:$0xff]  ;;  %v9309_v48 = vld [vmem:[#allocation65_spill] sm:$0xff] }
 0x232   :  { %v6865_v27 = vpop.permute.xlu1 %2381  ;;  %2859 = vperm.xlu1 %3549, %v2129_v55   ;;  %v2144_v23 = vsub.f32 %v1976_v49, %v2060_v44  ;;  %v2062_v58 = vmul.f32 %v9310_v17, %v9309_v48  ;;  %v9315_v49 = vld [vmem:[#allocation66_spill] sm:$0xff]  ;;  %v9316_v48 = vld [vmem:[#allocation92_spill] sm:$0xff] }
 0x233   :  { %9296 = vst [vmem:[#allocation47_spill] sm:$0xff] %v6865_v27  ;;  %v6869_v33 = vpop.permute.xlu0 %2436  ;;  %v2133_v59 = vsub.f32 %v1965_v3, %v2049_v8  ;;  %v1978_v8 = vld [vmem:[%s8523_s2 + $0xf8] sm:$0xff]  ;;  %v2064_v17 = vmul.f32 %v9316_v48, %v9315_v49 }
 0x234   :  { %9299 = vst [vmem:[#allocation46_spill] sm:$0xff] %v6869_v33  ;;  %2914 = vperm.xlu0 %3548, %v2140_v1   ;;  %v9306_v1 = vld [vmem:[#allocation61_spill] sm:$0xff]  ;;  %v2146_v44 = vsub.f32 %v1978_v8, %v2062_v58  ;;  %v9321_v8 = vld [vmem:[#allocation68_spill] sm:$0xff] }
 0x235   :  { %v2051_v6 = vmul.f32 %v9307_v36, %v9306_v1  ;;  %v9313_v1 = vld [vmem:[#allocation90_spill] sm:$0xff]  ;;  %v9322_v49 = vld [vmem:[#allocation97_spill] sm:$0xff] }
 0x236   :  { %v6879_v55 = vpop.permute.xlu1 %2391  ;;  %2869 = vperm.xlu1 %3549, %v2131_v51   ;;  %v2066_v48 = vmul.f32 %v9322_v49, %v9321_v8  ;;  %v9328_v8 = vld [vmem:[#allocation102_spill] sm:$0xff] }
 0x237   :  { %9302 = vst [vmem:[#allocation49_spill] sm:$0xff] %v6879_v55  ;;  %v6883_v33 = vpop.permute.xlu0 %2446  ;;  %v1967_v55 = vld [vmem:[%s8523_s2 + $0xa0] sm:$0xff] }
 0x238   :  { %9305 = vst [vmem:[#allocation50_spill] sm:$0xff] %v6883_v33  ;;  %2924 = vperm.xlu0 %3548, %v2142_v19   ;;  %v2135_v3 = vsub.f32 %v1967_v55, %v2051_v6  ;;  %v9312_v19 = vld [vmem:[#allocation63_spill] sm:$0xff] }
 0x239   :  { %v2053_v36 = vmul.f32 %v9313_v1, %v9312_v19  ;;  %v1980_v55 = vld [vmem:[%s8523_s2 + $0x108] sm:$0xff]  ;;  %v9319_v19 = vld [vmem:[#allocation94_spill] sm:$0xff] }
 0x23a   :  { %v6893_v51 = vpop.permute.xlu1 %2401  ;;  %2879 = vperm.xlu1 %3549, %v2133_v59   ;;  %v2148_v58 = vsub.f32 %v1980_v55, %v2064_v17  ;;  %v9327_v55 = vld [vmem:[#allocation70_spill] sm:$0xff] }
 0x23b   :  { %9308 = vst [vmem:[#allocation51_spill] sm:$0xff] %v6893_v51  ;;  %v6897_v33 = vpop.permute.xlu0 %2456  ;;  %v1969_v51 = vld [vmem:[%s8523_s2 + $0xb0] sm:$0xff]  ;;  %v2068_v49 = vmul.f32 %v9328_v8, %v9327_v55 }
 0x23c   :  { %9311 = vst [vmem:[#allocation52_spill] sm:$0xff] %v6897_v33  ;;  %2934 = vperm.xlu0 %3548, %v2144_v23   ;;  %v2137_v6 = vsub.f32 %v1969_v51, %v2053_v36  ;;  %v9318_v23 = vld [vmem:[#allocation64_spill] sm:$0xff]  ;;  %v1982_v51 = vld [vmem:[%s8523_s2 + $0x118] sm:$0xff] }
 0x23d   :  { %v2055_v1 = vmul.f32 %v9319_v19, %v9318_v23  ;;  %v9325_v23 = vld [vmem:[#allocation100_spill] sm:$0xff]  ;;  %v2150_v17 = vsub.f32 %v1982_v51, %v2066_v48 }
 0x23e   :  { %v6907_v59 = vpop.permute.xlu1 %2411  ;;  %2889 = vperm.xlu1 %3549, %v2135_v3   ;;  %v9333_v51 = vld [vmem:[#allocation72_spill] sm:$0xff] }
 0x23f   :  { %9314 = vst [vmem:[#allocation54_spill] sm:$0xff] %v6907_v59  ;;  %v6911_v33 = vpop.permute.xlu0 %2466  ;;  %v1971_v59 = vld [vmem:[%s8523_s2 + $0xc0] sm:$0xff]  ;;  %v9334_v55 = vld [vmem:[#allocation108_spill] sm:$0xff] }
 0x240   :  { %9317 = vst [vmem:[#allocation53_spill] sm:$0xff] %v6911_v33  ;;  %2944 = vperm.xlu0 %3548, %v2146_v44   ;;  %v2139_v36 = vsub.f32 %v1971_v59, %v2055_v1  ;;  %v9324_v44 = vld [vmem:[#allocation67_spill] sm:$0xff]  ;;  %v2070_v8 = vmul.f32 %v9334_v55, %v9333_v51  ;;  %v9340_v51 = vld [vmem:[#allocation114_spill] sm:$0xff] }
 0x241   :  { %v2057_v19 = vmul.f32 %v9325_v23, %v9324_v44  ;;  %v1984_v59 = vld [vmem:[%s8523_s2 + $0x128] sm:$0xff]  ;;  %v9331_v44 = vld [vmem:[#allocation104_spill] sm:$0xff] }
 0x242   :  { %v6921_v3 = vpop.permute.xlu1 %2421  ;;  %2899 = vperm.xlu1 %3549, %v2137_v6   ;;  %v2152_v48 = vsub.f32 %v1984_v59, %v2068_v49  ;;  %v9339_v59 = vld [vmem:[#allocation74_spill] sm:$0xff] }
 0x243   :  { %9320 = vst [vmem:[#allocation56_spill] sm:$0xff] %v6921_v3  ;;  %v6925_v33 = vpop.permute.xlu0 %2476  ;;  %v1973_v3 = vld [vmem:[%s8523_s2 + $0xd0] sm:$0xff]  ;;  %v2072_v55 = vmul.f32 %v9340_v51, %v9339_v59  ;;  %v9346_v59 = vld [vmem:[#allocation99_spill] sm:$0xff] }
 0x244   :  { %9323 = vst [vmem:[#allocation55_spill] sm:$0xff] %v6925_v33  ;;  %2954 = vperm.xlu0 %3548, %v2148_v58   ;;  %v2141_v1 = vsub.f32 %v1973_v3, %v2057_v19  ;;  %v9330_v58 = vld [vmem:[#allocation69_spill] sm:$0xff] }
 0x245   :  { %v2059_v23 = vmul.f32 %v9331_v44, %v9330_v58  ;;  %v1986_v3 = vld [vmem:[%s8523_s2 + $0x138] sm:$0xff]  ;;  %v9337_v58 = vld [vmem:[#allocation110_spill] sm:$0xff] }
 0x246   :  { %v6935_v6 = vpop.permute.xlu1 %2431  ;;  %2909 = vperm.xlu1 %3549, %v2139_v36   ;;  %v2154_v49 = vsub.f32 %v1986_v3, %v2070_v8  ;;  %v9345_v3 = vld [vmem:[#allocation77_spill] sm:$0xff] }
 0x247   :  { %9326 = vst [vmem:[#allocation58_spill] sm:$0xff] %v6935_v6  ;;  %v6939_v33 = vpop.permute.xlu0 %2486  ;;  %v1975_v6 = vld [vmem:[%s8523_s2 + $0xe0] sm:$0xff]  ;;  %v2074_v51 = vmul.f32 %v9346_v59, %v9345_v3 }
 0x248   :  { %9329 = vst [vmem:[#allocation76_spill] sm:$0xff] %v6939_v33  ;;  %2964 = vperm.xlu0 %3548, %v2150_v17   ;;  %v2143_v19 = vsub.f32 %v1975_v6, %v2059_v23  ;;  %v9336_v17 = vld [vmem:[#allocation71_spill] sm:$0xff]  ;;  %v9352_v3 = vld [vmem:[#allocation122_spill] sm:$0xff] }
 0x249   :  { %v2061_v44 = vmul.f32 %v9337_v58, %v9336_v17  ;;  %v1988_v6 = vld [vmem:[%s8523_s2 + $0x148] sm:$0xff] }
 0x24a   :  { %v6949_v36 = vpop.permute.xlu1 %2441  ;;  %2919 = vperm.xlu1 %3549, %v2141_v1   ;;  %v9343_v17 = vld [vmem:[#allocation115_spill] sm:$0xff]  ;;  %v2156_v8 = vsub.f32 %v1988_v6, %v2072_v55  ;;  %v9351_v6 = vld [vmem:[#allocation81_spill] sm:$0xff] }
 0x24b   :  { %9332 = vst [vmem:[#allocation57_spill] sm:$0xff] %v6949_v36  ;;  %v6953_v33 = vpop.permute.xlu0 %2496  ;;  %v1977_v36 = vld [vmem:[%s8523_s2 + $0xf0] sm:$0xff]  ;;  %v2076_v59 = vmul.f32 %v9352_v3, %v9351_v6  ;;  %v9358_v6 = vld [vmem:[#allocation113_spill] sm:$0xff] }
 0x24c   :  { %9335 = vst [vmem:[#allocation78_spill] sm:$0xff] %v6953_v33  ;;  %2974 = vperm.xlu0 %3548, %v2152_v48   ;;  %v2145_v23 = vsub.f32 %v1977_v36, %v2061_v44  ;;  %v9342_v48 = vld [vmem:[#allocation73_spill] sm:$0xff] }
 0x24d   :  { %v2063_v58 = vmul.f32 %v9343_v17, %v9342_v48  ;;  %v1990_v36 = vld [vmem:[%s8523_s2 + $0x158] sm:$0xff]  ;;  %v9349_v48 = vld [vmem:[#allocation120_spill] sm:$0xff] }
 0x24e   :  { %v6963_v1 = vpop.permute.xlu1 %2451  ;;  %2929 = vperm.xlu1 %3549, %v2143_v19   ;;  %v2158_v55 = vsub.f32 %v1990_v36, %v2074_v51  ;;  %v9357_v36 = vld [vmem:[#allocation85_spill] sm:$0xff] }
 0x24f   :  { %9338 = vst [vmem:[#allocation60_spill] sm:$0xff] %v6963_v1  ;;  %v6967_v33 = vpop.permute.xlu0 %2506  ;;  %v1979_v1 = vld [vmem:[%s8523_s2 + $0x100] sm:$0xff]  ;;  %v2078_v3 = vmul.f32 %v9358_v6, %v9357_v36  ;;  %v9364_v36 = vld [vmem:[#allocation117_spill] sm:$0xff] }
 0x250   :  { %9341 = vst [vmem:[#allocation80_spill] sm:$0xff] %v6967_v33  ;;  %2984 = vperm.xlu0 %3548, %v2154_v49   ;;  %v2147_v44 = vsub.f32 %v1979_v1, %v2063_v58  ;;  %v9348_v49 = vld [vmem:[#allocation75_spill] sm:$0xff] }
 0x251   :  { %v2065_v17 = vmul.f32 %v9349_v48, %v9348_v49  ;;  %v1992_v1 = vld [vmem:[%s8523_s2 + $0x168] sm:$0xff]  ;;  %v9355_v49 = vld [vmem:[#allocation105_spill] sm:$0xff] }
 0x252   :  { %v6977_v19 = vpop.permute.xlu1 %2461  ;;  %2939 = vperm.xlu1 %3549, %v2145_v23   ;;  %v2160_v51 = vsub.f32 %v1992_v1, %v2076_v59  ;;  %v9363_v1 = vld [vmem:[#allocation89_spill] sm:$0xff] }
 0x253   :  { %9344 = vst [vmem:[#allocation59_spill] sm:$0xff] %v6977_v19  ;;  %v6981_v33 = vpop.permute.xlu0 %2516  ;;  %v1981_v19 = vld [vmem:[%s8523_s2 + $0x110] sm:$0xff]  ;;  %v2080_v6 = vmul.f32 %v9364_v36, %v9363_v1  ;;  %v9370_v1 = vld [vmem:[#allocation2_spill] sm:$0xff] }
 0x254   :  { %9347 = vst [vmem:[#allocation82_spill] sm:$0xff] %v6981_v33  ;;  %2994 = vperm.xlu0 %3548, %v2156_v8   ;;  %v2149_v58 = vsub.f32 %v1981_v19, %v2065_v17  ;;  %v9354_v8 = vld [vmem:[#allocation79_spill] sm:$0xff]  ;;  %v1994_v19 = vld [vmem:[%s8523_s2 + $0x178] sm:$0xff] }
 0x255   :  { %v2067_v48 = vmul.f32 %v9355_v49, %v9354_v8  ;;  %v9361_v8 = vld [vmem:[#allocation111_spill] sm:$0xff]  ;;  %v2162_v59 = vsub.f32 %v1994_v19, %v2078_v3  ;;  %v9369_v19 = vld [vmem:[#allocation93_spill] sm:$0xff] }
 0x256   :  { %v6991_v23 = vpop.permute.xlu1 %2471  ;;  %2949 = vperm.xlu1 %3549, %v2147_v44   ;;  %v2082_v36 = vmul.f32 %v9370_v1, %v9369_v19  ;;  %v9376_v19 = vld [vmem:[#allocation4_spill] sm:$0xff] }
 0x257   :  { %9350 = vst [vmem:[#allocation62_spill] sm:$0xff] %v6991_v23  ;;  %v6995_v33 = vpop.permute.xlu0 %2526  ;;  %v1983_v23 = vld [vmem:[%s8523_s2 + $0x120] sm:$0xff] }
 0x258   :  { %9353 = vst [vmem:[#allocation84_spill] sm:$0xff] %v6995_v33  ;;  %3004 = vperm.xlu0 %3548, %v2158_v55   ;;  %v2151_v17 = vsub.f32 %v1983_v23, %v2067_v48  ;;  %v9360_v55 = vld [vmem:[#allocation83_spill] sm:$0xff] }
 0x259   :  { %v2069_v49 = vmul.f32 %v9361_v8, %v9360_v55  ;;  %v1996_v23 = vld [vmem:[%s8523_s2 + $0x188] sm:$0xff]  ;;  %v9367_v55 = vld [vmem:[#allocation126_spill] sm:$0xff] }
 0x25a   :  { %v7005_v44 = vpop.permute.xlu1 %2481  ;;  %2959 = vperm.xlu1 %3549, %v2149_v58   ;;  %v2164_v3 = vsub.f32 %v1996_v23, %v2080_v6  ;;  %v9375_v23 = vld [vmem:[#allocation98_spill] sm:$0xff] }
 0x25b   :  { %9356 = vst [vmem:[#allocation61_spill] sm:$0xff] %v7005_v44  ;;  %v7009_v33 = vpop.permute.xlu0 %2536  ;;  %v1985_v44 = vld [vmem:[%s8523_s2 + $0x130] sm:$0xff]  ;;  %v2084_v1 = vmul.f32 %v9376_v19, %v9375_v23  ;;  %v9382_v23 = vld [vmem:[#allocation13_spill] sm:$0xff] }
 0x25c   :  { %9359 = vst [vmem:[#allocation86_spill] sm:$0xff] %v7009_v33  ;;  %3014 = vperm.xlu0 %3548, %v2160_v51   ;;  %v2153_v48 = vsub.f32 %v1985_v44, %v2069_v49  ;;  %v9366_v51 = vld [vmem:[#allocation87_spill] sm:$0xff]  ;;  %v1998_v44 = vld [vmem:[%s8523_s2 + $0x198] sm:$0xff] }
 0x25d   :  { %v2071_v8 = vmul.f32 %v9367_v55, %v9366_v51  ;;  %v9373_v51 = vld [vmem:[#allocation3_spill] sm:$0xff]  ;;  %v2166_v6 = vsub.f32 %v1998_v44, %v2082_v36 }
 0x25e   :  { %v7019_v58 = vpop.permute.xlu1 %2491  ;;  %2969 = vperm.xlu1 %3549, %v2151_v17   ;;  %v9381_v44 = vld [vmem:[#allocation103_spill] sm:$0xff] }
 0x25f   :  { %9362 = vst [vmem:[#allocation65_spill] sm:$0xff] %v7019_v58  ;;  %v7023_v33 = vpop.permute.xlu0 %2546  ;;  %v1987_v58 = vld [vmem:[%s8523_s2 + $0x140] sm:$0xff]  ;;  %v2086_v19 = vmul.f32 %v9382_v23, %v9381_v44 }
 0x260   :  { %9365 = vst [vmem:[#allocation88_spill] sm:$0xff] %v7023_v33  ;;  %3024 = vperm.xlu0 %3548, %v2162_v59   ;;  %v2155_v49 = vsub.f32 %v1987_v58, %v2071_v8  ;;  %v9372_v59 = vld [vmem:[#allocation91_spill] sm:$0xff] }
 0x261   :  { %v2073_v55 = vmul.f32 %v9373_v51, %v9372_v59  ;;  %v2000_v58 = vld [vmem:[%s8523_s2 + $0x1a8] sm:$0xff]  ;;  %v9379_v59 = vld [vmem:[#allocation6_spill] sm:$0xff] }
 0x262   :  { %v7033_v17 = vpop.permute.xlu1 %2501  ;;  %2979 = vperm.xlu1 %3549, %v2153_v48   ;;  %v2168_v36 = vsub.f32 %v2000_v58, %v2084_v1  ;;  %v9386_v58 = vld [vmem:[#allocation109_spill] sm:$0xff] }
 0x263   :  { %9368 = vst [vmem:[#allocation63_spill] sm:$0xff] %v7033_v17  ;;  %v7037_v33 = vpop.permute.xlu0 %2556  ;;  %v1989_v17 = vld [vmem:[%s8523_s2 + $0x150] sm:$0xff]  ;;  %v2088_v44 = vmul.f32 %v6399_v12, %v9386_v58 }
 0x264   :  { %9371 = vst [vmem:[#allocation90_spill] sm:$0xff] %v7037_v33  ;;  %3034 = vperm.xlu0 %3548, %v2164_v3   ;;  %v2157_v8 = vsub.f32 %v1989_v17, %v2073_v55  ;;  %v9378_v3 = vld [vmem:[#allocation95_spill] sm:$0xff]  ;;  %v2002_v17 = vld [vmem:[%s8523_s2 + $0x1b8] sm:$0xff]  ;;  %v9391_v12 = vld [vmem:[#allocation112_spill] sm:$0xff] }
 0x265   :  { %v2075_v51 = vmul.f32 %v9379_v59, %v9378_v3  ;;  %v1993_v59 = vld [vmem:[%s8523_s2 + $0x170] sm:$0xff]  ;;  %v2170_v1 = vsub.f32 %v2002_v17, %v2086_v19  ;;  %v9392_v17 = vld [vmem:[#allocation14_spill] sm:$0xff] }
 0x266   :  { %v7047_v48 = vpop.permute.xlu1 %2511  ;;  %2989 = vperm.xlu1 %3549, %v2155_v49   ;;  %v2090_v58 = vmul.f32 %v9392_v17, %v9391_v12  ;;  %v9398_v12 = vld [vmem:[#allocation23_spill] sm:$0xff] }
 0x267   :  { %9374 = vst [vmem:[#allocation66_spill] sm:$0xff] %v7047_v48  ;;  %v7051_v33 = vpop.permute.xlu0 %2566  ;;  %v1991_v48 = vld [vmem:[%s8523_s2 + $0x160] sm:$0xff] }
 0x268   :  { %9377 = vst [vmem:[#allocation92_spill] sm:$0xff] %v7051_v33  ;;  %3044 = vperm.xlu0 %3548, %v2166_v6   ;;  %v2159_v55 = vsub.f32 %v1991_v48, %v2075_v51  ;;  %v9384_v6 = vld [vmem:[#allocation96_spill] sm:$0xff]  ;;  %v2004_v48 = vld [vmem:[%s8523_s2 + $0x1c8] sm:$0xff] }
 0x269   :  { %v2077_v3 = vmul.f32 %v6382_v13, %v9384_v6  ;;  %v9388_v13 = vld [vmem:[#allocation106_spill] sm:$0xff]  ;;  %v2172_v19 = vsub.f32 %v2004_v48, %v2088_v44 }
 0x26a   :  { %v7061_v49 = vpop.permute.xlu1 %2521  ;;  %2999 = vperm.xlu1 %3549, %v2157_v8   ;;  %v9397_v48 = vld [vmem:[#allocation118_spill] sm:$0xff] }
 0x26b   :  { %9380 = vst [vmem:[#allocation64_spill] sm:$0xff] %v7061_v49  ;;  %v7065_v33 = vpop.permute.xlu0 %2576  ;;  %v2161_v51 = vsub.f32 %v1993_v59, %v2077_v3  ;;  %v2006_v3 = vld [vmem:[%s8523_s2 + $0x1d8] sm:$0xff]  ;;  %v2092_v17 = vmul.f32 %v9398_v12, %v9397_v48  ;;  %v9404_v48 = vld [vmem:[#allocation22_spill] sm:$0xff]  ;;  %v9409_v49 = vld [vmem:[#allocation123_spill] sm:$0xff] }
 0x26c   :  { %9383 = vst [vmem:[#allocation94_spill] sm:$0xff] %v7065_v33  ;;  %3054 = vperm.xlu0 %3548, %v2168_v36   ;;  %v9389_v36 = vld [vmem:[#allocation19_spill] sm:$0xff]  ;;  %v2174_v44 = vsub.f32 %v2006_v3, %v2090_v58  ;;  %v9403_v3 = vld [vmem:[#allocation101_spill] sm:$0xff]  ;;  %v2087_v27 = vmul.f32 %v6505_v34, %v9409_v49 }
 0x26d   :  { %v2079_v6 = vmul.f32 %v9389_v36, %v9388_v13  ;;  %v9395_v13 = vld [vmem:[#allocation16_spill] sm:$0xff]  ;;  %v2094_v12 = vmul.f32 %v9404_v48, %v9403_v3  ;;  %v9408_v3 = vld [vmem:[#allocation125_spill] sm:$0xff] }
 0x26e   :  { %v7075_v8 = vpop.permute.xlu1 %2531  ;;  %3009 = vperm.xlu1 %3549, %v2159_v55   ;;  %v2096_v48 = vmul.f32 %v6489_v25, %v9408_v3  ;;  %v3726_v25 = vld [vmem:[%s8521_s0 + $0x30] sm:$0xff] }
 0x26f   :  { %9385 = vst [vmem:[#allocation68_spill] sm:$0xff] %v7075_v8  ;;  %v7079_v23 = vpop.permute.xlu0 %2586  ;;  %v1995_v8 = vld [vmem:[%s8523_s2 + $0x180] sm:$0xff] }
 0x270   :  { %9387 = vst [vmem:[#allocation97_spill] sm:$0xff] %v7079_v23  ;;  %3064 = vperm.xlu0 %3548, %v2170_v1   ;;  %v2163_v59 = vsub.f32 %v1995_v8, %v2079_v6  ;;  %v9394_v1 = vld [vmem:[#allocation107_spill] sm:$0xff] }
 0x271   :  { %v2081_v36 = vmul.f32 %v9395_v13, %v9394_v1  ;;  %v2008_v8 = vld [vmem:[%s8523_s2 + $0x1e8] sm:$0xff]  ;;  %v9401_v1 = vld [vmem:[#allocation25_spill] sm:$0xff] }
 0x272   :  { %v7089_v55 = vpop.permute.xlu1 %2541  ;;  %3019 = vperm.xlu1 %3549, %v2161_v51   ;;  %v2176_v58 = vsub.f32 %v2008_v8, %v2092_v17  ;;  %v3724_v17 = vld [vmem:[%s8521_s0 + $0x10] sm:$0xff] }
 0x273   :  { %9390 = vst [vmem:[#allocation67_spill] sm:$0xff] %v7089_v55  ;;  %v7093_v23 = vpop.permute.xlu0 %2596  ;;  %v1997_v55 = vld [vmem:[%s8523_s2 + $0x190] sm:$0xff]  ;;  %v2621_v8 = vmul.f32 %v3724_v17, %v6517_v21 }
 0x274   :  { %9393 = vst [vmem:[#allocation100_spill] sm:$0xff] %v7093_v23  ;;  %3074 = vperm.xlu0 %3548, %v2172_v19   ;;  %v2165_v6 = vsub.f32 %v1997_v55, %v2081_v36  ;;  %v9400_v19 = vld [vmem:[#allocation116_spill] sm:$0xff]  ;;  %v2010_v55 = vld [vmem:[%s8523_s2 + $0x1f8] sm:$0xff] }
 0x275   :  { %v2083_v13 = vmul.f32 %v9401_v1, %v9400_v19  ;;  %v9407_v19 = vld [vmem:[#allocation29_spill] sm:$0xff] }
 0x276   :  { %v7103_v51 = vpop.permute.xlu1 %2551  ;;  %3029 = vperm.xlu1 %3549, %v2163_v59  }
 0x277   :  { %9396 = vst [vmem:[#allocation70_spill] sm:$0xff] %v7103_v51  ;;  %v7107_v23 = vpop.permute.xlu0 %2606  ;;  %v1999_v51 = vld [vmem:[%s8523_s2 + $0x1a0] sm:$0xff] }
 0x278   :  { %9399 = vst [vmem:[#allocation102_spill] sm:$0xff] %v7107_v23  ;;  %3084 = vperm.xlu0 %3548, %v2174_v44   ;;  %v2167_v36 = vsub.f32 %v1999_v51, %v2083_v13  ;;  %v9406_v44 = vld [vmem:[#allocation121_spill] sm:$0xff]  ;;  %v2178_v13 = vsub.f32 %v2010_v55, %v2094_v12  ;;  %v2625_v12 = vmul.f32 %v3726_v25, %v6561_v42 }
 0x279   :  { %v2085_v1 = vmul.f32 %v9407_v19, %v9406_v44  ;;  %v2012_v19 = vld [vmem:[%s8523_s2 + $0x208] sm:$0xff]  ;;  %v3727_v55 = vld [vmem:[%s8521_s0 + $0x38] sm:$0xff] }
 0x27a   :  { %v7117_v59 = vpop.permute.xlu1 %2561  ;;  %3039 = vperm.xlu1 %3549, %v2165_v6   ;;  %v3725_v6 = vld [vmem:[%s8521_s0 + $0x18] sm:$0xff]  ;;  %v2180_v49 = vsub.f32 %v2012_v19, %v2096_v48 }
 0x27b   :  { %9402 = vst [vmem:[#allocation69_spill] sm:$0xff] %v7117_v59  ;;  %v7121_v23 = vpop.permute.xlu0 %2616  ;;  %v2001_v59 = vld [vmem:[%s8523_s2 + $0x1b0] sm:$0xff] }
 0x27c   :  { %9405 = vst [vmem:[#allocation104_spill] sm:$0xff] %v7121_v23  ;;  %3094 = vperm.xlu0 %3548, %v2176_v58   ;;  %v2622_v58 = vmul.f32 %v3725_v6, %v6517_v21  ;;  %v2169_v33 = vsub.f32 %v2001_v59, %v2085_v1  ;;  %v2003_v21 = vld [vmem:[%s8523_s2 + $0x1c0] sm:$0xff]  ;;  %v9410_v59 = vld [vmem:[#allocation124_spill] sm:$0xff] }
 0x27d   :  { %v2098_v1 = vmul.f32 %v6512_v10, %v9410_v59  ;;  %v3728_v10 = vld [vmem:[%s8521_s0 + $0x50] sm:$0xff] }
 0x27e   :  { %v7139_v51 = vpop.permute.xlu1 %2571  ;;  %3049 = vperm.xlu1 %3549, %v2167_v36   ;;  %v2626_v36 = vmul.f32 %v3727_v55, %v6561_v42  ;;  %v2014_v42 = vld [vmem:[%s8523_s2 + $0x218] sm:$0xff]  ;;  %v2629_v48 = vmul.f32 %v3728_v10, %v6605_v14 }
 0x27f   :  { %v2795_v44 = vpop.permute.xlu0 %2794 }
 0x280   :  { %v3209_v23 = vadd.f32 %v2795_v44, %v2621_v8  ;;  %v3210_v17 = vadd.f32 %v2795_v44, %v2622_v58  ;;  %3104 = vperm.xlu0 %3548, %v2178_v13   ;;  %v9411_v13 = vld [vmem:[#allocation119_spill] sm:$0xff]  ;;  %v3729_v44 = vld [vmem:[%s8521_s0 + $0x58] sm:$0xff] }
 0x281   :  { %v2089_v3 = vmul.f32 %v6529_v16, %v9411_v13  ;;  %v2630_v19 = vmul.f32 %v3729_v44, %v6605_v14  ;;  %v2016_v14 = vld [vmem:[%s8523_s2 + $0x228] sm:$0xff]  ;;  %v9415_v44 = vld [vmem:[#allocation9_spill] sm:$0xff] }
 0x282   :  { %3377 = vst [vmem:[%s8524_s3 + $0x10] sm:$0xff] %v3209_v23  ;;  %3378 = vst.msk [vmem:[%s8524_s3 + $0x18] sm:$0xff] %vm182_vm0, %v3210_v17  ;;  %v7166_v34 = vpop.permute.xlu1 %2581  ;;  %3059 = vperm.xlu1 %3549, %v2169_v33   ;;  %v2171_v23 = vsub.f32 %v2003_v21, %v2087_v27  ;;  %v2005_v33 = vld [vmem:[%s8523_s2 + $0x1d0] sm:$0xff]  ;;  %v2182_v27 = vsub.f32 %v2014_v42, %v2098_v1  ;;  %v9412_v17 = vld [vmem:[#allocation7_spill] sm:$0xff] }
 0x283   :  { %v2805_v8 = vpop.permute.xlu0 %2804  ;;  %v2100_v21 = vmul.f32 %v6536_v0, %v9412_v17  ;;  %v3730_v0 = vld [vmem:[%s8521_s0 + $0x70] sm:$0xff]  ;;  %v3731_v42 = vld [vmem:[%s8521_s0 + $0x78] sm:$0xff] }
 0x284   :  { %v3213_v6 = vadd.f32 %v2805_v8, %v2625_v12  ;;  %v3214_v58 = vadd.f32 %v2805_v8, %v2626_v36  ;;  %3114 = vperm.xlu0 %3548, %v2180_v49   ;;  %v2173_v36 = vsub.f32 %v2005_v33, %v2089_v3  ;;  %v9413_v49 = vld [vmem:[#allocation5_spill] sm:$0xff]  ;;  %v2007_v8 = vld [vmem:[%s8523_s2 + $0x1e0] sm:$0xff]  ;;  %v2633_v1 = vmul.f32 %v3730_v0, %v6640_v22 }
 0x285   :  { %v2091_v59 = vmul.f32 %v6551_v4, %v9413_v49  ;;  %v9416_v17 = vld [vmem:[#allocation37_spill] sm:$0xff] }
 0x286   :  { %3381 = vst [vmem:[%s8524_s3 + $0x30] sm:$0xff] %v3213_v6  ;;  %3382 = vst.msk [vmem:[%s8524_s3 + $0x38] sm:$0xff] %vm182_vm0, %v3214_v58  ;;  %v7193_v16 = vpop.permute.xlu1 %2591  ;;  %3069 = vperm.xlu1 %3549, %v2171_v23   ;;  %v2634_v6 = vmul.f32 %v3731_v42, %v6640_v22  ;;  %v2184_v58 = vsub.f32 %v2016_v14, %v2100_v21  ;;  %v9414_v23 = vld [vmem:[#allocation11_spill] sm:$0xff]  ;;  %v2018_v22 = vld [vmem:[%s8523_s2 + $0x238] sm:$0xff] }
 0x287   :  { %v2815_v25 = vpop.permute.xlu0 %2814  ;;  %v2102_v13 = vmul.f32 %v6564_v28, %v9414_v23  ;;  %v3732_v28 = vld [vmem:[%s8521_s0 + $0x90] sm:$0xff]  ;;  %v9419_v23 = vld [vmem:[#allocation30_spill] sm:$0xff] }
 0x288   :  { %v3217_v12 = vadd.f32 %v2815_v25, %v2629_v48  ;;  %v3218_v55 = vadd.f32 %v2815_v25, %v2630_v19  ;;  %3124 = vperm.xlu0 %3548, %v2182_v27   ;;  %v2175_v48 = vsub.f32 %v2007_v8, %v2091_v59  ;;  %v2093_v19 = vmul.f32 %v6568_v54, %v9415_v44  ;;  %v2009_v27 = vld [vmem:[%s8523_s2 + $0x1f0] sm:$0xff]  ;;  %v3733_v25 = vld [vmem:[%s8521_s0 + $0x98] sm:$0xff]  ;;  %v2020_v59 = vld [vmem:[%s8523_s2 + $0x248] sm:$0xff] }
 0x289   :  { %v2637_v21 = vmul.f32 %v3732_v28, %v9416_v17  ;;  %v2638_v14 = vmul.f32 %v3733_v25, %v9416_v17  ;;  %v9418_v42 = vld [vmem:[#allocation8_spill] sm:$0xff] }
 0x28a   :  { %3385 = vst [vmem:[%s8524_s3 + $0x50] sm:$0xff] %v3217_v12  ;;  %3386 = vst.msk [vmem:[%s8524_s3 + $0x58] sm:$0xff] %vm182_vm0, %v3218_v55  ;;  %v7220_v4 = vpop.permute.xlu1 %2601  ;;  %3079 = vperm.xlu1 %3549, %v2173_v36   ;;  %v2186_v12 = vsub.f32 %v2018_v22, %v2102_v13  ;;  %v9417_v55 = vld [vmem:[#allocation15_spill] sm:$0xff]  ;;  %v2011_v22 = vld [vmem:[%s8523_s2 + $0x200] sm:$0xff] }
 0x28b   :  { %v2825_v3 = vpop.permute.xlu0 %2824  ;;  %v2104_v36 = vmul.f32 %v6586_v50, %v9417_v55  ;;  %v3735_v50 = vld [vmem:[%s8521_s0 + $0x8] sm:$0xff]  ;;  %v9421_v28 = vld [vmem:[#allocation12_spill] sm:$0xff] }
 0x28c   :  { %v3221_v33 = vadd.f32 %v2825_v3, %v2633_v1  ;;  %v3222_v10 = vadd.f32 %v2825_v3, %v2634_v6  ;;  %3134 = vperm.xlu0 %3548, %v2184_v58   ;;  %v2177_v1 = vsub.f32 %v2009_v27, %v2093_v19  ;;  %v2095_v6 = vmul.f32 %v6590_v31, %v9418_v42  ;;  %v3734_v58 = vld [vmem:[%s8521_s0] sm:$0xff]  ;;  %v3736_v31 = vld [vmem:[%s8521_s0 + $0xb0] sm:$0xff] }
 0x28d   :  { %v2619_v13 = vmul.f32 %v3734_v58, %v9419_v23  ;;  %v2620_v3 = vmul.f32 %v3735_v50, %v9419_v23  ;;  %v2188_v27 = vsub.f32 %v2020_v59, %v2104_v36  ;;  %v2106_v17 = vmul.f32 %v6608_v46, %v9421_v28  ;;  %v9422_v42 = vld [vmem:[#allocation10_spill] sm:$0xff]  ;;  %v9423_v59 = vld [vmem:[#allocation28_spill] sm:$0xff]  ;;  %v9424_v23 = vld [vmem:[#allocation43_spill] sm:$0xff] }
 0x28e   :  { %3389 = vst [vmem:[%s8524_s3 + $0x70] sm:$0xff] %v3221_v33  ;;  %3390 = vst.msk [vmem:[%s8524_s3 + $0x78] sm:$0xff] %vm182_vm0, %v3222_v10  ;;  %3089 = vperm.xlu1 %3549, %v2175_v48   ;;  %v7247_v54 = vpop.permute.xlu1 %2611  ;;  %v9420_v33 = vld [vmem:[#allocation41_spill] sm:$0xff]  ;;  %v3738_v36 = vld [vmem:[%s8521_s0 + $0x20] sm:$0xff] }
 0x28f   :  { %v2835_v49 = vpop.permute.xlu0 %2834  ;;  %v2641_v10 = vmul.f32 %v3736_v31, %v9420_v33  ;;  %v3737_v48 = vld [vmem:[%s8521_s0 + $0xb8] sm:$0xff]  ;;  %v2623_v46 = vmul.f32 %v3738_v36, %v9423_v59  ;;  %v3744_v36 = vld [vmem:[%s8521_s0 + $0xf0] sm:$0xff] }
 0x290   :  { %v3225_v8 = vadd.f32 %v2835_v49, %v2637_v21  ;;  %v3226_v0 = vadd.f32 %v2835_v49, %v2638_v14  ;;  %3144 = vperm.xlu0 %3548, %v2186_v12   ;;  %v2642_v44 = vmul.f32 %v3737_v48, %v9420_v33  ;;  %v2022_v12 = vld [vmem:[%s8523_s2 + $0x258] sm:$0xff] }
 0x291   :  { %v3741_v50 = vld [vmem:[%s8521_s0 + $0xd8] sm:$0xff]  ;;  %v2190_v31 = vsub.f32 %v2022_v12, %v2106_v17  ;;  %v3742_v17 = vld [vmem:[%s8521_s0 + $0x40] sm:$0xff]  ;;  %v9428_v12 = vld [vmem:[#allocation32_spill] sm:$0xff] }
 0x292   :  { %3393 = vst [vmem:[%s8524_s3 + $0x90] sm:$0xff] %v3225_v8  ;;  %3394 = vst.msk [vmem:[%s8524_s3 + $0x98] sm:$0xff] %vm182_vm0, %v3226_v0  ;;  %3099 = vperm.xlu1 %3549, %v2177_v1   ;;  %v2790_v19 = vpop.permute.xlu1 %2789  ;;  %v2179_v8 = vsub.f32 %v2011_v22, %v2095_v6  ;;  %v2097_v0 = vmul.f32 %v6612_v57, %v9422_v42  ;;  %v3739_v1 = vld [vmem:[%s8521_s0 + $0x28] sm:$0xff]  ;;  %v2013_v57 = vld [vmem:[%s8523_s2 + $0x210] sm:$0xff] }
 0x293   :  { %v3207_v21 = vadd.f32 %v2790_v19, %v2619_v13  ;;  %v3208_v25 = vadd.f32 %v2790_v19, %v2620_v3  ;;  %v2845_v14 = vpop.permute.xlu0 %2844  ;;  %v2624_v58 = vmul.f32 %v3739_v1, %v9423_v59  ;;  %v3740_v6 = vld [vmem:[%s8521_s0 + $0xd0] sm:$0xff]  ;;  %v2646_v3 = vmul.f32 %v3741_v50, %v9424_v23  ;;  %v9425_v33 = vld [vmem:[#allocation21_spill] sm:$0xff]  ;;  %v9429_v59 = vld [vmem:[#allocation38_spill] sm:$0xff] }
 0x294   :  { %v3229_v55 = vadd.f32 %v2845_v14, %v2641_v10  ;;  %v3230_v49 = vadd.f32 %v2845_v14, %v2642_v44  ;;  %3154 = vperm.xlu0 %3548, %v2188_v27   ;;  %v2645_v13 = vmul.f32 %v3740_v6, %v9424_v23  ;;  %v2108_v10 = vmul.f32 %v6627_v26, %v9425_v33  ;;  %v2024_v27 = vld [vmem:[%s8523_s2 + $0x268] sm:$0xff]  ;;  %v9426_v14 = vld [vmem:[#allocation17_spill] sm:$0xff]  ;;  %v9430_v23 = vld [vmem:[#allocation18_spill] sm:$0xff] }
 0x295   :  { %3375 = vst [vmem:[%s8524_s3] sm:$0xff] %v3207_v21  ;;  %3376 = vst.msk [vmem:[%s8524_s3 + $0x8] sm:$0xff] %vm182_vm0, %v3208_v25  ;;  %v2181_v25 = vsub.f32 %v2013_v57, %v2097_v0  ;;  %v2627_v26 = vmul.f32 %v3742_v17, %v9428_v12  ;;  %v2015_v0 = vld [vmem:[%s8523_s2 + $0x220] sm:$0xff]  ;;  %v3745_v1 = vld [vmem:[%s8521_s0 + $0xf8] sm:$0xff] }
 0x296   :  { %3397 = vst [vmem:[%s8524_s3 + $0xb0] sm:$0xff] %v3229_v55  ;;  %3398 = vst.msk [vmem:[%s8524_s3 + $0xb8] sm:$0xff] %vm182_vm0, %v3230_v49  ;;  %3109 = vperm.xlu1 %3549, %v2179_v8   ;;  %v2800_v22 = vpop.permute.xlu1 %2799  ;;  %v9427_v55 = vld [vmem:[#allocation40_spill] sm:$0xff]  ;;  %v3743_v8 = vld [vmem:[%s8521_s0 + $0x48] sm:$0xff]  ;;  %v2192_v6 = vsub.f32 %v2024_v27, %v2108_v10 }
 0x297   :  { %v3211_v48 = vadd.f32 %v2800_v22, %v2623_v46  ;;  %v3212_v44 = vadd.f32 %v2800_v22, %v2624_v58  ;;  %v2855_v19 = vpop.permute.xlu0 %2854  ;;  %v2099_v49 = vmul.f32 %v9427_v55, %v9426_v14  ;;  %v2628_v42 = vmul.f32 %v3743_v8, %v9428_v12  ;;  %v3746_v10 = vld [vmem:[%s8521_s0 + $0x60] sm:$0xff]  ;;  %v9433_v27 = vld [vmem:[#allocation36_spill] sm:$0xff] }
 0x298   :  { %v3233_v28 = vadd.f32 %v2855_v19, %v2645_v13  ;;  %v3234_v21 = vadd.f32 %v2855_v19, %v2646_v3  ;;  %3164 = vperm.xlu0 %3548, %v2190_v31   ;;  %v2649_v46 = vmul.f32 %v3744_v36, %v9429_v59  ;;  %v2650_v58 = vmul.f32 %v3745_v1, %v9429_v59  ;;  %v2026_v31 = vld [vmem:[%s8523_s2 + $0x278] sm:$0xff]  ;;  %v9431_v19 = vld [vmem:[#allocation20_spill] sm:$0xff]  ;;  %v9434_v17 = vld [vmem:[#allocation42_spill] sm:$0xff] }
 0x299   :  { %3379 = vst [vmem:[%s8524_s3 + $0x20] sm:$0xff] %v3211_v48  ;;  %3380 = vst.msk [vmem:[%s8524_s3 + $0x28] sm:$0xff] %vm182_vm0, %v3212_v44  ;;  %v2110_v13 = vmul.f32 %v6643_v43, %v9430_v23  ;;  %v2183_v44 = vsub.f32 %v2015_v0, %v2099_v49  ;;  %v2631_v43 = vmul.f32 %v3746_v10, %v9433_v27  ;;  %v2017_v55 = vld [vmem:[%s8523_s2 + $0x230] sm:$0xff]  ;;  %v9435_v36 = vld [vmem:[#allocation27_spill] sm:$0xff] }
 0x29a   :  { %3401 = vst [vmem:[%s8524_s3 + $0xd0] sm:$0xff] %v3233_v28  ;;  %3402 = vst.msk [vmem:[%s8524_s3 + $0xd8] sm:$0xff] %vm182_vm0, %v3234_v21  ;;  %3119 = vperm.xlu1 %3549, %v2181_v25   ;;  %v2810_v57 = vpop.permute.xlu1 %2809  ;;  %v9432_v28 = vld [vmem:[#allocation44_spill] sm:$0xff]  ;;  %v3747_v25 = vld [vmem:[%s8521_s0 + $0x68] sm:$0xff]  ;;  %v2112_v59 = vmul.f32 %v6659_v62, %v9435_v36 }
 0x29b   :  { %v3215_v50 = vadd.f32 %v2810_v57, %v2627_v26  ;;  %v3216_v3 = vadd.f32 %v2810_v57, %v2628_v42  ;;  %v2865_v22 = vpop.permute.xlu0 %2864  ;;  %v2101_v21 = vmul.f32 %v9432_v28, %v9431_v19  ;;  %v2632_v14 = vmul.f32 %v3747_v25, %v9433_v27  ;;  %v3748_v49 = vld [vmem:[%s8521_s0 + $0x110] sm:$0xff]  ;;  %v3749_v26 = vld [vmem:[%s8521_s0 + $0x118] sm:$0xff]  ;;  %v2028_v57 = vld [vmem:[%s8523_s2 + $0x288] sm:$0xff] }
 0x29c   :  { %v3237_v33 = vadd.f32 %v2865_v22, %v2649_v46  ;;  %v3238_v48 = vadd.f32 %v2865_v22, %v2650_v58  ;;  %3174 = vperm.xlu0 %3548, %v2192_v6   ;;  %v2653_v12 = vmul.f32 %v3748_v49, %v9434_v17  ;;  %v2654_v8 = vmul.f32 %v3749_v26, %v9434_v17  ;;  %v9438_v19 = vld [vmem:[#allocation128_spill] sm:$0xff]  ;;  %v9439_v25 = vld [vmem:[#allocation31_spill] sm:$0xff] }
 0x29d   :  { %3383 = vst [vmem:[%s8524_s3 + $0x40] sm:$0xff] %v3215_v50  ;;  %3384 = vst.msk [vmem:[%s8524_s3 + $0x48] sm:$0xff] %vm182_vm0, %v3216_v3  ;;  %v2194_v0 = vsub.f32 %v2026_v31, %v2110_v13  ;;  %v2185_v50 = vsub.f32 %v2017_v55, %v2101_v21  ;;  %v9436_v3 = vld [vmem:[#allocation24_spill] sm:$0xff]  ;;  %v3750_v13 = vld [vmem:[%s8521_s0 + $0x80] sm:$0xff] }
 0x29e   :  { %3405 = vst [vmem:[%s8524_s3 + $0xf0] sm:$0xff] %v3237_v33  ;;  %3406 = vst.msk [vmem:[%s8524_s3 + $0xf8] sm:$0xff] %vm182_vm0, %v3238_v48  ;;  %3129 = vperm.xlu1 %3549, %v2183_v44   ;;  %v2820_v42 = vpop.permute.xlu1 %2819  ;;  %v2103_v22 = vmul.f32 %v6667_v18, %v9436_v3  ;;  %v9437_v31 = vld [vmem:[#allocation127_spill] sm:$0xff]  ;;  %v2019_v18 = vld [vmem:[%s8523_s2 + $0x240] sm:$0xff] }
 0x29f   :  { %v3219_v46 = vadd.f32 %v2820_v42, %v2631_v43  ;;  %v3220_v1 = vadd.f32 %v2820_v42, %v2632_v14  ;;  %v2875_v58 = vpop.permute.xlu0 %2874  ;;  %v2635_v62 = vmul.f32 %v3750_v13, %v9437_v31  ;;  %v3751_v33 = vld [vmem:[%s8521_s0 + $0x88] sm:$0xff]  ;;  %v3752_v44 = vld [vmem:[%s8521_s0 + $0x130] sm:$0xff]  ;;  %v3753_v21 = vld [vmem:[%s8521_s0 + $0x138] sm:$0xff]  ;;  %v2196_v43 = vsub.f32 %v2028_v57, %v2112_v59 }
 0x2a0   :  { %v3241_v6 = vadd.f32 %v2875_v58, %v2653_v12  ;;  %v3242_v23 = vadd.f32 %v2875_v58, %v2654_v8  ;;  %3184 = vperm.xlu0 %3548, %v2194_v0   ;;  %v2636_v48 = vmul.f32 %v3751_v33, %v9437_v31  ;;  %v2657_v28 = vmul.f32 %v3752_v44, %v9438_v19  ;;  %v2030_v12 = vld [vmem:[%s8523_s2 + $0x298] sm:$0xff]  ;;  %v9440_v0 = vld [vmem:[#allocation26_spill] sm:$0xff]  ;;  %v3756_v58 = vld [vmem:[%s8521_s0 + $0x150] sm:$0xff] }
 0x2a1   :  { %3387 = vst [vmem:[%s8524_s3 + $0x60] sm:$0xff] %v3219_v46  ;;  %3388 = vst.msk [vmem:[%s8524_s3 + $0x68] sm:$0xff] %vm182_vm0, %v3220_v1  ;;  %v2658_v10 = vmul.f32 %v3753_v21, %v9438_v19  ;;  %v2114_v14 = vmul.f32 %v6675_v52, %v9439_v25  ;;  %v2187_v42 = vsub.f32 %v2019_v18, %v2103_v22  ;;  %v3754_v59 = vld [vmem:[%s8521_s0 + $0xa0] sm:$0xff]  ;;  %v3755_v46 = vld [vmem:[%s8521_s0 + $0xa8] sm:$0xff] }
 0x2a2   :  { %3409 = vst [vmem:[%s8524_s3 + $0x110] sm:$0xff] %v3241_v6  ;;  %3410 = vst.msk [vmem:[%s8524_s3 + $0x118] sm:$0xff] %vm182_vm0, %v3242_v23  ;;  %3139 = vperm.xlu1 %3549, %v2185_v50   ;;  %v2830_v27 = vpop.permute.xlu1 %2829  ;;  %v2105_v36 = vmul.f32 %v6685_v2, %v9440_v0  ;;  %v2639_v52 = vmul.f32 %v3754_v59, %v6672_v32  ;;  %v2640_v1 = vmul.f32 %v3755_v46, %v6672_v32  ;;  %v2021_v2 = vld [vmem:[%s8523_s2 + $0x250] sm:$0xff]  ;;  %v9441_v57 = vld [vmem:[#allocation45_spill] sm:$0xff] }
 0x2a3   :  { %v3223_v55 = vadd.f32 %v2830_v27, %v2635_v62  ;;  %v3224_v49 = vadd.f32 %v2830_v27, %v2636_v48  ;;  %v2885_v17 = vpop.permute.xlu0 %2884  ;;  %v2661_v6 = vmul.f32 %v3756_v58, %v9441_v57  ;;  %v3757_v32 = vld [vmem:[%s8521_s0 + $0x158] sm:$0xff]  ;;  %v2198_v3 = vsub.f32 %v2030_v12, %v2114_v14  ;;  %v3758_v19 = vld [vmem:[%s8521_s0 + $0xc0] sm:$0xff]  ;;  %v3764_v58 = vld [vmem:[%s8521_s0 + $0x190] sm:$0xff] }
 0x2a4   :  { %v3245_v26 = vadd.f32 %v2885_v17, %v2657_v28  ;;  %v3246_v8 = vadd.f32 %v2885_v17, %v2658_v10  ;;  %3194 = vperm.xlu0 %3548, %v2196_v43   ;;  %v2662_v23 = vmul.f32 %v3757_v32, %v9441_v57  ;;  %v2189_v48 = vsub.f32 %v2021_v2, %v2105_v36  ;;  %v9442_v18 = vld [vmem:[#allocation33_spill] sm:$0xff]  ;;  %v3759_v10 = vld [vmem:[%s8521_s0 + $0xc8] sm:$0xff]  ;;  %v3760_v43 = vld [vmem:[%s8521_s0 + $0x170] sm:$0xff] }
 0x2a5   :  { %3391 = vst [vmem:[%s8524_s3 + $0x80] sm:$0xff] %v3223_v55  ;;  %3392 = vst.msk [vmem:[%s8524_s3 + $0x88] sm:$0xff] %vm182_vm0, %v3224_v49  ;;  %v2107_v44 = vmul.f32 %v6700_v35, %v9442_v18  ;;  %v9443_v28 = vld [vmem:[#allocation129_spill] sm:$0xff]  ;;  %v2023_v35 = vld [vmem:[%s8523_s2 + $0x260] sm:$0xff]  ;;  %v2665_v25 = vmul.f32 %v3760_v43, %v6695_v15  ;;  %v2669_v57 = vmul.f32 %v3764_v58, %v6710_v40 }
 0x2a6   :  { %3413 = vst [vmem:[%s8524_s3 + $0x130] sm:$0xff] %v3245_v26  ;;  %3414 = vst.msk [vmem:[%s8524_s3 + $0x138] sm:$0xff] %vm182_vm0, %v3246_v8  ;;  %3149 = vperm.xlu1 %3549, %v2187_v42   ;;  %v2840_v50 = vpop.permute.xlu1 %2839  ;;  %v2643_v21 = vmul.f32 %v3758_v19, %v9443_v28  ;;  %v2644_v27 = vmul.f32 %v3759_v10, %v9443_v28  ;;  %v3761_v14 = vld [vmem:[%s8521_s0 + $0x178] sm:$0xff]  ;;  %v9444_v36 = vld [vmem:[#allocation35_spill] sm:$0xff] }
 0x2a7   :  { %v3227_v22 = vadd.f32 %v2840_v50, %v2639_v52  ;;  %v3228_v13 = vadd.f32 %v2840_v50, %v2640_v1  ;;  %v2895_v31 = vpop.permute.xlu0 %2894  ;;  %v2666_v55 = vmul.f32 %v3761_v14, %v6695_v15  ;;  %v2191_v0 = vsub.f32 %v2023_v35, %v2107_v44  ;;  %v3762_v59 = vld [vmem:[%s8521_s0 + $0xe0] sm:$0xff]  ;;  %v3763_v1 = vld [vmem:[%s8521_s0 + $0xe8] sm:$0xff]  ;;  %v9448_v10 = vld [vmem:[#allocation132_spill] sm:$0xff] }
 0x2a8   :  { %v3249_v62 = vadd.f32 %v2895_v31, %v2661_v6  ;;  %v3250_v33 = vadd.f32 %v2895_v31, %v2662_v23  ;;  %3204 = vperm.xlu0 %3548, %v2198_v3   ;;  %v2109_v15 = vmul.f32 %v6715_v5, %v9444_v36  ;;  %v9445_v52 = vld [vmem:[#allocation130_spill] sm:$0xff]  ;;  %v2025_v5 = vld [vmem:[%s8523_s2 + $0x270] sm:$0xff]  ;;  %v3765_v6 = vld [vmem:[%s8521_s0 + $0x198] sm:$0xff] }
 0x2a9   :  { %3395 = vst [vmem:[%s8524_s3 + $0xa0] sm:$0xff] %v3227_v22  ;;  %3396 = vst.msk [vmem:[%s8524_s3 + $0xa8] sm:$0xff] %vm182_vm0, %v3228_v13  ;;  %v2647_v46 = vmul.f32 %v3762_v59, %v9445_v52  ;;  %v2648_v2 = vmul.f32 %v3763_v1, %v9445_v52  ;;  %v2670_v32 = vmul.f32 %v3765_v6, %v6710_v40  ;;  %v9447_v18 = vld [vmem:[#allocation131_spill] sm:$0xff]  ;;  %v3769_v35 = vld [vmem:[%s8521_s0 + $0x1b8] sm:$0xff] }
 0x2aa   :  { %3417 = vst [vmem:[%s8524_s3 + $0x150] sm:$0xff] %v3249_v62  ;;  %3418 = vst.msk [vmem:[%s8524_s3 + $0x158] sm:$0xff] %vm182_vm0, %v3250_v33  ;;  %3159 = vperm.xlu1 %3549, %v2189_v48   ;;  %v2850_v49 = vpop.permute.xlu1 %2849  ;;  %v2193_v62 = vsub.f32 %v2025_v5, %v2109_v15  ;;  %v9446_v33 = vld [vmem:[#allocation39_spill] sm:$0xff]  ;;  %v3766_v48 = vld [vmem:[%s8521_s0 + $0x100] sm:$0xff]  ;;  %v2674_v43 = vmul.f32 %v3769_v35, %v9448_v10 }
 0x2ab   :  { %v3231_v17 = vadd.f32 %v2850_v49, %v2643_v21  ;;  %v3232_v12 = vadd.f32 %v2850_v49, %v2644_v27  ;;  %v2905_v26 = vpop.permute.xlu0 %2904  ;;  %v2111_v40 = vmul.f32 %v6730_v39, %v9446_v33  ;;  %v2651_v44 = vmul.f32 %v3766_v48, %v9447_v18  ;;  %v3767_v19 = vld [vmem:[%s8521_s0 + $0x108] sm:$0xff]  ;;  %v2027_v39 = vld [vmem:[%s8523_s2 + $0x280] sm:$0xff]  ;;  %v3768_v21 = vld [vmem:[%s8521_s0 + $0x1b0] sm:$0xff] }
 0x2ac   :  { %v3253_v8 = vadd.f32 %v2905_v26, %v2665_v25  ;;  %v3254_v42 = vadd.f32 %v2905_v26, %v2666_v55  ;;  %v2652_v28 = vmul.f32 %v3767_v19, %v9447_v18  ;;  %v2673_v27 = vmul.f32 %v3768_v21, %v9448_v10  ;;  %v9450_v36 = vld [vmem:[#allocation133_spill] sm:$0xff]  ;;  %v3771_v59 = vld [vmem:[%s8521_s0 + $0x128] sm:$0xff]  ;;  %v3776_v33 = vld [vmem:[%s8521_s0 + $0x1f0] sm:$0xff] }
 0x2ad   :  { %3399 = vst [vmem:[%s8524_s3 + $0xc0] sm:$0xff] %v3231_v17  ;;  %3400 = vst.msk [vmem:[%s8524_s3 + $0xc8] sm:$0xff] %vm182_vm0, %v3232_v12  ;;  %v2195_v26 = vsub.f32 %v2027_v39, %v2111_v40  ;;  %v2656_v52 = vmul.f32 %v3771_v59, %v9450_v36  ;;  %v2681_v40 = vmul.f32 %v3776_v33, %v6757_v45  ;;  %v3777_v48 = vld [vmem:[%s8521_s0 + $0x1f8] sm:$0xff]  ;;  %v3779_v35 = vld [vmem:[%s8521_s0 + $0x168] sm:$0xff] }
 0x2ae   :  { %3421 = vst [vmem:[%s8524_s3 + $0x170] sm:$0xff] %v3253_v8  ;;  %3422 = vst.msk [vmem:[%s8524_s3 + $0x178] sm:$0xff] %vm182_vm0, %v3254_v42  ;;  %3169 = vperm.xlu1 %3549, %v2191_v0   ;;  %v2860_v23 = vpop.permute.xlu1 %2859  ;;  %v9449_v8 = vld [vmem:[#allocation34_spill] sm:$0xff]  ;;  %v2682_v18 = vmul.f32 %v3777_v48, %v6757_v45  ;;  %v3784_v59 = vld [vmem:[%s8521_s0 + $0x230] sm:$0xff] }
 0x2af   :  { %v3235_v50 = vadd.f32 %v2860_v23, %v2647_v46  ;;  %v3236_v3 = vadd.f32 %v2860_v23, %v2648_v2  ;;  %v2915_v22 = vpop.permute.xlu0 %2914  ;;  %v2113_v42 = vmul.f32 %v6745_v56, %v9449_v8  ;;  %v3770_v0 = vld [vmem:[%s8521_s0 + $0x120] sm:$0xff]  ;;  %v2029_v56 = vld [vmem:[%s8523_s2 + $0x290] sm:$0xff]  ;;  %v3773_v2 = vld [vmem:[%s8521_s0 + $0x1d8] sm:$0xff] }
 0x2b0   :  { %v3257_v13 = vadd.f32 %v2915_v22, %v2669_v57  ;;  %v3258_v31 = vadd.f32 %v2915_v22, %v2670_v32  ;;  %v2655_v15 = vmul.f32 %v3770_v0, %v9450_v36  ;;  %v3772_v46 = vld [vmem:[%s8521_s0 + $0x1d0] sm:$0xff]  ;;  %v2678_v5 = vmul.f32 %v3773_v2, %v6740_v11  ;;  %v3778_v45 = vld [vmem:[%s8521_s0 + $0x160] sm:$0xff]  ;;  %v3783_v36 = vld [vmem:[%s8521_s0 + $0x188] sm:$0xff] }
 0x2b1   :  { %3403 = vst [vmem:[%s8524_s3 + $0xe0] sm:$0xff] %v3235_v50  ;;  %3404 = vst.msk [vmem:[%s8524_s3 + $0xe8] sm:$0xff] %vm182_vm0, %v3236_v3  ;;  %v2677_v1 = vmul.f32 %v3772_v46, %v6740_v11  ;;  %v2197_v3 = vsub.f32 %v2029_v56, %v2113_v42  ;;  %v3774_v11 = vld [vmem:[%s8521_s0 + $0x140] sm:$0xff]  ;;  %v9451_v22 = vld [vmem:[#allocation48_spill] sm:$0xff] }
 0x2b2   :  { %3425 = vst [vmem:[%s8524_s3 + $0x190] sm:$0xff] %v3257_v13  ;;  %3426 = vst.msk [vmem:[%s8524_s3 + $0x198] sm:$0xff] %vm182_vm0, %v3258_v31  ;;  %3179 = vperm.xlu1 %3549, %v2193_v62   ;;  %v2870_v25 = vpop.permute.xlu1 %2869  ;;  %v2659_v13 = vmul.f32 %v3774_v11, %v9451_v22  ;;  %v3775_v31 = vld [vmem:[%s8521_s0 + $0x148] sm:$0xff]  ;;  %v3782_v0 = vld [vmem:[%s8521_s0 + $0x180] sm:$0xff] }
 0x2b3   :  { %v3239_v14 = vadd.f32 %v2870_v25, %v2651_v44  ;;  %v3240_v55 = vadd.f32 %v2870_v25, %v2652_v28  ;;  %v2925_v49 = vpop.permute.xlu0 %2924  ;;  %v2660_v62 = vmul.f32 %v3775_v31, %v9451_v22  ;;  %v3780_v25 = vld [vmem:[%s8521_s0 + $0x210] sm:$0xff]  ;;  %v3785_v56 = vld [vmem:[%s8521_s0 + $0x238] sm:$0xff]  ;;  %v3790_v48 = vld [vmem:[%s8521_s0 + $0x1c0] sm:$0xff] }
 0x2b4   :  { %v3261_v17 = vadd.f32 %v2925_v49, %v2673_v27  ;;  %v3262_v12 = vadd.f32 %v2925_v49, %v2674_v43  ;;  %v2663_v27 = vmul.f32 %v3778_v45, %v6767_v29  ;;  %v2664_v43 = vmul.f32 %v3779_v35, %v6767_v29  ;;  %v3789_v11 = vld [vmem:[%s8521_s0 + $0x258] sm:$0xff] }
 0x2b5   :  { %3407 = vst [vmem:[%s8524_s3 + $0x100] sm:$0xff] %v3239_v14  ;;  %3408 = vst.msk [vmem:[%s8524_s3 + $0x108] sm:$0xff] %vm182_vm0, %v3240_v55  ;;  %v2685_v14 = vmul.f32 %v3780_v25, %v6771_v53  ;;  %v3781_v55 = vld [vmem:[%s8521_s0 + $0x218] sm:$0xff]  ;;  %v3794_v25 = vld [vmem:[%s8521_s0 + $0x1e0] sm:$0xff] }
 0x2b6   :  { %3429 = vst [vmem:[%s8524_s3 + $0x1b0] sm:$0xff] %v3261_v17  ;;  %3430 = vst.msk [vmem:[%s8524_s3 + $0x1b8] sm:$0xff] %vm182_vm0, %v3262_v12  ;;  %3189 = vperm.xlu1 %3549, %v2195_v26   ;;  %v2880_v58 = vpop.permute.xlu1 %2879  ;;  %v2686_v29 = vmul.f32 %v3781_v55, %v6771_v53  ;;  %v2667_v53 = vmul.f32 %v3782_v0, %v6781_v60 }
 0x2b7   :  { %v3243_v57 = vadd.f32 %v2880_v58, %v2655_v15  ;;  %v3244_v6 = vadd.f32 %v2880_v58, %v2656_v52  ;;  %v2935_v32 = vpop.permute.xlu0 %2934  ;;  %v2668_v15 = vmul.f32 %v3783_v36, %v6781_v60  ;;  %v2689_v52 = vmul.f32 %v3784_v59, %v6785_v61  ;;  %v3798_v36 = vld [vmem:[%s8521_s0 + $0x200] sm:$0xff] }
 0x2b8   :  { %v3265_v23 = vadd.f32 %v2935_v32, %v2677_v1  ;;  %v3266_v50 = vadd.f32 %v2935_v32, %v2678_v5  ;;  %v2690_v60 = vmul.f32 %v3785_v56, %v6785_v61  ;;  %v3787_v32 = vld [vmem:[%s8521_s0 + $0x1a8] sm:$0xff] }
 0x2b9   :  { %3411 = vst [vmem:[%s8524_s3 + $0x120] sm:$0xff] %v3243_v57  ;;  %3412 = vst.msk [vmem:[%s8524_s3 + $0x128] sm:$0xff] %vm182_vm0, %v3244_v6  ;;  %v3786_v6 = vld [vmem:[%s8521_s0 + $0x1a0] sm:$0xff] }
 0x2ba   :  { %3433 = vst [vmem:[%s8524_s3 + $0x1d0] sm:$0xff] %v3265_v23  ;;  %3434 = vst.msk [vmem:[%s8524_s3 + $0x1d8] sm:$0xff] %vm182_vm0, %v3266_v50  ;;  %v2890_v44 = vpop.permute.xlu1 %2889  ;;  %3199 = vperm.xlu1 %3549, %v2197_v3   ;;  %v2671_v61 = vmul.f32 %v3786_v6, %v6795_v63  ;;  %v2672_v23 = vmul.f32 %v3787_v32, %v6795_v63  ;;  %v3788_v50 = vld [vmem:[%s8521_s0 + $0x250] sm:$0xff]  ;;  %v2694_v63 = vmul.f32 %v3789_v11, %v6799_v20  ;;  %v3802_v6 = vld [vmem:[%s8521_s0 + $0x220] sm:$0xff] }
 0x2bb   :  { %v3247_v19 = vadd.f32 %v2890_v44, %v2659_v13  ;;  %v3248_v28 = vadd.f32 %v2890_v44, %v2660_v62  ;;  %v2945_v39 = vpop.permute.xlu0 %2944  ;;  %v2693_v3 = vmul.f32 %v3788_v50, %v6799_v20  ;;  %v2675_v20 = vmul.f32 %v3790_v48, %v6809_v9  ;;  %v3807_v48 = vld [vmem:[%s8521_s0 + $0x248] sm:$0xff] }
 0x2bc   :  { %v3269_v21 = vadd.f32 %v2945_v39, %v2681_v40  ;;  %v3270_v10 = vadd.f32 %v2945_v39, %v2682_v18  ;;  %v3791_v18 = vld [vmem:[%s8521_s0 + $0x1c8] sm:$0xff]  ;;  %v3793_v39 = vld [vmem:[%s8521_s0 + $0x278] sm:$0xff] }
 0x2bd   :  { %3415 = vst [vmem:[%s8524_s3 + $0x140] sm:$0xff] %v3247_v19  ;;  %3416 = vst.msk [vmem:[%s8524_s3 + $0x148] sm:$0xff] %vm182_vm0, %v3248_v28  ;;  %v2676_v44 = vmul.f32 %v3791_v18, %v6809_v9  ;;  %v3792_v19 = vld [vmem:[%s8521_s0 + $0x270] sm:$0xff]  ;;  %v2698_v9 = vmul.f32 %v3793_v39, %v6813_v37 }
 0x2be   :  { %3437 = vst [vmem:[%s8524_s3 + $0x1f0] sm:$0xff] %v3269_v21  ;;  %3438 = vst.msk [vmem:[%s8524_s3 + $0x1f8] sm:$0xff] %vm182_vm0, %v3270_v10  ;;  %v2900_v49 = vpop.permute.xlu1 %2899  ;;  %v2697_v28 = vmul.f32 %v3792_v19, %v6813_v37  ;;  %v2679_v37 = vmul.f32 %v3794_v25, %v6823_v30  ;;  %v3808_v18 = vld [vmem:[%s8521_s0 + $0x2f0] sm:$0xff]  ;;  %v9454_v25 = vld [vmem:[#allocation49_spill] sm:$0xff] }
 0x2bf   :  { %v3251_v17 = vadd.f32 %v2900_v49, %v2663_v27  ;;  %v3252_v12 = vadd.f32 %v2900_v49, %v2664_v43  ;;  %v2955_v26 = vpop.permute.xlu0 %2954 }
 0x2c0   :  { %v3273_v8 = vadd.f32 %v2955_v26, %v2685_v14  ;;  %v3274_v42 = vadd.f32 %v2955_v26, %v2686_v29  ;;  %v3795_v14 = vld [vmem:[%s8521_s0 + $0x1e8] sm:$0xff]  ;;  %v3796_v29 = vld [vmem:[%s8521_s0 + $0x290] sm:$0xff] }
 0x2c1   :  { %3419 = vst [vmem:[%s8524_s3 + $0x160] sm:$0xff] %v3251_v17  ;;  %3420 = vst.msk [vmem:[%s8524_s3 + $0x168] sm:$0xff] %vm182_vm0, %v3252_v12  ;;  %v2680_v55 = vmul.f32 %v3795_v14, %v6823_v30  ;;  %v2701_v49 = vmul.f32 %v3796_v29, %v6827_v24  ;;  %v3797_v17 = vld [vmem:[%s8521_s0 + $0x298] sm:$0xff]  ;;  %v3811_v14 = vld [vmem:[%s8521_s0 + $0x268] sm:$0xff] }
 0x2c2   :  { %3441 = vst [vmem:[%s8524_s3 + $0x210] sm:$0xff] %v3273_v8  ;;  %3442 = vst.msk [vmem:[%s8524_s3 + $0x218] sm:$0xff] %vm182_vm0, %v3274_v42  ;;  %v2910_v46 = vpop.permute.xlu1 %2909  ;;  %v2702_v30 = vmul.f32 %v3797_v17, %v6827_v24  ;;  %v2683_v24 = vmul.f32 %v3798_v36, %v6837_v41  ;;  %v3812_v29 = vld [vmem:[%s8521_s0 + $0x310] sm:$0xff] }
 0x2c3   :  { %v3255_v1 = vadd.f32 %v2910_v46, %v2667_v53  ;;  %v3256_v2 = vadd.f32 %v2910_v46, %v2668_v15  ;;  %v2965_v5 = vpop.permute.xlu0 %2964  ;;  %v3799_v15 = vld [vmem:[%s8521_s0 + $0x208] sm:$0xff] }
 0x2c4   :  { %v3277_v58 = vadd.f32 %v2965_v5, %v2689_v52  ;;  %v3278_v57 = vadd.f32 %v2965_v5, %v2690_v60  ;;  %v2684_v59 = vmul.f32 %v3799_v15, %v6837_v41  ;;  %v3800_v52 = vld [vmem:[%s8521_s0 + $0x2b0] sm:$0xff]  ;;  %v3801_v60 = vld [vmem:[%s8521_s0 + $0x2b8] sm:$0xff]  ;;  %v9456_v15 = vld [vmem:[#allocation51_spill] sm:$0xff] }
 0x2c5   :  { %3423 = vst [vmem:[%s8524_s3 + $0x180] sm:$0xff] %v3255_v1  ;;  %3424 = vst.msk [vmem:[%s8524_s3 + $0x188] sm:$0xff] %vm182_vm0, %v3256_v2  ;;  %v2705_v56 = vmul.f32 %v3800_v52, %v6841_v7  ;;  %v2706_v41 = vmul.f32 %v3801_v60, %v6841_v7  ;;  %v2687_v7 = vmul.f32 %v3802_v6, %v6851_v47  ;;  %v3815_v52 = vld [vmem:[%s8521_s0 + $0x288] sm:$0xff]  ;;  %v3816_v60 = vld [vmem:[%s8521_s0 + $0x330] sm:$0xff] }
 0x2c6   :  { %3445 = vst [vmem:[%s8524_s3 + $0x230] sm:$0xff] %v3277_v58  ;;  %3446 = vst.msk [vmem:[%s8524_s3 + $0x238] sm:$0xff] %vm182_vm0, %v3278_v57  ;;  %v2920_v22 = vpop.permute.xlu1 %2919 }
 0x2c7   :  { %v3259_v13 = vadd.f32 %v2920_v22, %v2671_v61  ;;  %v3260_v31 = vadd.f32 %v2920_v22, %v2672_v23  ;;  %v2975_v62 = vpop.permute.xlu0 %2974  ;;  %v3803_v61 = vld [vmem:[%s8521_s0 + $0x228] sm:$0xff]  ;;  %v3804_v23 = vld [vmem:[%s8521_s0 + $0x2d0] sm:$0xff] }
 0x2c8   :  { %v3281_v33 = vadd.f32 %v2975_v62, %v2693_v3  ;;  %v3282_v40 = vadd.f32 %v2975_v62, %v2694_v63  ;;  %v2688_v32 = vmul.f32 %v3803_v61, %v6851_v47  ;;  %v2709_v50 = vmul.f32 %v3804_v23, %v6855_v38  ;;  %v3805_v3 = vld [vmem:[%s8521_s0 + $0x2d8] sm:$0xff]  ;;  %v9458_v23 = vld [vmem:[#allocation54_spill] sm:$0xff] }
 0x2c9   :  { %3427 = vst [vmem:[%s8524_s3 + $0x1a0] sm:$0xff] %v3259_v13  ;;  %3428 = vst.msk [vmem:[%s8524_s3 + $0x1a8] sm:$0xff] %vm182_vm0, %v3260_v31  ;;  %v2710_v47 = vmul.f32 %v3805_v3, %v6855_v38  ;;  %v9452_v38 = vld [vmem:[#allocation47_spill] sm:$0xff] }
 0x2ca   :  { %3449 = vst [vmem:[%s8524_s3 + $0x250] sm:$0xff] %v3281_v33  ;;  %3450 = vst.msk [vmem:[%s8524_s3 + $0x258] sm:$0xff] %vm182_vm0, %v3282_v40  ;;  %v2930_v21 = vpop.permute.xlu1 %2929  ;;  %v3806_v33 = vld [vmem:[%s8521_s0 + $0x240] sm:$0xff]  ;;  %v3819_v3 = vld [vmem:[%s8521_s0 + $0x2a8] sm:$0xff] }
 0x2cb   :  { %v3263_v10 = vadd.f32 %v2930_v21, %v2675_v20  ;;  %v3264_v45 = vadd.f32 %v2930_v21, %v2676_v44  ;;  %v2985_v27 = vpop.permute.xlu0 %2984  ;;  %v2691_v40 = vmul.f32 %v3806_v33, %v9452_v38  ;;  %v2692_v20 = vmul.f32 %v3807_v48, %v9452_v38  ;;  %v9453_v44 = vld [vmem:[#allocation46_spill] sm:$0xff] }
 0x2cc   :  { %v3285_v35 = vadd.f32 %v2985_v27, %v2697_v28  ;;  %v3286_v43 = vadd.f32 %v2985_v27, %v2698_v9  ;;  %v2713_v19 = vmul.f32 %v3808_v18, %v9453_v44  ;;  %v3809_v28 = vld [vmem:[%s8521_s0 + $0x2f8] sm:$0xff]  ;;  %v3822_v18 = vld [vmem:[%s8521_s0 + $0x2c0] sm:$0xff] }
 0x2cd   :  { %3431 = vst [vmem:[%s8524_s3 + $0x1c0] sm:$0xff] %v3263_v10  ;;  %3432 = vst.msk [vmem:[%s8524_s3 + $0x1c8] sm:$0xff] %vm182_vm0, %v3264_v45  ;;  %v2714_v39 = vmul.f32 %v3809_v28, %v9453_v44  ;;  %v9460_v44 = vld [vmem:[#allocation56_spill] sm:$0xff]  ;;  %v3823_v28 = vld [vmem:[%s8521_s0 + $0x2c8] sm:$0xff] }
 0x2ce   :  { %3453 = vst [vmem:[%s8524_s3 + $0x270] sm:$0xff] %v3285_v35  ;;  %3454 = vst.msk [vmem:[%s8524_s3 + $0x278] sm:$0xff] %vm182_vm0, %v3286_v43  ;;  %v2940_v12 = vpop.permute.xlu1 %2939  ;;  %v3810_v43 = vld [vmem:[%s8521_s0 + $0x260] sm:$0xff] }
 0x2cf   :  { %v3267_v26 = vadd.f32 %v2940_v12, %v2679_v37  ;;  %v3268_v8 = vadd.f32 %v2940_v12, %v2680_v55  ;;  %v2995_v42 = vpop.permute.xlu0 %2994  ;;  %v2695_v37 = vmul.f32 %v3810_v43, %v9454_v25  ;;  %v2696_v55 = vmul.f32 %v3811_v14, %v9454_v25 }
 0x2d0   :  { %v3289_v0 = vadd.f32 %v2995_v42, %v2701_v49  ;;  %v3290_v53 = vadd.f32 %v2995_v42, %v2702_v30  ;;  %v9455_v49 = vld [vmem:[#allocation50_spill] sm:$0xff]  ;;  %v3813_v30 = vld [vmem:[%s8521_s0 + $0x318] sm:$0xff] }
 0x2d1   :  { %3435 = vst [vmem:[%s8524_s3 + $0x1e0] sm:$0xff] %v3267_v26  ;;  %3436 = vst.msk [vmem:[%s8524_s3 + $0x1e8] sm:$0xff] %vm182_vm0, %v3268_v8  ;;  %v2717_v17 = vmul.f32 %v3812_v29, %v9455_v49  ;;  %v2718_v12 = vmul.f32 %v3813_v30, %v9455_v49  ;;  %v3826_v29 = vld [vmem:[%s8521_s0 + $0x2e0] sm:$0xff]  ;;  %v3827_v30 = vld [vmem:[%s8521_s0 + $0x2e8] sm:$0xff] }
 0x2d2   :  { %3457 = vst [vmem:[%s8524_s3 + $0x290] sm:$0xff] %v3289_v0  ;;  %3458 = vst.msk [vmem:[%s8524_s3 + $0x298] sm:$0xff] %vm182_vm0, %v3290_v53  ;;  %v2950_v46 = vpop.permute.xlu1 %2949  ;;  %v9462_v49 = vld [vmem:[#allocation58_spill] sm:$0xff] }
 0x2d3   :  { %v3271_v1 = vadd.f32 %v2950_v46, %v2683_v24  ;;  %v3272_v2 = vadd.f32 %v2950_v46, %v2684_v59  ;;  %v3005_v5 = vpop.permute.xlu0 %3004  ;;  %v3814_v24 = vld [vmem:[%s8521_s0 + $0x280] sm:$0xff] }
 0x2d4   :  { %v3293_v58 = vadd.f32 %v3005_v5, %v2705_v56  ;;  %v3294_v57 = vadd.f32 %v3005_v5, %v2706_v41  ;;  %v2699_v59 = vmul.f32 %v3814_v24, %v9456_v15  ;;  %v2700_v56 = vmul.f32 %v3815_v52, %v9456_v15  ;;  %v9457_v41 = vld [vmem:[#allocation52_spill] sm:$0xff] }
 0x2d5   :  { %3439 = vst [vmem:[%s8524_s3 + $0x200] sm:$0xff] %v3271_v1  ;;  %3440 = vst.msk [vmem:[%s8524_s3 + $0x208] sm:$0xff] %vm182_vm0, %v3272_v2  ;;  %v2721_v46 = vmul.f32 %v3816_v60, %v9457_v41  ;;  %v3817_v1 = vld [vmem:[%s8521_s0 + $0x338] sm:$0xff]  ;;  %v3830_v60 = vld [vmem:[%s8521_s0 + $0x300] sm:$0xff] }
 0x2d6   :  { %3461 = vst [vmem:[%s8524_s3 + $0x2b0] sm:$0xff] %v3293_v58  ;;  %3462 = vst.msk [vmem:[%s8524_s3 + $0x2b8] sm:$0xff] %vm182_vm0, %v3294_v57  ;;  %v2960_v11 = vpop.permute.xlu1 %2959  ;;  %v2722_v2 = vmul.f32 %v3817_v1, %v9457_v41  ;;  %v9464_v41 = vld [vmem:[#allocation57_spill] sm:$0xff]  ;;  %v3831_v1 = vld [vmem:[%s8521_s0 + $0x308] sm:$0xff] }
 0x2d7   :  { %v3275_v63 = vadd.f32 %v2960_v11, %v2687_v7  ;;  %v3276_v22 = vadd.f32 %v2960_v11, %v2688_v32  ;;  %v3015_v13 = vpop.permute.xlu0 %3014  ;;  %v3818_v32 = vld [vmem:[%s8521_s0 + $0x2a0] sm:$0xff]  ;;  %v3820_v11 = vld [vmem:[%s8521_s0 + $0x350] sm:$0xff] }
 0x2d8   :  { %v3297_v31 = vadd.f32 %v3015_v13, %v2709_v50  ;;  %v3298_v62 = vadd.f32 %v3015_v13, %v2710_v47  ;;  %v2703_v50 = vmul.f32 %v3818_v32, %v9458_v23  ;;  %v2704_v47 = vmul.f32 %v3819_v3, %v9458_v23  ;;  %v3821_v13 = vld [vmem:[%s8521_s0 + $0x358] sm:$0xff] }
 0x2d9   :  { %3443 = vst [vmem:[%s8524_s3 + $0x220] sm:$0xff] %v3275_v63  ;;  %3444 = vst.msk [vmem:[%s8524_s3 + $0x228] sm:$0xff] %vm182_vm0, %v3276_v22  ;;  %v9459_v63 = vld [vmem:[#allocation53_spill] sm:$0xff] }
 0x2da   :  { %3465 = vst [vmem:[%s8524_s3 + $0x2d0] sm:$0xff] %v3297_v31  ;;  %3466 = vst.msk [vmem:[%s8524_s3 + $0x2d8] sm:$0xff] %vm182_vm0, %v3298_v62  ;;  %v2970_v9 = vpop.permute.xlu1 %2969  ;;  %v2725_v22 = vmul.f32 %v3820_v11, %v9459_v63  ;;  %v2726_v31 = vmul.f32 %v3821_v13, %v9459_v63  ;;  %v3834_v11 = vld [vmem:[%s8521_s0 + $0x320] sm:$0xff]  ;;  %v9466_v63 = vld [vmem:[#allocation60_spill] sm:$0xff] }
 0x2db   :  { %v3279_v21 = vadd.f32 %v2970_v9, %v2691_v40  ;;  %v3280_v10 = vadd.f32 %v2970_v9, %v2692_v20  ;;  %v3025_v45 = vpop.permute.xlu0 %3024  ;;  %v3824_v9 = vld [vmem:[%s8521_s0 + $0x370] sm:$0xff]  ;;  %v3835_v13 = vld [vmem:[%s8521_s0 + $0x328] sm:$0xff] }
 0x2dc   :  { %v3301_v27 = vadd.f32 %v3025_v45, %v2713_v19  ;;  %v3302_v35 = vadd.f32 %v3025_v45, %v2714_v39  ;;  %v2707_v19 = vmul.f32 %v3822_v18, %v9460_v44  ;;  %v2708_v39 = vmul.f32 %v3823_v28, %v9460_v44  ;;  %v3825_v45 = vld [vmem:[%s8521_s0 + $0x378] sm:$0xff] }
 0x2dd   :  { %3447 = vst [vmem:[%s8524_s3 + $0x240] sm:$0xff] %v3279_v21  ;;  %3448 = vst.msk [vmem:[%s8524_s3 + $0x248] sm:$0xff] %vm182_vm0, %v3280_v10  ;;  %v9461_v21 = vld [vmem:[#allocation55_spill] sm:$0xff] }
 0x2de   :  { %3469 = vst [vmem:[%s8524_s3 + $0x2f0] sm:$0xff] %v3301_v27  ;;  %3470 = vst.msk [vmem:[%s8524_s3 + $0x2f8] sm:$0xff] %vm182_vm0, %v3302_v35  ;;  %v2980_v26 = vpop.permute.xlu1 %2979  ;;  %v2729_v10 = vmul.f32 %v3824_v9, %v9461_v21  ;;  %v2730_v27 = vmul.f32 %v3825_v45, %v9461_v21  ;;  %v3838_v9 = vld [vmem:[%s8521_s0 + $0x340] sm:$0xff]  ;;  %v9468_v21 = vld [vmem:[#allocation59_spill] sm:$0xff] }
 0x2df   :  { %v3283_v8 = vadd.f32 %v2980_v26, %v2695_v37  ;;  %v3284_v42 = vadd.f32 %v2980_v26, %v2696_v55  ;;  %v3035_v0 = vpop.permute.xlu0 %3034  ;;  %v3828_v26 = vld [vmem:[%s8521_s0 + $0x390] sm:$0xff]  ;;  %v3839_v45 = vld [vmem:[%s8521_s0 + $0x348] sm:$0xff] }
 0x2e0   :  { %v3305_v53 = vadd.f32 %v3035_v0, %v2717_v17  ;;  %v3306_v36 = vadd.f32 %v3035_v0, %v2718_v12  ;;  %v2711_v17 = vmul.f32 %v3826_v29, %v9462_v49  ;;  %v2712_v12 = vmul.f32 %v3827_v30, %v9462_v49  ;;  %v3829_v0 = vld [vmem:[%s8521_s0 + $0x398] sm:$0xff] }
 0x2e1   :  { %3451 = vst [vmem:[%s8524_s3 + $0x260] sm:$0xff] %v3283_v8  ;;  %3452 = vst.msk [vmem:[%s8524_s3 + $0x268] sm:$0xff] %vm182_vm0, %v3284_v42  ;;  %v9463_v8 = vld [vmem:[#allocation76_spill] sm:$0xff] }
 0x2e2   :  { %3473 = vst [vmem:[%s8524_s3 + $0x310] sm:$0xff] %v3305_v53  ;;  %3474 = vst.msk [vmem:[%s8524_s3 + $0x318] sm:$0xff] %vm182_vm0, %v3306_v36  ;;  %v2990_v5 = vpop.permute.xlu1 %2989  ;;  %v2733_v42 = vmul.f32 %v3828_v26, %v9463_v8  ;;  %v2734_v53 = vmul.f32 %v3829_v0, %v9463_v8  ;;  %v3842_v26 = vld [vmem:[%s8521_s0 + $0x360] sm:$0xff]  ;;  %v3843_v0 = vld [vmem:[%s8521_s0 + $0x368] sm:$0xff] }
 0x2e3   :  { %v3287_v58 = vadd.f32 %v2990_v5, %v2699_v59  ;;  %v3288_v57 = vadd.f32 %v2990_v5, %v2700_v56  ;;  %v3045_v6 = vpop.permute.xlu0 %3044  ;;  %v3832_v5 = vld [vmem:[%s8521_s0 + $0x3b0] sm:$0xff]  ;;  %v9470_v8 = vld [vmem:[#allocation62_spill] sm:$0xff] }
 0x2e4   :  { %v3309_v7 = vadd.f32 %v3045_v6, %v2721_v46  ;;  %v3310_v61 = vadd.f32 %v3045_v6, %v2722_v2  ;;  %v2715_v46 = vmul.f32 %v3830_v60, %v9464_v41  ;;  %v2716_v2 = vmul.f32 %v3831_v1, %v9464_v41  ;;  %v3833_v6 = vld [vmem:[%s8521_s0 + $0x3b8] sm:$0xff] }
 0x2e5   :  { %3455 = vst [vmem:[%s8524_s3 + $0x280] sm:$0xff] %v3287_v58  ;;  %3456 = vst.msk [vmem:[%s8524_s3 + $0x288] sm:$0xff] %vm182_vm0, %v3288_v57  ;;  %v9465_v58 = vld [vmem:[#allocation78_spill] sm:$0xff] }
 0x2e6   :  { %3477 = vst [vmem:[%s8524_s3 + $0x330] sm:$0xff] %v3309_v7  ;;  %3478 = vst.msk [vmem:[%s8524_s3 + $0x338] sm:$0xff] %vm182_vm0, %v3310_v61  ;;  %v3000_v62 = vpop.permute.xlu1 %2999  ;;  %v2737_v57 = vmul.f32 %v3832_v5, %v9465_v58  ;;  %v2738_v7 = vmul.f32 %v3833_v6, %v9465_v58  ;;  %v3846_v5 = vld [vmem:[%s8521_s0 + $0x380] sm:$0xff]  ;;  %v9472_v58 = vld [vmem:[#allocation61_spill] sm:$0xff] }
 0x2e7   :  { %v3291_v33 = vadd.f32 %v3000_v62, %v2703_v50  ;;  %v3292_v38 = vadd.f32 %v3000_v62, %v2704_v47  ;;  %v3055_v40 = vpop.permute.xlu0 %3054  ;;  %v3836_v62 = vld [vmem:[%s8521_s0 + $0x3d0] sm:$0xff]  ;;  %v3847_v6 = vld [vmem:[%s8521_s0 + $0x388] sm:$0xff] }
 0x2e8   :  { %v3313_v48 = vadd.f32 %v3055_v40, %v2725_v22  ;;  %v3314_v20 = vadd.f32 %v3055_v40, %v2726_v31  ;;  %v2719_v22 = vmul.f32 %v3834_v11, %v9466_v63  ;;  %v2720_v31 = vmul.f32 %v3835_v13, %v9466_v63  ;;  %v3837_v40 = vld [vmem:[%s8521_s0 + $0x3d8] sm:$0xff] }
 0x2e9   :  { %3459 = vst [vmem:[%s8524_s3 + $0x2a0] sm:$0xff] %v3291_v33  ;;  %3460 = vst.msk [vmem:[%s8524_s3 + $0x2a8] sm:$0xff] %vm182_vm0, %v3292_v38  ;;  %v9467_v33 = vld [vmem:[#allocation80_spill] sm:$0xff] }
 0x2ea   :  { %3481 = vst [vmem:[%s8524_s3 + $0x350] sm:$0xff] %v3313_v48  ;;  %3482 = vst.msk [vmem:[%s8524_s3 + $0x358] sm:$0xff] %vm182_vm0, %v3314_v20  ;;  %v3010_v35 = vpop.permute.xlu1 %3009  ;;  %v2741_v38 = vmul.f32 %v3836_v62, %v9467_v33  ;;  %v2742_v48 = vmul.f32 %v3837_v40, %v9467_v33  ;;  %v3850_v62 = vld [vmem:[%s8521_s0 + $0x3a0] sm:$0xff]  ;;  %v9474_v33 = vld [vmem:[#allocation65_spill] sm:$0xff] }
 0x2eb   :  { %v3295_v43 = vadd.f32 %v3010_v35, %v2707_v19  ;;  %v3296_v25 = vadd.f32 %v3010_v35, %v2708_v39  ;;  %v3065_v37 = vpop.permute.xlu0 %3064  ;;  %v3840_v35 = vld [vmem:[%s8521_s0 + $0x3f0] sm:$0xff]  ;;  %v3851_v40 = vld [vmem:[%s8521_s0 + $0x3a8] sm:$0xff] }
 0x2ec   :  { %v3317_v14 = vadd.f32 %v3065_v37, %v2729_v10  ;;  %v3318_v55 = vadd.f32 %v3065_v37, %v2730_v27  ;;  %v2723_v10 = vmul.f32 %v3838_v9, %v9468_v21  ;;  %v2724_v27 = vmul.f32 %v3839_v45, %v9468_v21  ;;  %v3841_v37 = vld [vmem:[%s8521_s0 + $0x3f8] sm:$0xff] }
 0x2ed   :  { %3463 = vst [vmem:[%s8524_s3 + $0x2c0] sm:$0xff] %v3295_v43  ;;  %3464 = vst.msk [vmem:[%s8524_s3 + $0x2c8] sm:$0xff] %vm182_vm0, %v3296_v25  ;;  %v9469_v43 = vld [vmem:[#allocation82_spill] sm:$0xff] }
 0x2ee   :  { %3485 = vst [vmem:[%s8524_s3 + $0x370] sm:$0xff] %v3317_v14  ;;  %3486 = vst.msk [vmem:[%s8524_s3 + $0x378] sm:$0xff] %vm182_vm0, %v3318_v55  ;;  %v3020_v36 = vpop.permute.xlu1 %3019  ;;  %v2745_v25 = vmul.f32 %v3840_v35, %v9469_v43  ;;  %v2746_v14 = vmul.f32 %v3841_v37, %v9469_v43  ;;  %v3854_v35 = vld [vmem:[%s8521_s0 + $0x3c0] sm:$0xff]  ;;  %v9476_v43 = vld [vmem:[#allocation63_spill] sm:$0xff] }
 0x2ef   :  { %v3299_v24 = vadd.f32 %v3020_v36, %v2711_v17  ;;  %v3300_v15 = vadd.f32 %v3020_v36, %v2712_v12  ;;  %v3075_v59 = vpop.permute.xlu0 %3074  ;;  %v3844_v36 = vld [vmem:[%s8521_s0 + $0x410] sm:$0xff]  ;;  %v3855_v37 = vld [vmem:[%s8521_s0 + $0x3c8] sm:$0xff] }
 0x2f0   :  { %v3321_v52 = vadd.f32 %v3075_v59, %v2733_v42  ;;  %v3322_v56 = vadd.f32 %v3075_v59, %v2734_v53  ;;  %v2727_v42 = vmul.f32 %v3842_v26, %v9470_v8  ;;  %v2728_v53 = vmul.f32 %v3843_v0, %v9470_v8  ;;  %v3845_v59 = vld [vmem:[%s8521_s0 + $0x418] sm:$0xff] }
 0x2f1   :  { %3467 = vst [vmem:[%s8524_s3 + $0x2e0] sm:$0xff] %v3299_v24  ;;  %3468 = vst.msk [vmem:[%s8524_s3 + $0x2e8] sm:$0xff] %vm182_vm0, %v3300_v15  ;;  %v9471_v24 = vld [vmem:[#allocation84_spill] sm:$0xff] }
 0x2f2   :  { %3489 = vst [vmem:[%s8524_s3 + $0x390] sm:$0xff] %v3321_v52  ;;  %3490 = vst.msk [vmem:[%s8524_s3 + $0x398] sm:$0xff] %vm182_vm0, %v3322_v56  ;;  %v3030_v61 = vpop.permute.xlu1 %3029  ;;  %v2749_v15 = vmul.f32 %v3844_v36, %v9471_v24  ;;  %v2750_v52 = vmul.f32 %v3845_v59, %v9471_v24  ;;  %v3858_v36 = vld [vmem:[%s8521_s0 + $0x3e0] sm:$0xff]  ;;  %v3859_v59 = vld [vmem:[%s8521_s0 + $0x3e8] sm:$0xff] }
 0x2f3   :  { %v3303_v32 = vadd.f32 %v3030_v61, %v2715_v46  ;;  %v3304_v23 = vadd.f32 %v3030_v61, %v2716_v2  ;;  %v3085_v50 = vpop.permute.xlu0 %3084  ;;  %v3848_v61 = vld [vmem:[%s8521_s0 + $0x430] sm:$0xff]  ;;  %v9478_v24 = vld [vmem:[#allocation66_spill] sm:$0xff] }
 0x2f4   :  { %v3325_v3 = vadd.f32 %v3085_v50, %v2737_v57  ;;  %v3326_v47 = vadd.f32 %v3085_v50, %v2738_v7  ;;  %v2731_v57 = vmul.f32 %v3846_v5, %v9472_v58  ;;  %v2732_v7 = vmul.f32 %v3847_v6, %v9472_v58  ;;  %v3849_v50 = vld [vmem:[%s8521_s0 + $0x438] sm:$0xff] }
 0x2f5   :  { %3471 = vst [vmem:[%s8524_s3 + $0x300] sm:$0xff] %v3303_v32  ;;  %3472 = vst.msk [vmem:[%s8524_s3 + $0x308] sm:$0xff] %vm182_vm0, %v3304_v23  ;;  %v9473_v32 = vld [vmem:[#allocation86_spill] sm:$0xff] }
 0x2f6   :  { %3493 = vst [vmem:[%s8524_s3 + $0x3b0] sm:$0xff] %v3325_v3  ;;  %3494 = vst.msk [vmem:[%s8524_s3 + $0x3b8] sm:$0xff] %vm182_vm0, %v3326_v47  ;;  %v3040_v20 = vpop.permute.xlu1 %3039  ;;  %v2753_v23 = vmul.f32 %v3848_v61, %v9473_v32  ;;  %v2754_v3 = vmul.f32 %v3849_v50, %v9473_v32  ;;  %v3862_v61 = vld [vmem:[%s8521_s0 + $0x400] sm:$0xff]  ;;  %v9480_v32 = vld [vmem:[#allocation64_spill] sm:$0xff] }
 0x2f7   :  { %v3307_v18 = vadd.f32 %v3040_v20, %v2719_v22  ;;  %v3308_v44 = vadd.f32 %v3040_v20, %v2720_v31  ;;  %v3095_v19 = vpop.permute.xlu0 %3094  ;;  %v3852_v20 = vld [vmem:[%s8521_s0 + $0x450] sm:$0xff]  ;;  %v3863_v50 = vld [vmem:[%s8521_s0 + $0x408] sm:$0xff] }
 0x2f8   :  { %v3329_v28 = vadd.f32 %v3095_v19, %v2741_v38  ;;  %v3330_v39 = vadd.f32 %v3095_v19, %v2742_v48  ;;  %v2735_v38 = vmul.f32 %v3850_v62, %v9474_v33  ;;  %v2736_v48 = vmul.f32 %v3851_v40, %v9474_v33  ;;  %v3853_v19 = vld [vmem:[%s8521_s0 + $0x458] sm:$0xff] }
 0x2f9   :  { %3475 = vst [vmem:[%s8524_s3 + $0x320] sm:$0xff] %v3307_v18  ;;  %3476 = vst.msk [vmem:[%s8524_s3 + $0x328] sm:$0xff] %vm182_vm0, %v3308_v44  ;;  %v9475_v18 = vld [vmem:[#allocation88_spill] sm:$0xff] }
 0x2fa   :  { %3497 = vst [vmem:[%s8524_s3 + $0x3d0] sm:$0xff] %v3329_v28  ;;  %3498 = vst.msk [vmem:[%s8524_s3 + $0x3d8] sm:$0xff] %vm182_vm0, %v3330_v39  ;;  %v3050_v55 = vpop.permute.xlu1 %3049  ;;  %v2757_v44 = vmul.f32 %v3852_v20, %v9475_v18  ;;  %v2758_v28 = vmul.f32 %v3853_v19, %v9475_v18  ;;  %v3866_v20 = vld [vmem:[%s8521_s0 + $0x420] sm:$0xff]  ;;  %v9482_v18 = vld [vmem:[#allocation68_spill] sm:$0xff] }
 0x2fb   :  { %v3311_v29 = vadd.f32 %v3050_v55, %v2723_v10  ;;  %v3312_v49 = vadd.f32 %v3050_v55, %v2724_v27  ;;  %v3105_v17 = vpop.permute.xlu0 %3104  ;;  %v3856_v55 = vld [vmem:[%s8521_s0 + $0x470] sm:$0xff]  ;;  %v3867_v19 = vld [vmem:[%s8521_s0 + $0x428] sm:$0xff] }
 0x2fc   :  { %v3333_v30 = vadd.f32 %v3105_v17, %v2745_v25  ;;  %v3334_v12 = vadd.f32 %v3105_v17, %v2746_v14  ;;  %v2739_v25 = vmul.f32 %v3854_v35, %v9476_v43  ;;  %v2740_v14 = vmul.f32 %v3855_v37, %v9476_v43  ;;  %v3857_v17 = vld [vmem:[%s8521_s0 + $0x478] sm:$0xff] }
 0x2fd   :  { %3479 = vst [vmem:[%s8524_s3 + $0x340] sm:$0xff] %v3311_v29  ;;  %3480 = vst.msk [vmem:[%s8524_s3 + $0x348] sm:$0xff] %vm182_vm0, %v3312_v49  ;;  %v9477_v29 = vld [vmem:[#allocation90_spill] sm:$0xff] }
 0x2fe   :  { %3501 = vst [vmem:[%s8524_s3 + $0x3f0] sm:$0xff] %v3333_v30  ;;  %3502 = vst.msk [vmem:[%s8524_s3 + $0x3f8] sm:$0xff] %vm182_vm0, %v3334_v12  ;;  %v3060_v56 = vpop.permute.xlu1 %3059  ;;  %v2761_v49 = vmul.f32 %v3856_v55, %v9477_v29  ;;  %v2762_v30 = vmul.f32 %v3857_v17, %v9477_v29  ;;  %v3870_v55 = vld [vmem:[%s8521_s0 + $0x440] sm:$0xff]  ;;  %v9484_v29 = vld [vmem:[#allocation67_spill] sm:$0xff] }
 0x2ff   :  { %v3315_v60 = vadd.f32 %v3060_v56, %v2727_v42  ;;  %v3316_v41 = vadd.f32 %v3060_v56, %v2728_v53  ;;  %v3115_v46 = vpop.permute.xlu0 %3114  ;;  %v3860_v56 = vld [vmem:[%s8521_s0 + $0x490] sm:$0xff]  ;;  %v3871_v17 = vld [vmem:[%s8521_s0 + $0x448] sm:$0xff] }
 0x300   :  { %v3337_v1 = vadd.f32 %v3115_v46, %v2749_v15  ;;  %v3338_v2 = vadd.f32 %v3115_v46, %v2750_v52  ;;  %v2743_v15 = vmul.f32 %v3858_v36, %v9478_v24  ;;  %v2744_v52 = vmul.f32 %v3859_v59, %v9478_v24  ;;  %v3861_v46 = vld [vmem:[%s8521_s0 + $0x498] sm:$0xff] }
 0x301   :  { %3483 = vst [vmem:[%s8524_s3 + $0x360] sm:$0xff] %v3315_v60  ;;  %3484 = vst.msk [vmem:[%s8524_s3 + $0x368] sm:$0xff] %vm182_vm0, %v3316_v41  ;;  %v9479_v60 = vld [vmem:[#allocation92_spill] sm:$0xff] }
 0x302   :  { %3505 = vst [vmem:[%s8524_s3 + $0x410] sm:$0xff] %v3337_v1  ;;  %3506 = vst.msk [vmem:[%s8524_s3 + $0x418] sm:$0xff] %vm182_vm0, %v3338_v2  ;;  %v3070_v47 = vpop.permute.xlu1 %3069  ;;  %v2765_v41 = vmul.f32 %v3860_v56, %v9479_v60  ;;  %v2766_v1 = vmul.f32 %v3861_v46, %v9479_v60  ;;  %v3874_v56 = vld [vmem:[%s8521_s0 + $0x460] sm:$0xff]  ;;  %v3875_v46 = vld [vmem:[%s8521_s0 + $0x468] sm:$0xff] }
 0x303   :  { %v3319_v11 = vadd.f32 %v3070_v47, %v2731_v57  ;;  %v3320_v63 = vadd.f32 %v3070_v47, %v2732_v7  ;;  %v3125_v22 = vpop.permute.xlu0 %3124  ;;  %v3864_v47 = vld [vmem:[%s8521_s0 + $0x4b0] sm:$0xff]  ;;  %v9486_v60 = vld [vmem:[#allocation70_spill] sm:$0xff] }
 0x304   :  { %v3341_v13 = vadd.f32 %v3125_v22, %v2753_v23  ;;  %v3342_v31 = vadd.f32 %v3125_v22, %v2754_v3  ;;  %v2747_v23 = vmul.f32 %v3862_v61, %v9480_v32  ;;  %v2748_v3 = vmul.f32 %v3863_v50, %v9480_v32  ;;  %v3865_v22 = vld [vmem:[%s8521_s0 + $0x4b8] sm:$0xff] }
 0x305   :  { %3487 = vst [vmem:[%s8524_s3 + $0x380] sm:$0xff] %v3319_v11  ;;  %3488 = vst.msk [vmem:[%s8524_s3 + $0x388] sm:$0xff] %vm182_vm0, %v3320_v63  ;;  %v9481_v11 = vld [vmem:[#allocation94_spill] sm:$0xff] }
 0x306   :  { %3509 = vst [vmem:[%s8524_s3 + $0x430] sm:$0xff] %v3341_v13  ;;  %3510 = vst.msk [vmem:[%s8524_s3 + $0x438] sm:$0xff] %vm182_vm0, %v3342_v31  ;;  %v3080_v39 = vpop.permute.xlu1 %3079  ;;  %v2769_v63 = vmul.f32 %v3864_v47, %v9481_v11  ;;  %v2770_v13 = vmul.f32 %v3865_v22, %v9481_v11  ;;  %v3878_v47 = vld [vmem:[%s8521_s0 + $0x480] sm:$0xff]  ;;  %v9488_v11 = vld [vmem:[#allocation69_spill] sm:$0xff] }
 0x307   :  { %v3323_v9 = vadd.f32 %v3080_v39, %v2735_v38  ;;  %v3324_v21 = vadd.f32 %v3080_v39, %v2736_v48  ;;  %v3135_v10 = vpop.permute.xlu0 %3134  ;;  %v3868_v39 = vld [vmem:[%s8521_s0 + $0x4d0] sm:$0xff]  ;;  %v3879_v22 = vld [vmem:[%s8521_s0 + $0x488] sm:$0xff] }
 0x308   :  { %v3345_v45 = vadd.f32 %v3135_v10, %v2757_v44  ;;  %v3346_v27 = vadd.f32 %v3135_v10, %v2758_v28  ;;  %v2751_v44 = vmul.f32 %v3866_v20, %v9482_v18  ;;  %v2752_v28 = vmul.f32 %v3867_v19, %v9482_v18  ;;  %v3869_v10 = vld [vmem:[%s8521_s0 + $0x4d8] sm:$0xff] }
 0x309   :  { %3491 = vst [vmem:[%s8524_s3 + $0x3a0] sm:$0xff] %v3323_v9  ;;  %3492 = vst.msk [vmem:[%s8524_s3 + $0x3a8] sm:$0xff] %vm182_vm0, %v3324_v21  ;;  %v9483_v9 = vld [vmem:[#allocation97_spill] sm:$0xff] }
 0x30a   :  { %3513 = vst [vmem:[%s8524_s3 + $0x450] sm:$0xff] %v3345_v45  ;;  %3514 = vst.msk [vmem:[%s8524_s3 + $0x458] sm:$0xff] %vm182_vm0, %v3346_v27  ;;  %v3090_v12 = vpop.permute.xlu1 %3089  ;;  %v2773_v21 = vmul.f32 %v3868_v39, %v9483_v9  ;;  %v2774_v45 = vmul.f32 %v3869_v10, %v9483_v9  ;;  %v3882_v39 = vld [vmem:[%s8521_s0 + $0x4a0] sm:$0xff] }
 0x30b   :  { %v3327_v26 = vadd.f32 %v3090_v12, %v2739_v25  ;;  %v3328_v8 = vadd.f32 %v3090_v12, %v2740_v14  ;;  %v3145_v42 = vpop.permute.xlu0 %3144  ;;  %v3872_v12 = vld [vmem:[%s8521_s0 + $0x4f0] sm:$0xff]  ;;  %v2767_v9 = vmul.f32 %v3882_v39, %v7139_v51 }
 0x30c   :  { %v3349_v0 = vadd.f32 %v3145_v42, %v2761_v49  ;;  %v3350_v53 = vadd.f32 %v3145_v42, %v2762_v30  ;;  %v2755_v49 = vmul.f32 %v3870_v55, %v9484_v29  ;;  %v2756_v30 = vmul.f32 %v3871_v17, %v9484_v29  ;;  %v3873_v42 = vld [vmem:[%s8521_s0 + $0x4f8] sm:$0xff] }
 0x30d   :  { %3495 = vst [vmem:[%s8524_s3 + $0x3c0] sm:$0xff] %v3327_v26  ;;  %3496 = vst.msk [vmem:[%s8524_s3 + $0x3c8] sm:$0xff] %vm182_vm0, %v3328_v8  ;;  %v9485_v26 = vld [vmem:[#allocation100_spill] sm:$0xff] }
 0x30e   :  { %3517 = vst [vmem:[%s8524_s3 + $0x470] sm:$0xff] %v3349_v0  ;;  %3518 = vst.msk [vmem:[%s8524_s3 + $0x478] sm:$0xff] %vm182_vm0, %v3350_v53  ;;  %v3100_v2 = vpop.permute.xlu1 %3099  ;;  %v2777_v8 = vmul.f32 %v3872_v12, %v9485_v26  ;;  %v2778_v0 = vmul.f32 %v3873_v42, %v9485_v26  ;;  %v3888_v42 = vld [vmem:[%s8521_s0 + $0x500] sm:$0xff] }
 0x30f   :  { %v3331_v5 = vadd.f32 %v3100_v2, %v2743_v15  ;;  %v3332_v58 = vadd.f32 %v3100_v2, %v2744_v52  ;;  %v3155_v57 = vpop.permute.xlu0 %3154  ;;  %v3876_v2 = vld [vmem:[%s8521_s0 + $0x510] sm:$0xff] }
 0x310   :  { %v3353_v6 = vadd.f32 %v3155_v57, %v2765_v41  ;;  %v3354_v7 = vadd.f32 %v3155_v57, %v2766_v1  ;;  %v2759_v41 = vmul.f32 %v3874_v56, %v9486_v60  ;;  %v2760_v1 = vmul.f32 %v3875_v46, %v9486_v60  ;;  %v3877_v57 = vld [vmem:[%s8521_s0 + $0x518] sm:$0xff] }
 0x311   :  { %3499 = vst [vmem:[%s8524_s3 + $0x3e0] sm:$0xff] %v3331_v5  ;;  %3500 = vst.msk [vmem:[%s8524_s3 + $0x3e8] sm:$0xff] %vm182_vm0, %v3332_v58  ;;  %v9487_v5 = vld [vmem:[#allocation102_spill] sm:$0xff] }
 0x312   :  { %3521 = vst [vmem:[%s8524_s3 + $0x490] sm:$0xff] %v3353_v6  ;;  %3522 = vst.msk [vmem:[%s8524_s3 + $0x498] sm:$0xff] %vm182_vm0, %v3354_v7  ;;  %v3110_v31 = vpop.permute.xlu1 %3109  ;;  %v2781_v58 = vmul.f32 %v3876_v2, %v9487_v5  ;;  %v2782_v6 = vmul.f32 %v3877_v57, %v9487_v5 }
 0x313   :  { %v3335_v62 = vadd.f32 %v3110_v31, %v2747_v23  ;;  %v3336_v33 = vadd.f32 %v3110_v31, %v2748_v3  ;;  %v3165_v38 = vpop.permute.xlu0 %3164  ;;  %v3880_v31 = vld [vmem:[%s8521_s0 + $0x530] sm:$0xff] }
 0x314   :  { %v3357_v40 = vadd.f32 %v3165_v38, %v2769_v63  ;;  %v3358_v48 = vadd.f32 %v3165_v38, %v2770_v13  ;;  %v2763_v63 = vmul.f32 %v3878_v47, %v9488_v11  ;;  %v2764_v13 = vmul.f32 %v3879_v22, %v9488_v11  ;;  %v3881_v38 = vld [vmem:[%s8521_s0 + $0x538] sm:$0xff] }
 0x315   :  { %3503 = vst [vmem:[%s8524_s3 + $0x400] sm:$0xff] %v3335_v62  ;;  %3504 = vst.msk [vmem:[%s8524_s3 + $0x408] sm:$0xff] %vm182_vm0, %v3336_v33  ;;  %v9489_v62 = vld [vmem:[#allocation104_spill] sm:$0xff] }
 0x316   :  { %3525 = vst [vmem:[%s8524_s3 + $0x4b0] sm:$0xff] %v3357_v40  ;;  %3526 = vst.msk [vmem:[%s8524_s3 + $0x4b8] sm:$0xff] %vm182_vm0, %v3358_v48  ;;  %v3120_v27 = vpop.permute.xlu1 %3119  ;;  %v2785_v33 = vmul.f32 %v3880_v31, %v9489_v62  ;;  %v2786_v40 = vmul.f32 %v3881_v38, %v9489_v62 }
 0x317   :  { %v3339_v35 = vadd.f32 %v3120_v27, %v2751_v44  ;;  %v3340_v43 = vadd.f32 %v3120_v27, %v2752_v28  ;;  %v3175_v25 = vpop.permute.xlu0 %3174 }
 0x318   :  { %v3361_v37 = vadd.f32 %v3175_v25, %v2773_v21  ;;  %v3362_v14 = vadd.f32 %v3175_v25, %v2774_v45  ;;  %v3883_v21 = vld [vmem:[%s8521_s0 + $0x4a8] sm:$0xff] }
 0x319   :  { %3507 = vst [vmem:[%s8524_s3 + $0x420] sm:$0xff] %v3339_v35  ;;  %3508 = vst.msk [vmem:[%s8524_s3 + $0x428] sm:$0xff] %vm182_vm0, %v3340_v43  ;;  %v2768_v10 = vmul.f32 %v3883_v21, %v7139_v51  ;;  %v3884_v35 = vld [vmem:[%s8521_s0 + $0x4c0] sm:$0xff]  ;;  %v3885_v25 = vld [vmem:[%s8521_s0 + $0x4c8] sm:$0xff] }
 0x31a   :  { %3529 = vst [vmem:[%s8524_s3 + $0x4d0] sm:$0xff] %v3361_v37  ;;  %3530 = vst.msk [vmem:[%s8524_s3 + $0x4d8] sm:$0xff] %vm182_vm0, %v3362_v14  ;;  %v3130_v53 = vpop.permute.xlu1 %3129  ;;  %v2771_v43 = vmul.f32 %v3884_v35, %v7166_v34  ;;  %v2772_v37 = vmul.f32 %v3885_v25, %v7166_v34  ;;  %v3887_v34 = vld [vmem:[%s8521_s0 + $0x4e8] sm:$0xff] }
 0x31b   :  { %v3343_v36 = vadd.f32 %v3130_v53, %v2755_v49  ;;  %v3344_v24 = vadd.f32 %v3130_v53, %v2756_v30  ;;  %v3185_v15 = vpop.permute.xlu0 %3184  ;;  %v3886_v49 = vld [vmem:[%s8521_s0 + $0x4e0] sm:$0xff]  ;;  %v2776_v30 = vmul.f32 %v3887_v34, %v7193_v16 }
 0x31c   :  { %v3365_v59 = vadd.f32 %v3185_v15, %v2777_v8  ;;  %v3366_v52 = vadd.f32 %v3185_v15, %v2778_v0  ;;  %v2775_v17 = vmul.f32 %v3886_v49, %v7193_v16  ;;  %v2779_v0 = vmul.f32 %v3888_v42, %v7220_v4  ;;  %v3889_v16 = vld [vmem:[%s8521_s0 + $0x508] sm:$0xff] }
 0x31d   :  { %3511 = vst [vmem:[%s8524_s3 + $0x440] sm:$0xff] %v3343_v36  ;;  %3512 = vst.msk [vmem:[%s8524_s3 + $0x448] sm:$0xff] %vm182_vm0, %v3344_v24  ;;  %v2780_v53 = vmul.f32 %v3889_v16, %v7220_v4  ;;  %v3891_v4 = vld [vmem:[%s8521_s0 + $0x528] sm:$0xff] }
 0x31e   :  { %3533 = vst [vmem:[%s8524_s3 + $0x4f0] sm:$0xff] %v3365_v59  ;;  %3534 = vst.msk [vmem:[%s8524_s3 + $0x4f8] sm:$0xff] %vm182_vm0, %v3366_v52  ;;  %v3140_v7 = vpop.permute.xlu1 %3139  ;;  %v3890_v59 = vld [vmem:[%s8521_s0 + $0x520] sm:$0xff]  ;;  %v2784_v56 = vmul.f32 %v3891_v4, %v7247_v54 }
 0x31f   :  { %v3347_v61 = vadd.f32 %v3140_v7, %v2759_v41  ;;  %v3348_v32 = vadd.f32 %v3140_v7, %v2760_v1  ;;  %v3195_v23 = vpop.permute.xlu0 %3194  ;;  %v2783_v52 = vmul.f32 %v3890_v59, %v7247_v54 }
 0x320   :  { %v3369_v50 = vadd.f32 %v3195_v23, %v2781_v58  ;;  %v3370_v3 = vadd.f32 %v3195_v23, %v2782_v6 }
 0x321   :  { %3515 = vst [vmem:[%s8524_s3 + $0x460] sm:$0xff] %v3347_v61  ;;  %3516 = vst.msk [vmem:[%s8524_s3 + $0x468] sm:$0xff] %vm182_vm0, %v3348_v32 }
 0x322   :  { %3537 = vst [vmem:[%s8524_s3 + $0x510] sm:$0xff] %v3369_v50  ;;  %3538 = vst.msk [vmem:[%s8524_s3 + $0x518] sm:$0xff] %vm182_vm0, %v3370_v3  ;;  %v3150_v48 = vpop.permute.xlu1 %3149 }
 0x323   :  { %v3351_v20 = vadd.f32 %v3150_v48, %v2763_v63  ;;  %v3352_v18 = vadd.f32 %v3150_v48, %v2764_v13  ;;  %v3205_v44 = vpop.permute.xlu0 %3204 }
 0x324   :  { %v3373_v19 = vadd.f32 %v3205_v44, %v2785_v33  ;;  %v3374_v28 = vadd.f32 %v3205_v44, %v2786_v40 }
 0x325   :  { %3519 = vst [vmem:[%s8524_s3 + $0x480] sm:$0xff] %v3351_v20  ;;  %3520 = vst.msk [vmem:[%s8524_s3 + $0x488] sm:$0xff] %vm182_vm0, %v3352_v18 }
 0x326   :  { %3541 = vst [vmem:[%s8524_s3 + $0x530] sm:$0xff] %v3373_v19  ;;  %3542 = vst.msk [vmem:[%s8524_s3 + $0x538] sm:$0xff] %vm182_vm0, %v3374_v28  ;;  %v3160_v45 = vpop.permute.xlu1 %3159 }
 0x327   :  { %v3355_v51 = vadd.f32 %v3160_v45, %v2767_v9  ;;  %v3356_v27 = vadd.f32 %v3160_v45, %v2768_v10 }
 0x329   :  { %3523 = vst [vmem:[%s8524_s3 + $0x4a0] sm:$0xff] %v3355_v51  ;;  %3524 = vst.msk [vmem:[%s8524_s3 + $0x4a8] sm:$0xff] %vm182_vm0, %v3356_v27 }
 0x32a   :  { %v3170_v14 = vpop.permute.xlu1 %3169 }
 0x32b   :  { %v3359_v55 = vadd.f32 %v3170_v14, %v2771_v43  ;;  %v3360_v29 = vadd.f32 %v3170_v14, %v2772_v37 }
 0x32d   :  { %3527 = vst [vmem:[%s8524_s3 + $0x4c0] sm:$0xff] %v3359_v55  ;;  %3528 = vst.msk [vmem:[%s8524_s3 + $0x4c8] sm:$0xff] %vm182_vm0, %v3360_v29 }
 0x32e   :  { %v3180_v12 = vpop.permute.xlu1 %3179 }
 0x32f   :  { %v3363_v26 = vadd.f32 %v3180_v12, %v2775_v17  ;;  %v3364_v8 = vadd.f32 %v3180_v12, %v2776_v30 }
 0x331   :  { %3531 = vst [vmem:[%s8524_s3 + $0x4e0] sm:$0xff] %v3363_v26  ;;  %3532 = vst.msk [vmem:[%s8524_s3 + $0x4e8] sm:$0xff] %vm182_vm0, %v3364_v8 }
 0x332   :  { %v3190_v36 = vpop.permute.xlu1 %3189 }
 0x333   :  { %v3367_v24 = vadd.f32 %v3190_v36, %v2779_v0  ;;  %v3368_v15 = vadd.f32 %v3190_v36, %v2780_v53 }
 0x335   :  { %3535 = vst [vmem:[%s8524_s3 + $0x500] sm:$0xff] %v3367_v24  ;;  %3536 = vst.msk [vmem:[%s8524_s3 + $0x508] sm:$0xff] %vm182_vm0, %v3368_v15 }
 0x336   :  { %v3200_v60 = vpop.permute.xlu1 %3199 }
 0x337   :  { %v3371_v41 = vadd.f32 %v3200_v60, %v2783_v52  ;;  %v3372_v46 = vadd.f32 %v3200_v60, %v2784_v56 }
 0x339   :  { %3539 = vst [vmem:[%s8524_s3 + $0x520] sm:$0xff] %v3371_v41  ;;  %3540 = vst.msk [vmem:[%s8524_s3 + $0x528] sm:$0xff] %vm182_vm0, %v3372_v46 }

</bundles_post_ra>
